<compile_context>
chip_gen: v7x
topology: tpu7x:2x2x1
jax: 0.10.0
libtpu: 0.0.40
codegen_flags: <defaults>
</compile_context>

<pallas_src>
import math
import jax
import jax.numpy as jnp
import numpy as np
from jax import lax
from jax.experimental import pallas as pl
from jax.experimental.pallas import tpu as pltpu

# ---------------- config (small, consistent with MRUBlock.__init__) ----------
B, T = 2, 8
E = 64                      # hidden_size == embed_size == state_size
H = 4                       # num_heads
SHS = E // H                # state_head_size = 16 (perfect square)
O = math.isqrt(SHS)         # state_head_order = 4
C = E // (O * H)            # embedding_chunk_size = 4
J = H * O * O               # flattened per-token state-matrix width = 64
FFN = 4 * E                 # assumed MLP hidden width
DEPTH = 2
EPS = 1e-5
UPDATE_SCALE = 0.01 * (1.0 / O) * (E / C)     # state_matrices_update_scale
OUT_SCALE = float(E) / O                      # embed_size / state_head_order
NS = O + O * O              # scan streams: B_j (j < O) then C_{j,j'}
ZW = NS * J                 # width of the folded stream matmul output


# ------------------------------ fused kernel ---------------------------------
def mru_fused_kernel(x_ref, g1_ref, wstream_ref, bstream_ref, a0_ref,
                     wdown_ref, wout_ref, g2_ref, wffup_ref, wffdn_ref,
                     y_ref, s_ref, z_ref):
    f32 = jnp.float32
    x = x_ref[0]                                               # (T, E)

    # ---- mru_norm (LayerNorm, no bias) ----
    mu = jnp.mean(x, axis=-1, keepdims=True)
    var = jnp.mean(jnp.square(x - mu), axis=-1, keepdims=True)
    xn = (x - mu) * lax.rsqrt(var + EPS) * g1_ref[0]

    # ---- head-wise up-projection (block-diag matmul) with the lane permutations
    # needed by the scan folded into the weights host-side: a single lane-dense
    # MXU dot produces all NS permuted "streams" of the per-token head matrices.
    z_ref[...] = (jnp.dot(xn, wstream_ref[...], preferred_element_type=f32)
                  + bstream_ref[0])                            # (T, NS*J)

    # ---- inclusive prefix matrix-product over time (MRU recurrence), vectorized
    # over all heads on the VPU.  With p = h*O*O + i*O + k:
    #   A_j[p]      = S_prev[h, i, j]
    #   B_j[t][p]   = M_t[h, j, k]          -> stream j
    #   C_jj'[t][p] = M_t[h, j, j']         -> stream O + O*j + j'
    #   s_t = sum_j A_j * B_j[t]        ;   A_j'^new = sum_j A_j * C_jj'[t]
    a0 = a0_ref[...]                                           # (O, J) flat-identity A
    a = [a0[j:j + 1, :] for j in range(O)]
    rows = []
    for t in range(T):                                         # T small: static unroll
        s_t = a[0] * z_ref[pl.ds(t, 1), pl.ds(0, J)]
        for j in range(1, O):
            s_t = s_t + a[j] * z_ref[pl.ds(t, 1), pl.ds(j * J, J)]
        rows.append(s_t)
        if t + 1 < T:
            new_a = []
            for j2 in range(O):
                acc = a[0] * z_ref[pl.ds(t, 1), pl.ds((O + j2) * J, J)]
                for j in range(1, O):
                    acc = acc + a[j] * z_ref[pl.ds(t, 1), pl.ds((O + j * O + j2) * J, J)]
                new_a.append(acc)
            a = new_a
    s = jnp.concatenate(rows, axis=0)                          # (T, J) flat states
    s_ref[0] = s

    # ---- down-projection * (E/O), mru_out linear, residual ----
    out = jnp.dot(s, wdown_ref[...], preferred_element_type=f32) * OUT_SCALE
    x1 = x + jnp.dot(out, wout_ref[...], preferred_element_type=f32)

    # ---- ffn_norm (LayerNorm, no bias) + MLP (up -> GELU -> down) + residual ----
    mu2 = jnp.mean(x1, axis=-1, keepdims=True)
    var2 = jnp.mean(jnp.square(x1 - mu2), axis=-1, keepdims=True)
    xn2 = (x1 - mu2) * lax.rsqrt(var2 + EPS) * g2_ref[0]
    h = jax.nn.gelu(jnp.dot(xn2, wffup_ref[...], preferred_element_type=f32))
    y_ref[0] = x1 + jnp.dot(h, wffdn_ref[...], preferred_element_type=f32)


def mru_fused(x, p):
    return pl.pallas_call(
        mru_fused_kernel,
        out_shape=(jax.ShapeDtypeStruct((B, T, E), jnp.float32),
                   jax.ShapeDtypeStruct((B, T, J), jnp.float32)),
        grid=(B,),
        in_specs=[
            pl.BlockSpec((1, T, E), lambda b: (b, 0, 0)),      # x
            pl.BlockSpec((1, E), lambda b: (0, 0)),            # gamma_mru
            pl.BlockSpec((E, ZW), lambda b: (0, 0)),           # folded up-proj streams
            pl.BlockSpec((1, ZW), lambda b: (0, 0)),           # stream biases (identity offsets)
            pl.BlockSpec((O, J), lambda b: (0, 0)),            # A-state init (flat identity)
            pl.BlockSpec((J, E), lambda b: (0, 0)),            # block-diag down-proj
            pl.BlockSpec((E, E), lambda b: (0, 0)),            # mru_out weight (pre-transposed)
            pl.BlockSpec((1, E), lambda b: (0, 0)),            # gamma_ffn
            pl.BlockSpec((E, FFN), lambda b: (0, 0)),          # ffn up (pre-transposed)
            pl.BlockSpec((FFN, E), lambda b: (0, 0)),          # ffn down (pre-transposed)
        ],
        out_specs=(pl.BlockSpec((1, T, E), lambda b: (b, 0, 0)),
                   pl.BlockSpec((1, T, J), lambda b: (b, 0, 0))),
        scratch_shapes=[pltpu.VMEM((T, ZW), jnp.float32)],
        compiler_params=pltpu.CompilerParams(
            dimension_semantics=("parallel",)),                # batch across v7x's 2 TCs
    )(x, p['gamma_mru'][None], p['w_streams'], p['b_streams'], p['a_init'],
      p['wdown_big'], p['w_out_t'], p['gamma_ffn'][None],
      p['w_ffn_up_t'], p['w_ffn_dn_t'])


# ----------------------------- parameter setup -------------------------------
def build_wup_big(up):
    # (H, C, O) -> block-diagonal (E, J):  W[h*O*C+o*C+c, h*O*O+o*O+p] = up[h,c,p]
    w = np.zeros((E, J), np.float32)
    upn = np.asarray(up)
    for h in range(H):
        for o in range(O):
            r, col = h * O * C + o * C, h * O * O + o * O
            w[r:r + C, col:col + O] = upn[h]
    return jnp.asarray(w)


def build_wdown_big(down):
    # (H, O, C) -> block-diagonal (J, E):  W[h*O*O+o*O+p, h*O*C+o*C+c] = down[h,p,c]
    w = np.zeros((J, E), np.float32)
    dn = np.asarray(down)
    for h in range(H):
        for o in range(O):
            r, col = h * O * O + o * O, h * O * C + o * C
            w[r:r + O, col:col + C] = dn[h]
    return jnp.asarray(w)


def build_scan_streams(wup_big, eye_flat):
    """Fold constant lane-permutation matrices (and UPDATE_SCALE / +I offset) into
    the up-projection so the in-kernel scan is pure lane-dense VPU math."""
    p = np.arange(J)
    base = (p // (O * O)) * (O * O)      # start of this lane's head block
    k = p % O                            # column index inside the head matrix
    i = (p % (O * O)) // O               # row index inside the head matrix
    w = np.asarray(wup_big, np.float32) * UPDATE_SCALE          # (E, J)
    e = np.asarray(eye_flat, np.float32)                        # (J,)
    srcs = []
    for j in range(O):                   # B_j[p]     = M[base + O*j + k]
        srcs.append(base + O * j + k)
    for j in range(O):                   # C_{j,j'}[p] = M[base + O*j + j']
        for j2 in range(O):
            srcs.append(base + O * j + j2)
    w_streams = np.concatenate([w[:, s] for s in srcs], axis=1)        # (E, NS*J)
    b_streams = np.concatenate([e[s] for s in srcs], axis=0)[None, :]  # (1, NS*J)
    a_init = (i[None, :] == np.arange(O)[:, None]).astype(np.float32)  # (O, J)
    return jnp.asarray(w_streams), jnp.asarray(b_streams), jnp.asarray(a_init)


def init_params(key):
    ks = jax.random.split(key, 6)
    # NOTE: torch init of state_matrices_up is zeros; use a small deterministic
    # normal so the scan is non-trivial in this synthetic test.
    up = 0.02 * jax.random.normal(ks[0], (H, C, O), jnp.float32)
    down_std = 0.02 * math.sqrt(E) / (E / O)
    down = down_std * jax.random.normal(ks[1], (H, O, C), jnp.float32)
    w_out = (0.02 / math.sqrt(DEPTH)) * jax.random.normal(ks[2], (E, E), jnp.float32)
    # TODO(synk): DENSE_REGISTRY 'mlp' internals unknown; assume up->GELU->down, no bias.
    w_ffn_up = 0.02 * jax.random.normal(ks[3], (FFN, E), jnp.float32)
    w_ffn_dn = (0.02 / math.sqrt(DEPTH)) * jax.random.normal(ks[4], (E, FFN), jnp.float32)
    eye_flat = jnp.tile(jnp.eye(O, dtype=jnp.float32).reshape(-1), (H,))  # (J,)
    wup_big = build_wup_big(up)
    wdown_big = build_wdown_big(down)
    w_streams, b_streams, a_init = build_scan_streams(wup_big, eye_flat)
    return dict(
        # reference-side parameters
        up=up, down=down, w_out=w_out,
        gamma_mru=jnp.ones((E,), jnp.float32),
        gamma_ffn=jnp.ones((E,), jnp.float32),
        w_ffn_up=w_ffn_up, w_ffn_dn=w_ffn_dn,
        # kernel-side parameters (pre-folded / pre-transposed ONCE at init)
        wdown_big=wdown_big,
        w_out_t=w_out.T,
        w_ffn_up_t=w_ffn_up.T,
        w_ffn_dn_t=w_ffn_dn.T,
        w_streams=w_streams, b_streams=b_streams, a_init=a_init,
    )


# ----------------------------- forward ---------------------------------------
def mru_block_forward(inputs, attention_mask, params,
                      past_key_values=None, current_state=None):
    del attention_mask, past_key_values
    # TODO(synk): current_state (last_state) concatenation path not exercised here.
    y, states_flat = mru_fused(inputs, params)                  # (B,T,E), (B,T,J)
    # states_flat[b, t, h*O*O + i*O + k] == S_t^{(h)}[i, k]; the flat layout is a
    # contiguous (T, H, O, O) view, so no transpose is needed.
    # Mirrors the PyTorch module's `states[-1]` (indexes the batch axis).
    new_state = states_flat[-1].reshape(T, H, O, O)
    return y, None, new_state, 0


# --------------------------- pure-JAX reference -------------------------------
def reference_forward(x, p):
    hp = jax.lax.Precision.HIGHEST

    def ln(v, g):
        mu = v.mean(-1, keepdims=True)
        var = ((v - mu) ** 2).mean(-1, keepdims=True)
        return (v - mu) / jnp.sqrt(var + EPS) * g

    xn = ln(x, p['gamma_mru'])
    r = xn.reshape(B, T, H, O, C)
    new_m = jnp.einsum('bthoc,hcp->bthop', r, p['up'], precision=hp) * UPDATE_SCALE
    new_m = new_m + jnp.eye(O, dtype=jnp.float32)

    def step(carry, m):  # inclusive left-to-right prefix matrix product
        nxt = jnp.einsum('bhij,bhjk->bhik', carry, m, precision=hp)
        return nxt, nxt

    init = jnp.broadcast_to(jnp.eye(O, dtype=jnp.float32), (B, H, O, O))
    _, states_t = lax.scan(step, init, new_m.transpose(1, 0, 2, 3, 4))
    states = states_t.transpose(1, 0, 2, 3, 4)                      # (B,T,H,O,O)
    out = (jnp.einsum('bthop,hpc->bthoc', states, p['down'], precision=hp)
           * OUT_SCALE).reshape(B, T, E)
    mru_o = jnp.einsum('bte,fe->btf', out, p['w_out'], precision=hp)
    x1 = x + mru_o
    h = jax.nn.gelu(jnp.einsum('bte,fe->btf', ln(x1, p['gamma_ffn']),
                               p['w_ffn_up'], precision=hp))
    y = x1 + jnp.einsum('btf,ef->bte', h, p['w_ffn_dn'], precision=hp)
    return y, states[-1]


# ----------------------------- main -------------------------------------------
if __name__ == "__main__":
    key = jax.random.PRNGKey(0)
    kx, kp = jax.random.split(key)
    inputs = jax.random.normal(kx, (B, T, E), jnp.float32)
    attention_mask = jnp.ones((B, T), jnp.float32)  # unused by forward
    params = init_params(kp)

    fwd = jax.jit(lambda x, m: mru_block_forward(x, m, params))
    y, _, new_state, _ = fwd(inputs, attention_mask)
    jax.block_until_ready(y)
    jax.block_until_ready(new_state)

    y_ref, state_ref = reference_forward(inputs, params)
    assert y.shape == (B, T, E) and new_state.shape == (T, H, O, O)
    assert np.all(np.isfinite(np.asarray(y)))
    np.testing.assert_allclose(np.asarray(y), np.asarray(y_ref), rtol=1e-2, atol=1e-2)
    np.testing.assert_allclose(np.asarray(new_state), np.asarray(state_ref),
                               rtol=1e-2, atol=1e-2)
    print("KERNEL_OK")
</pallas_src>

<mosaic_0001>
module attributes {stable_mosaic.version = 11 : i64} {
  func.func @mru_fused_kernel(%arg0: i32, %arg1: memref<1x8x64xf32, #tpu.memory_space<vmem>>, %arg2: memref<1x64xf32, #tpu.memory_space<vmem>>, %arg3: memref<64x1280xf32, #tpu.memory_space<vmem>>, %arg4: memref<1x1280xf32, #tpu.memory_space<vmem>>, %arg5: memref<4x64xf32, #tpu.memory_space<vmem>>, %arg6: memref<64x64xf32, #tpu.memory_space<vmem>>, %arg7: memref<64x64xf32, #tpu.memory_space<vmem>>, %arg8: memref<1x64xf32, #tpu.memory_space<vmem>>, %arg9: memref<64x256xf32, #tpu.memory_space<vmem>>, %arg10: memref<256x64xf32, #tpu.memory_space<vmem>>, %arg11: memref<1x8x64xf32, #tpu.memory_space<vmem>>, %arg12: memref<1x8x64xf32, #tpu.memory_space<vmem>>, %arg13: memref<8x1280xf32, #tpu.memory_space<vmem>>) attributes {dimension_semantics = [#tpu.dimension_semantics<parallel>], iteration_bounds = array<i64: 2>, scalar_prefetch = 0 : i64, scratch_operands = 1 : i64, tpu.core_type = #tpu.core_type<tc>, window_params = [{transform_indices = @transform_0, window_bounds = array<i64: 1, 8, 64>}, {pipeline_mode = #tpu.pipeline_mode<synchronous>, transform_indices = @transform_1, window_bounds = array<i64: 1, 64>}, {pipeline_mode = #tpu.pipeline_mode<synchronous>, transform_indices = @transform_2, window_bounds = array<i64: 64, 1280>}, {pipeline_mode = #tpu.pipeline_mode<synchronous>, transform_indices = @transform_3, window_bounds = array<i64: 1, 1280>}, {pipeline_mode = #tpu.pipeline_mode<synchronous>, transform_indices = @transform_4, window_bounds = array<i64: 4, 64>}, {pipeline_mode = #tpu.pipeline_mode<synchronous>, transform_indices = @transform_5, window_bounds = array<i64: 64, 64>}, {pipeline_mode = #tpu.pipeline_mode<synchronous>, transform_indices = @transform_6, window_bounds = array<i64: 64, 64>}, {pipeline_mode = #tpu.pipeline_mode<synchronous>, transform_indices = @transform_7, window_bounds = array<i64: 1, 64>}, {pipeline_mode = #tpu.pipeline_mode<synchronous>, transform_indices = @transform_8, window_bounds = array<i64: 64, 256>}, {pipeline_mode = #tpu.pipeline_mode<synchronous>, transform_indices = @transform_9, window_bounds = array<i64: 256, 64>}, {transform_indices = @transform_10, window_bounds = array<i64: 1, 8, 64>}, {transform_indices = @transform_11, window_bounds = array<i64: 1, 8, 64>}]} {
    %c0 = arith.constant 0 : index
    %c0_0 = arith.constant 0 : index
    %c0_1 = arith.constant 0 : index
    %0 = vector.load %arg1[%c0, %c0_0, %c0_1] : memref<1x8x64xf32, #tpu.memory_space<vmem>>, vector<1x8x64xf32>
    %1 = vector.shape_cast %0 : vector<1x8x64xf32> to vector<8x64xf32>
    %cst = arith.constant dense<0.000000e+00> : vector<8xf32>
    %2 = vector.multi_reduction <add>, %1, %cst [1] : vector<8x64xf32> to vector<8xf32>
    %3 = vector.shape_cast %2 : vector<8xf32> to vector<8x1xf32>
    %cst_2 = arith.constant 6.400000e+01 : f32
    %4 = vector.broadcast %cst_2 : f32 to vector<8x1xf32>
    %5 = arith.divf %3, %4 : vector<8x1xf32>
    %6 = vector.broadcast %5 : vector<8x1xf32> to vector<8x64xf32>
    %7 = arith.subf %1, %6 : vector<8x64xf32>
    %8 = arith.mulf %7, %7 : vector<8x64xf32>
    %cst_3 = arith.constant dense<0.000000e+00> : vector<8xf32>
    %9 = vector.multi_reduction <add>, %8, %cst_3 [1] : vector<8x64xf32> to vector<8xf32>
    %10 = vector.shape_cast %9 : vector<8xf32> to vector<8x1xf32>
    %cst_4 = arith.constant 6.400000e+01 : f32
    %11 = vector.broadcast %cst_4 : f32 to vector<8x1xf32>
    %12 = arith.divf %10, %11 : vector<8x1xf32>
    %13 = vector.broadcast %5 : vector<8x1xf32> to vector<8x64xf32>
    %14 = arith.subf %1, %13 : vector<8x64xf32>
    %cst_5 = arith.constant 9.99999974E-6 : f32
    %15 = vector.broadcast %cst_5 : f32 to vector<8x1xf32>
    %16 = arith.addf %12, %15 : vector<8x1xf32>
    %17 = math.rsqrt %16 : vector<8x1xf32>
    %18 = vector.broadcast %17 : vector<8x1xf32> to vector<8x64xf32>
    %19 = arith.mulf %14, %18 : vector<8x64xf32>
    %c0_6 = arith.constant 0 : index
    %c0_7 = arith.constant 0 : index
    %20 = vector.load %arg2[%c0_6, %c0_7] : memref<1x64xf32, #tpu.memory_space<vmem>>, vector<1x64xf32>
    %21 = vector.shape_cast %20 : vector<1x64xf32> to vector<64xf32>
    %22 = vector.shape_cast %21 : vector<64xf32> to vector<1x64xf32>
    %23 = vector.broadcast %22 : vector<1x64xf32> to vector<8x64xf32>
    %24 = arith.mulf %19, %23 : vector<8x64xf32>
    %c0_8 = arith.constant 0 : index
    %c0_9 = arith.constant 0 : index
    %25 = vector.load %arg3[%c0_8, %c0_9] : memref<64x1280xf32, #tpu.memory_space<vmem>>, vector<64x1280xf32>
    %cst_10 = arith.constant dense<0.000000e+00> : vector<8x1280xf32>
    %26 = tpu.matmul %24, %25, %cst_10 {dimension_numbers = #tpu.dot_dimension_numbers<[1], [0], [0], [1], [0, 0, 1, 1], [], []>} : vector<8x64xf32>, vector<64x1280xf32>, vector<8x1280xf32> -> vector<8x1280xf32>
    %c0_11 = arith.constant 0 : index
    %c0_12 = arith.constant 0 : index
    %27 = vector.load %arg4[%c0_11, %c0_12] : memref<1x1280xf32, #tpu.memory_space<vmem>>, vector<1x1280xf32>
    %28 = vector.shape_cast %27 : vector<1x1280xf32> to vector<1280xf32>
    %29 = vector.shape_cast %28 : vector<1280xf32> to vector<1x1280xf32>
    %30 = vector.broadcast %29 : vector<1x1280xf32> to vector<8x1280xf32>
    %31 = arith.addf %26, %30 : vector<8x1280xf32>
    %c0_13 = arith.constant 0 : index
    %c0_14 = arith.constant 0 : index
    %32 = vector.load %arg13[%c0_13, %c0_14] : memref<8x1280xf32, #tpu.memory_space<vmem>>, vector<8x1280xf32>
    tpu.vector_store %arg13[%c0_13, %c0_14], %31 {strides = array<i32>} : memref<8x1280xf32, #tpu.memory_space<vmem>>, vector<8x1280xf32>,
    %c0_15 = arith.constant 0 : index
    %c0_16 = arith.constant 0 : index
    %33 = vector.load %arg5[%c0_15, %c0_16] : memref<4x64xf32, #tpu.memory_space<vmem>>, vector<4x64xf32>
    %34 = vector.extract_strided_slice %33 {offsets = [0, 0], sizes = [1, 64], strides = [1, 1]} : vector<4x64xf32> to vector<1x64xf32>
    %35 = vector.extract_strided_slice %33 {offsets = [1, 0], sizes = [1, 64], strides = [1, 1]} : vector<4x64xf32> to vector<1x64xf32>
    %36 = vector.extract_strided_slice %33 {offsets = [2, 0], sizes = [1, 64], strides = [1, 1]} : vector<4x64xf32> to vector<1x64xf32>
    %37 = vector.extract_strided_slice %33 {offsets = [3, 0], sizes = [1, 64], strides = [1, 1]} : vector<4x64xf32> to vector<1x64xf32>
    %c0_17 = arith.constant 0 : index
    %c0_18 = arith.constant 0 : index
    %38 = vector.load %arg13[%c0_17, %c0_18] : memref<8x1280xf32, #tpu.memory_space<vmem>>, vector<1x64xf32>
    %39 = arith.mulf %34, %38 : vector<1x64xf32>
    %c0_19 = arith.constant 0 : index
    %c64 = arith.constant 64 : index
    %40 = vector.load %arg13[%c0_19, %c64] : memref<8x1280xf32, #tpu.memory_space<vmem>>, vector<1x64xf32>
    %41 = arith.mulf %35, %40 : vector<1x64xf32>
    %42 = arith.addf %39, %41 : vector<1x64xf32>
    %c0_20 = arith.constant 0 : index
    %c128 = arith.constant 128 : index
    %43 = vector.load %arg13[%c0_20, %c128] : memref<8x1280xf32, #tpu.memory_space<vmem>>, vector<1x64xf32>
    %44 = arith.mulf %36, %43 : vector<1x64xf32>
    %45 = arith.addf %42, %44 : vector<1x64xf32>
    %c0_21 = arith.constant 0 : index
    %c192 = arith.constant 192 : index
    %46 = vector.load %arg13[%c0_21, %c192] : memref<8x1280xf32, #tpu.memory_space<vmem>>, vector<1x64xf32>
    %47 = arith.mulf %37, %46 : vector<1x64xf32>
    %48 = arith.addf %45, %47 : vector<1x64xf32>
    %c0_22 = arith.constant 0 : index
    %c256 = arith.constant 256 : index
    %49 = vector.load %arg13[%c0_22, %c256] : memref<8x1280xf32, #tpu.memory_space<vmem>>, vector<1x64xf32>
    %50 = arith.mulf %34, %49 : vector<1x64xf32>
    %c0_23 = arith.constant 0 : index
    %c512 = arith.constant 512 : index
    %51 = vector.load %arg13[%c0_23, %c512] : memref<8x1280xf32, #tpu.memory_space<vmem>>, vector<1x64xf32>
    %52 = arith.mulf %35, %51 : vector<1x64xf32>
    %53 = arith.addf %50, %52 : vector<1x64xf32>
    %c0_24 = arith.constant 0 : index
    %c768 = arith.constant 768 : index
    %54 = vector.load %arg13[%c0_24, %c768] : memref<8x1280xf32, #tpu.memory_space<vmem>>, vector<1x64xf32>
    %55 = arith.mulf %36, %54 : vector<1x64xf32>
    %56 = arith.addf %53, %55 : vector<1x64xf32>
    %c0_25 = arith.constant 0 : index
    %c1024 = arith.constant 1024 : index
    %57 = vector.load %arg13[%c0_25, %c1024] : memref<8x1280xf32, #tpu.memory_space<vmem>>, vector<1x64xf32>
    %58 = arith.mulf %37, %57 : vector<1x64xf32>
    %59 = arith.addf %56, %58 : vector<1x64xf32>
    %c0_26 = arith.constant 0 : index
    %c320 = arith.constant 320 : index
    %60 = vector.load %arg13[%c0_26, %c320] : memref<8x1280xf32, #tpu.memory_space<vmem>>, vector<1x64xf32>
    %61 = arith.mulf %34, %60 : vector<1x64xf32>
    %c0_27 = arith.constant 0 : index
    %c576 = arith.constant 576 : index
    %62 = vector.load %arg13[%c0_27, %c576] : memref<8x1280xf32, #tpu.memory_space<vmem>>, vector<1x64xf32>
    %63 = arith.mulf %35, %62 : vector<1x64xf32>
    %64 = arith.addf %61, %63 : vector<1x64xf32>
    %c0_28 = arith.constant 0 : index
    %c832 = arith.constant 832 : index
    %65 = vector.load %arg13[%c0_28, %c832] : memref<8x1280xf32, #tpu.memory_space<vmem>>, vector<1x64xf32>
    %66 = arith.mulf %36, %65 : vector<1x64xf32>
    %67 = arith.addf %64, %66 : vector<1x64xf32>
    %c0_29 = arith.constant 0 : index
    %c1088 = arith.constant 1088 : index
    %68 = vector.load %arg13[%c0_29, %c1088] : memref<8x1280xf32, #tpu.memory_space<vmem>>, vector<1x64xf32>
    %69 = arith.mulf %37, %68 : vector<1x64xf32>
    %70 = arith.addf %67, %69 : vector<1x64xf32>
    %c0_30 = arith.constant 0 : index
    %c384 = arith.constant 384 : index
    %71 = vector.load %arg13[%c0_30, %c384] : memref<8x1280xf32, #tpu.memory_space<vmem>>, vector<1x64xf32>
    %72 = arith.mulf %34, %71 : vector<1x64xf32>
    %c0_31 = arith.constant 0 : index
    %c640 = arith.constant 640 : index
    %73 = vector.load %arg13[%c0_31, %c640] : memref<8x1280xf32, #tpu.memory_space<vmem>>, vector<1x64xf32>
    %74 = arith.mulf %35, %73 : vector<1x64xf32>
    %75 = arith.addf %72, %74 : vector<1x64xf32>
    %c0_32 = arith.constant 0 : index
    %c896 = arith.constant 896 : index
    %76 = vector.load %arg13[%c0_32, %c896] : memref<8x1280xf32, #tpu.memory_space<vmem>>, vector<1x64xf32>
    %77 = arith.mulf %36, %76 : vector<1x64xf32>
    %78 = arith.addf %75, %77 : vector<1x64xf32>
    %c0_33 = arith.constant 0 : index
    %c1152 = arith.constant 1152 : index
    %79 = vector.load %arg13[%c0_33, %c1152] : memref<8x1280xf32, #tpu.memory_space<vmem>>, vector<1x64xf32>
    %80 = arith.mulf %37, %79 : vector<1x64xf32>
    %81 = arith.addf %78, %80 : vector<1x64xf32>
    %c0_34 = arith.constant 0 : index
    %c448 = arith.constant 448 : index
    %82 = vector.load %arg13[%c0_34, %c448] : memref<8x1280xf32, #tpu.memory_space<vmem>>, vector<1x64xf32>
    %83 = arith.mulf %34, %82 : vector<1x64xf32>
    %c0_35 = arith.constant 0 : index
    %c704 = arith.constant 704 : index
    %84 = vector.load %arg13[%c0_35, %c704] : memref<8x1280xf32, #tpu.memory_space<vmem>>, vector<1x64xf32>
    %85 = arith.mulf %35, %84 : vector<1x64xf32>
    %86 = arith.addf %83, %85 : vector<1x64xf32>
    %c0_36 = arith.constant 0 : index
    %c960 = arith.constant 960 : index
    %87 = vector.load %arg13[%c0_36, %c960] : memref<8x1280xf32, #tpu.memory_space<vmem>>, vector<1x64xf32>
    %88 = arith.mulf %36, %87 : vector<1x64xf32>
    %89 = arith.addf %86, %88 : vector<1x64xf32>
    %c0_37 = arith.constant 0 : index
    %c1216 = arith.constant 1216 : index
    %90 = vector.load %arg13[%c0_37, %c1216] : memref<8x1280xf32, #tpu.memory_space<vmem>>, vector<1x64xf32>
    %91 = arith.mulf %37, %90 : vector<1x64xf32>
    %92 = arith.addf %89, %91 : vector<1x64xf32>
    %c1 = arith.constant 1 : index
    %c0_38 = arith.constant 0 : index
    %93 = vector.load %arg13[%c1, %c0_38] : memref<8x1280xf32, #tpu.memory_space<vmem>>, vector<1x64xf32>
    %94 = arith.mulf %59, %93 : vector<1x64xf32>
    %c1_39 = arith.constant 1 : index
    %c64_40 = arith.constant 64 : index
    %95 = vector.load %arg13[%c1_39, %c64_40] : memref<8x1280xf32, #tpu.memory_space<vmem>>, vector<1x64xf32>
    %96 = arith.mulf %70, %95 : vector<1x64xf32>
    %97 = arith.addf %94, %96 : vector<1x64xf32>
    %c1_41 = arith.constant 1 : index
    %c128_42 = arith.constant 128 : index
    %98 = vector.load %arg13[%c1_41, %c128_42] : memref<8x1280xf32, #tpu.memory_space<vmem>>, vector<1x64xf32>
    %99 = arith.mulf %81, %98 : vector<1x64xf32>
    %100 = arith.addf %97, %99 : vector<1x64xf32>
    %c1_43 = arith.constant 1 : index
    %c192_44 = arith.constant 192 : index
    %101 = vector.load %arg13[%c1_43, %c192_44] : memref<8x1280xf32, #tpu.memory_space<vmem>>, vector<1x64xf32>
    %102 = arith.mulf %92, %101 : vector<1x64xf32>
    %103 = arith.addf %100, %102 : vector<1x64xf32>
    %c1_45 = arith.constant 1 : index
    %c256_46 = arith.constant 256 : index
    %104 = vector.load %arg13[%c1_45, %c256_46] : memref<8x1280xf32, #tpu.memory_space<vmem>>, vector<1x64xf32>
    %105 = arith.mulf %59, %104 : vector<1x64xf32>
    %c1_47 = arith.constant 1 : index
    %c512_48 = arith.constant 512 : index
    %106 = vector.load %arg13[%c1_47, %c512_48] : memref<8x1280xf32, #tpu.memory_space<vmem>>, vector<1x64xf32>
    %107 = arith.mulf %70, %106 : vector<1x64xf32>
    %108 = arith.addf %105, %107 : vector<1x64xf32>
    %c1_49 = arith.constant 1 : index
    %c768_50 = arith.constant 768 : index
    %109 = vector.load %arg13[%c1_49, %c768_50] : memref<8x1280xf32, #tpu.memory_space<vmem>>, vector<1x64xf32>
    %110 = arith.mulf %81, %109 : vector<1x64xf32>
    %111 = arith.addf %108, %110 : vector<1x64xf32>
    %c1_51 = arith.constant 1 : index
    %c1024_52 = arith.constant 1024 : index
    %112 = vector.load %arg13[%c1_51, %c1024_52] : memref<8x1280xf32, #tpu.memory_space<vmem>>, vector<1x64xf32>
    %113 = arith.mulf %92, %112 : vector<1x64xf32>
    %114 = arith.addf %111, %113 : vector<1x64xf32>
    %c1_53 = arith.constant 1 : index
    %c320_54 = arith.constant 320 : index
    %115 = vector.load %arg13[%c1_53, %c320_54] : memref<8x1280xf32, #tpu.memory_space<vmem>>, vector<1x64xf32>
    %116 = arith.mulf %59, %115 : vector<1x64xf32>
    %c1_55 = arith.constant 1 : index
    %c576_56 = arith.constant 576 : index
    %117 = vector.load %arg13[%c1_55, %c576_56] : memref<8x1280xf32, #tpu.memory_space<vmem>>, vector<1x64xf32>
    %118 = arith.mulf %70, %117 : vector<1x64xf32>
    %119 = arith.addf %116, %118 : vector<1x64xf32>
    %c1_57 = arith.constant 1 : index
    %c832_58 = arith.constant 832 : index
    %120 = vector.load %arg13[%c1_57, %c832_58] : memref<8x1280xf32, #tpu.memory_space<vmem>>, vector<1x64xf32>
    %121 = arith.mulf %81, %120 : vector<1x64xf32>
    %122 = arith.addf %119, %121 : vector<1x64xf32>
    %c1_59 = arith.constant 1 : index
    %c1088_60 = arith.constant 1088 : index
    %123 = vector.load %arg13[%c1_59, %c1088_60] : memref<8x1280xf32, #tpu.memory_space<vmem>>, vector<1x64xf32>
    %124 = arith.mulf %92, %123 : vector<1x64xf32>
    %125 = arith.addf %122, %124 : vector<1x64xf32>
    %c1_61 = arith.constant 1 : index
    %c384_62 = arith.constant 384 : index
    %126 = vector.load %arg13[%c1_61, %c384_62] : memref<8x1280xf32, #tpu.memory_space<vmem>>, vector<1x64xf32>
    %127 = arith.mulf %59, %126 : vector<1x64xf32>
    %c1_63 = arith.constant 1 : index
    %c640_64 = arith.constant 640 : index
    %128 = vector.load %arg13[%c1_63, %c640_64] : memref<8x1280xf32, #tpu.memory_space<vmem>>, vector<1x64xf32>
    %129 = arith.mulf %70, %128 : vector<1x64xf32>
    %130 = arith.addf %127, %129 : vector<1x64xf32>
    %c1_65 = arith.constant 1 : index
    %c896_66 = arith.constant 896 : index
    %131 = vector.load %arg13[%c1_65, %c896_66] : memref<8x1280xf32, #tpu.memory_space<vmem>>, vector<1x64xf32>
    %132 = arith.mulf %81, %131 : vector<1x64xf32>
    %133 = arith.addf %130, %132 : vector<1x64xf32>
    %c1_67 = arith.constant 1 : index
    %c1152_68 = arith.constant 1152 : index
    %134 = vector.load %arg13[%c1_67, %c1152_68] : memref<8x1280xf32, #tpu.memory_space<vmem>>, vector<1x64xf32>
    %135 = arith.mulf %92, %134 : vector<1x64xf32>
    %136 = arith.addf %133, %135 : vector<1x64xf32>
    %c1_69 = arith.constant 1 : index
    %c448_70 = arith.constant 448 : index
    %137 = vector.load %arg13[%c1_69, %c448_70] : memref<8x1280xf32, #tpu.memory_space<vmem>>, vector<1x64xf32>
    %138 = arith.mulf %59, %137 : vector<1x64xf32>
    %c1_71 = arith.constant 1 : index
    %c704_72 = arith.constant 704 : index
    %139 = vector.load %arg13[%c1_71, %c704_72] : memref<8x1280xf32, #tpu.memory_space<vmem>>, vector<1x64xf32>
    %140 = arith.mulf %70, %139 : vector<1x64xf32>
    %141 = arith.addf %138, %140 : vector<1x64xf32>
    %c1_73 = arith.constant 1 : index
    %c960_74 = arith.constant 960 : index
    %142 = vector.load %arg13[%c1_73, %c960_74] : memref<8x1280xf32, #tpu.memory_space<vmem>>, vector<1x64xf32>
    %143 = arith.mulf %81, %142 : vector<1x64xf32>
    %144 = arith.addf %141, %143 : vector<1x64xf32>
    %c1_75 = arith.constant 1 : index
    %c1216_76 = arith.constant 1216 : index
    %145 = vector.load %arg13[%c1_75, %c1216_76] : memref<8x1280xf32, #tpu.memory_space<vmem>>, vector<1x64xf32>
    %146 = arith.mulf %92, %145 : vector<1x64xf32>
    %147 = arith.addf %144, %146 : vector<1x64xf32>
    %c2 = arith.constant 2 : index
    %c0_77 = arith.constant 0 : index
    %148 = vector.load %arg13[%c2, %c0_77] : memref<8x1280xf32, #tpu.memory_space<vmem>>, vector<1x64xf32>
    %149 = arith.mulf %114, %148 : vector<1x64xf32>
    %c2_78 = arith.constant 2 : index
    %c64_79 = arith.constant 64 : index
    %150 = vector.load %arg13[%c2_78, %c64_79] : memref<8x1280xf32, #tpu.memory_space<vmem>>, vector<1x64xf32>
    %151 = arith.mulf %125, %150 : vector<1x64xf32>
    %152 = arith.addf %149, %151 : vector<1x64xf32>
    %c2_80 = arith.constant 2 : index
    %c128_81 = arith.constant 128 : index
    %153 = vector.load %arg13[%c2_80, %c128_81] : memref<8x1280xf32, #tpu.memory_space<vmem>>, vector<1x64xf32>
    %154 = arith.mulf %136, %153 : vector<1x64xf32>
    %155 = arith.addf %152, %154 : vector<1x64xf32>
    %c2_82 = arith.constant 2 : index
    %c192_83 = arith.constant 192 : index
    %156 = vector.load %arg13[%c2_82, %c192_83] : memref<8x1280xf32, #tpu.memory_space<vmem>>, vector<1x64xf32>
    %157 = arith.mulf %147, %156 : vector<1x64xf32>
    %158 = arith.addf %155, %157 : vector<1x64xf32>
    %c2_84 = arith.constant 2 : index
    %c256_85 = arith.constant 256 : index
    %159 = vector.load %arg13[%c2_84, %c256_85] : memref<8x1280xf32, #tpu.memory_space<vmem>>, vector<1x64xf32>
    %160 = arith.mulf %114, %159 : vector<1x64xf32>
    %c2_86 = arith.constant 2 : index
    %c512_87 = arith.constant 512 : index
    %161 = vector.load %arg13[%c2_86, %c512_87] : memref<8x1280xf32, #tpu.memory_space<vmem>>, vector<1x64xf32>
    %162 = arith.mulf %125, %161 : vector<1x64xf32>
    %163 = arith.addf %160, %162 : vector<1x64xf32>
    %c2_88 = arith.constant 2 : index
    %c768_89 = arith.constant 768 : index
    %164 = vector.load %arg13[%c2_88, %c768_89] : memref<8x1280xf32, #tpu.memory_space<vmem>>, vector<1x64xf32>
    %165 = arith.mulf %136, %164 : vector<1x64xf32>
    %166 = arith.addf %163, %165 : vector<1x64xf32>
    %c2_90 = arith.constant 2 : index
    %c1024_91 = arith.constant 1024 : index
    %167 = vector.load %arg13[%c2_90, %c1024_91] : memref<8x1280xf32, #tpu.memory_space<vmem>>, vector<1x64xf32>
    %168 = arith.mulf %147, %167 : vector<1x64xf32>
    %169 = arith.addf %166, %168 : vector<1x64xf32>
    %c2_92 = arith.constant 2 : index
    %c320_93 = arith.constant 320 : index
    %170 = vector.load %arg13[%c2_92, %c320_93] : memref<8x1280xf32, #tpu.memory_space<vmem>>, vector<1x64xf32>
    %171 = arith.mulf %114, %170 : vector<1x64xf32>
    %c2_94 = arith.constant 2 : index
    %c576_95 = arith.constant 576 : index
    %172 = vector.load %arg13[%c2_94, %c576_95] : memref<8x1280xf32, #tpu.memory_space<vmem>>, vector<1x64xf32>
    %173 = arith.mulf %125, %172 : vector<1x64xf32>
    %174 = arith.addf %171, %173 : vector<1x64xf32>
    %c2_96 = arith.constant 2 : index
    %c832_97 = arith.constant 832 : index
    %175 = vector.load %arg13[%c2_96, %c832_97] : memref<8x1280xf32, #tpu.memory_space<vmem>>, vector<1x64xf32>
    %176 = arith.mulf %136, %175 : vector<1x64xf32>
    %177 = arith.addf %174, %176 : vector<1x64xf32>
    %c2_98 = arith.constant 2 : index
    %c1088_99 = arith.constant 1088 : index
    %178 = vector.load %arg13[%c2_98, %c1088_99] : memref<8x1280xf32, #tpu.memory_space<vmem>>, vector<1x64xf32>
    %179 = arith.mulf %147, %178 : vector<1x64xf32>
    %180 = arith.addf %177, %179 : vector<1x64xf32>
    %c2_100 = arith.constant 2 : index
    %c384_101 = arith.constant 384 : index
    %181 = vector.load %arg13[%c2_100, %c384_101] : memref<8x1280xf32, #tpu.memory_space<vmem>>, vector<1x64xf32>
    %182 = arith.mulf %114, %181 : vector<1x64xf32>
    %c2_102 = arith.constant 2 : index
    %c640_103 = arith.constant 640 : index
    %183 = vector.load %arg13[%c2_102, %c640_103] : memref<8x1280xf32, #tpu.memory_space<vmem>>, vector<1x64xf32>
    %184 = arith.mulf %125, %183 : vector<1x64xf32>
    %185 = arith.addf %182, %184 : vector<1x64xf32>
    %c2_104 = arith.constant 2 : index
    %c896_105 = arith.constant 896 : index
    %186 = vector.load %arg13[%c2_104, %c896_105] : memref<8x1280xf32, #tpu.memory_space<vmem>>, vector<1x64xf32>
    %187 = arith.mulf %136, %186 : vector<1x64xf32>
    %188 = arith.addf %185, %187 : vector<1x64xf32>
    %c2_106 = arith.constant 2 : index
    %c1152_107 = arith.constant 1152 : index
    %189 = vector.load %arg13[%c2_106, %c1152_107] : memref<8x1280xf32, #tpu.memory_space<vmem>>, vector<1x64xf32>
    %190 = arith.mulf %147, %189 : vector<1x64xf32>
    %191 = arith.addf %188, %190 : vector<1x64xf32>
    %c2_108 = arith.constant 2 : index
    %c448_109 = arith.constant 448 : index
    %192 = vector.load %arg13[%c2_108, %c448_109] : memref<8x1280xf32, #tpu.memory_space<vmem>>, vector<1x64xf32>
    %193 = arith.mulf %114, %192 : vector<1x64xf32>
    %c2_110 = arith.constant 2 : index
    %c704_111 = arith.constant 704 : index
    %194 = vector.load %arg13[%c2_110, %c704_111] : memref<8x1280xf32, #tpu.memory_space<vmem>>, vector<1x64xf32>
    %195 = arith.mulf %125, %194 : vector<1x64xf32>
    %196 = arith.addf %193, %195 : vector<1x64xf32>
    %c2_112 = arith.constant 2 : index
    %c960_113 = arith.constant 960 : index
    %197 = vector.load %arg13[%c2_112, %c960_113] : memref<8x1280xf32, #tpu.memory_space<vmem>>, vector<1x64xf32>
    %198 = arith.mulf %136, %197 : vector<1x64xf32>
    %199 = arith.addf %196, %198 : vector<1x64xf32>
    %c2_114 = arith.constant 2 : index
    %c1216_115 = arith.constant 1216 : index
    %200 = vector.load %arg13[%c2_114, %c1216_115] : memref<8x1280xf32, #tpu.memory_space<vmem>>, vector<1x64xf32>
    %201 = arith.mulf %147, %200 : vector<1x64xf32>
    %202 = arith.addf %199, %201 : vector<1x64xf32>
    %c3 = arith.constant 3 : index
    %c0_116 = arith.constant 0 : index
    %203 = vector.load %arg13[%c3, %c0_116] : memref<8x1280xf32, #tpu.memory_space<vmem>>, vector<1x64xf32>
    %204 = arith.mulf %169, %203 : vector<1x64xf32>
    %c3_117 = arith.constant 3 : index
    %c64_118 = arith.constant 64 : index
    %205 = vector.load %arg13[%c3_117, %c64_118] : memref<8x1280xf32, #tpu.memory_space<vmem>>, vector<1x64xf32>
    %206 = arith.mulf %180, %205 : vector<1x64xf32>
    %207 = arith.addf %204, %206 : vector<1x64xf32>
    %c3_119 = arith.constant 3 : index
    %c128_120 = arith.constant 128 : index
    %208 = vector.load %arg13[%c3_119, %c128_120] : memref<8x1280xf32, #tpu.memory_space<vmem>>, vector<1x64xf32>
    %209 = arith.mulf %191, %208 : vector<1x64xf32>
    %210 = arith.addf %207, %209 : vector<1x64xf32>
    %c3_121 = arith.constant 3 : index
    %c192_122 = arith.constant 192 : index
    %211 = vector.load %arg13[%c3_121, %c192_122] : memref<8x1280xf32, #tpu.memory_space<vmem>>, vector<1x64xf32>
    %212 = arith.mulf %202, %211 : vector<1x64xf32>
    %213 = arith.addf %210, %212 : vector<1x64xf32>
    %c3_123 = arith.constant 3 : index
    %c256_124 = arith.constant 256 : index
    %214 = vector.load %arg13[%c3_123, %c256_124] : memref<8x1280xf32, #tpu.memory_space<vmem>>, vector<1x64xf32>
    %215 = arith.mulf %169, %214 : vector<1x64xf32>
    %c3_125 = arith.constant 3 : index
    %c512_126 = arith.constant 512 : index
    %216 = vector.load %arg13[%c3_125, %c512_126] : memref<8x1280xf32, #tpu.memory_space<vmem>>, vector<1x64xf32>
    %217 = arith.mulf %180, %216 : vector<1x64xf32>
    %218 = arith.addf %215, %217 : vector<1x64xf32>
    %c3_127 = arith.constant 3 : index
    %c768_128 = arith.constant 768 : index
    %219 = vector.load %arg13[%c3_127, %c768_128] : memref<8x1280xf32, #tpu.memory_space<vmem>>, vector<1x64xf32>
    %220 = arith.mulf %191, %219 : vector<1x64xf32>
    %221 = arith.addf %218, %220 : vector<1x64xf32>
    %c3_129 = arith.constant 3 : index
    %c1024_130 = arith.constant 1024 : index
    %222 = vector.load %arg13[%c3_129, %c1024_130] : memref<8x1280xf32, #tpu.memory_space<vmem>>, vector<1x64xf32>
    %223 = arith.mulf %202, %222 : vector<1x64xf32>
    %224 = arith.addf %221, %223 : vector<1x64xf32>
    %c3_131 = arith.constant 3 : index
    %c320_132 = arith.constant 320 : index
    %225 = vector.load %arg13[%c3_131, %c320_132] : memref<8x1280xf32, #tpu.memory_space<vmem>>, vector<1x64xf32>
    %226 = arith.mulf %169, %225 : vector<1x64xf32>
    %c3_133 = arith.constant 3 : index
    %c576_134 = arith.constant 576 : index
    %227 = vector.load %arg13[%c3_133, %c576_134] : memref<8x1280xf32, #tpu.memory_space<vmem>>, vector<1x64xf32>
    %228 = arith.mulf %180, %227 : vector<1x64xf32>
    %229 = arith.addf %226, %228 : vector<1x64xf32>
    %c3_135 = arith.constant 3 : index
    %c832_136 = arith.constant 832 : index
    %230 = vector.load %arg13[%c3_135, %c832_136] : memref<8x1280xf32, #tpu.memory_space<vmem>>, vector<1x64xf32>
    %231 = arith.mulf %191, %230 : vector<1x64xf32>
    %232 = arith.addf %229, %231 : vector<1x64xf32>
    %c3_137 = arith.constant 3 : index
    %c1088_138 = arith.constant 1088 : index
    %233 = vector.load %arg13[%c3_137, %c1088_138] : memref<8x1280xf32, #tpu.memory_space<vmem>>, vector<1x64xf32>
    %234 = arith.mulf %202, %233 : vector<1x64xf32>
    %235 = arith.addf %232, %234 : vector<1x64xf32>
    %c3_139 = arith.constant 3 : index
    %c384_140 = arith.constant 384 : index
    %236 = vector.load %arg13[%c3_139, %c384_140] : memref<8x1280xf32, #tpu.memory_space<vmem>>, vector<1x64xf32>
    %237 = arith.mulf %169, %236 : vector<1x64xf32>
    %c3_141 = arith.constant 3 : index
    %c640_142 = arith.constant 640 : index
    %238 = vector.load %arg13[%c3_141, %c640_142] : memref<8x1280xf32, #tpu.memory_space<vmem>>, vector<1x64xf32>
    %239 = arith.mulf %180, %238 : vector<1x64xf32>
    %240 = arith.addf %237, %239 : vector<1x64xf32>
    %c3_143 = arith.constant 3 : index
    %c896_144 = arith.constant 896 : index
    %241 = vector.load %arg13[%c3_143, %c896_144] : memref<8x1280xf32, #tpu.memory_space<vmem>>, vector<1x64xf32>
    %242 = arith.mulf %191, %241 : vector<1x64xf32>
    %243 = arith.addf %240, %242 : vector<1x64xf32>
    %c3_145 = arith.constant 3 : index
    %c1152_146 = arith.constant 1152 : index
    %244 = vector.load %arg13[%c3_145, %c1152_146] : memref<8x1280xf32, #tpu.memory_space<vmem>>, vector<1x64xf32>
    %245 = arith.mulf %202, %244 : vector<1x64xf32>
    %246 = arith.addf %243, %245 : vector<1x64xf32>
    %c3_147 = arith.constant 3 : index
    %c448_148 = arith.constant 448 : index
    %247 = vector.load %arg13[%c3_147, %c448_148] : memref<8x1280xf32, #tpu.memory_space<vmem>>, vector<1x64xf32>
    %248 = arith.mulf %169, %247 : vector<1x64xf32>
    %c3_149 = arith.constant 3 : index
    %c704_150 = arith.constant 704 : index
    %249 = vector.load %arg13[%c3_149, %c704_150] : memref<8x1280xf32, #tpu.memory_space<vmem>>, vector<1x64xf32>
    %250 = arith.mulf %180, %249 : vector<1x64xf32>
    %251 = arith.addf %248, %250 : vector<1x64xf32>
    %c3_151 = arith.constant 3 : index
    %c960_152 = arith.constant 960 : index
    %252 = vector.load %arg13[%c3_151, %c960_152] : memref<8x1280xf32, #tpu.memory_space<vmem>>, vector<1x64xf32>
    %253 = arith.mulf %191, %252 : vector<1x64xf32>
    %254 = arith.addf %251, %253 : vector<1x64xf32>
    %c3_153 = arith.constant 3 : index
    %c1216_154 = arith.constant 1216 : index
    %255 = vector.load %arg13[%c3_153, %c1216_154] : memref<8x1280xf32, #tpu.memory_space<vmem>>, vector<1x64xf32>
    %256 = arith.mulf %202, %255 : vector<1x64xf32>
    %257 = arith.addf %254, %256 : vector<1x64xf32>
    %c4 = arith.constant 4 : index
    %c0_155 = arith.constant 0 : index
    %258 = vector.load %arg13[%c4, %c0_155] : memref<8x1280xf32, #tpu.memory_space<vmem>>, vector<1x64xf32>
    %259 = arith.mulf %224, %258 : vector<1x64xf32>
    %c4_156 = arith.constant 4 : index
    %c64_157 = arith.constant 64 : index
    %260 = vector.load %arg13[%c4_156, %c64_157] : memref<8x1280xf32, #tpu.memory_space<vmem>>, vector<1x64xf32>
    %261 = arith.mulf %235, %260 : vector<1x64xf32>
    %262 = arith.addf %259, %261 : vector<1x64xf32>
    %c4_158 = arith.constant 4 : index
    %c128_159 = arith.constant 128 : index
    %263 = vector.load %arg13[%c4_158, %c128_159] : memref<8x1280xf32, #tpu.memory_space<vmem>>, vector<1x64xf32>
    %264 = arith.mulf %246, %263 : vector<1x64xf32>
    %265 = arith.addf %262, %264 : vector<1x64xf32>
    %c4_160 = arith.constant 4 : index
    %c192_161 = arith.constant 192 : index
    %266 = vector.load %arg13[%c4_160, %c192_161] : memref<8x1280xf32, #tpu.memory_space<vmem>>, vector<1x64xf32>
    %267 = arith.mulf %257, %266 : vector<1x64xf32>
    %268 = arith.addf %265, %267 : vector<1x64xf32>
    %c4_162 = arith.constant 4 : index
    %c256_163 = arith.constant 256 : index
    %269 = vector.load %arg13[%c4_162, %c256_163] : memref<8x1280xf32, #tpu.memory_space<vmem>>, vector<1x64xf32>
    %270 = arith.mulf %224, %269 : vector<1x64xf32>
    %c4_164 = arith.constant 4 : index
    %c512_165 = arith.constant 512 : index
    %271 = vector.load %arg13[%c4_164, %c512_165] : memref<8x1280xf32, #tpu.memory_space<vmem>>, vector<1x64xf32>
    %272 = arith.mulf %235, %271 : vector<1x64xf32>
    %273 = arith.addf %270, %272 : vector<1x64xf32>
    %c4_166 = arith.constant 4 : index
    %c768_167 = arith.constant 768 : index
    %274 = vector.load %arg13[%c4_166, %c768_167] : memref<8x1280xf32, #tpu.memory_space<vmem>>, vector<1x64xf32>
    %275 = arith.mulf %246, %274 : vector<1x64xf32>
    %276 = arith.addf %273, %275 : vector<1x64xf32>
    %c4_168 = arith.constant 4 : index
    %c1024_169 = arith.constant 1024 : index
    %277 = vector.load %arg13[%c4_168, %c1024_169] : memref<8x1280xf32, #tpu.memory_space<vmem>>, vector<1x64xf32>
    %278 = arith.mulf %257, %277 : vector<1x64xf32>
    %279 = arith.addf %276, %278 : vector<1x64xf32>
    %c4_170 = arith.constant 4 : index
    %c320_171 = arith.constant 320 : index
    %280 = vector.load %arg13[%c4_170, %c320_171] : memref<8x1280xf32, #tpu.memory_space<vmem>>, vector<1x64xf32>
    %281 = arith.mulf %224, %280 : vector<1x64xf32>
    %c4_172 = arith.constant 4 : index
    %c576_173 = arith.constant 576 : index
    %282 = vector.load %arg13[%c4_172, %c576_173] : memref<8x1280xf32, #tpu.memory_space<vmem>>, vector<1x64xf32>
    %283 = arith.mulf %235, %282 : vector<1x64xf32>
    %284 = arith.addf %281, %283 : vector<1x64xf32>
    %c4_174 = arith.constant 4 : index
    %c832_175 = arith.constant 832 : index
    %285 = vector.load %arg13[%c4_174, %c832_175] : memref<8x1280xf32, #tpu.memory_space<vmem>>, vector<1x64xf32>
    %286 = arith.mulf %246, %285 : vector<1x64xf32>
    %287 = arith.addf %284, %286 : vector<1x64xf32>
    %c4_176 = arith.constant 4 : index
    %c1088_177 = arith.constant 1088 : index
    %288 = vector.load %arg13[%c4_176, %c1088_177] : memref<8x1280xf32, #tpu.memory_space<vmem>>, vector<1x64xf32>
    %289 = arith.mulf %257, %288 : vector<1x64xf32>
    %290 = arith.addf %287, %289 : vector<1x64xf32>
    %c4_178 = arith.constant 4 : index
    %c384_179 = arith.constant 384 : index
    %291 = vector.load %arg13[%c4_178, %c384_179] : memref<8x1280xf32, #tpu.memory_space<vmem>>, vector<1x64xf32>
    %292 = arith.mulf %224, %291 : vector<1x64xf32>
    %c4_180 = arith.constant 4 : index
    %c640_181 = arith.constant 640 : index
    %293 = vector.load %arg13[%c4_180, %c640_181] : memref<8x1280xf32, #tpu.memory_space<vmem>>, vector<1x64xf32>
    %294 = arith.mulf %235, %293 : vector<1x64xf32>
    %295 = arith.addf %292, %294 : vector<1x64xf32>
    %c4_182 = arith.constant 4 : index
    %c896_183 = arith.constant 896 : index
    %296 = vector.load %arg13[%c4_182, %c896_183] : memref<8x1280xf32, #tpu.memory_space<vmem>>, vector<1x64xf32>
    %297 = arith.mulf %246, %296 : vector<1x64xf32>
    %298 = arith.addf %295, %297 : vector<1x64xf32>
    %c4_184 = arith.constant 4 : index
    %c1152_185 = arith.constant 1152 : index
    %299 = vector.load %arg13[%c4_184, %c1152_185] : memref<8x1280xf32, #tpu.memory_space<vmem>>, vector<1x64xf32>
    %300 = arith.mulf %257, %299 : vector<1x64xf32>
    %301 = arith.addf %298, %300 : vector<1x64xf32>
    %c4_186 = arith.constant 4 : index
    %c448_187 = arith.constant 448 : index
    %302 = vector.load %arg13[%c4_186, %c448_187] : memref<8x1280xf32, #tpu.memory_space<vmem>>, vector<1x64xf32>
    %303 = arith.mulf %224, %302 : vector<1x64xf32>
    %c4_188 = arith.constant 4 : index
    %c704_189 = arith.constant 704 : index
    %304 = vector.load %arg13[%c4_188, %c704_189] : memref<8x1280xf32, #tpu.memory_space<vmem>>, vector<1x64xf32>
    %305 = arith.mulf %235, %304 : vector<1x64xf32>
    %306 = arith.addf %303, %305 : vector<1x64xf32>
    %c4_190 = arith.constant 4 : index
    %c960_191 = arith.constant 960 : index
    %307 = vector.load %arg13[%c4_190, %c960_191] : memref<8x1280xf32, #tpu.memory_space<vmem>>, vector<1x64xf32>
    %308 = arith.mulf %246, %307 : vector<1x64xf32>
    %309 = arith.addf %306, %308 : vector<1x64xf32>
    %c4_192 = arith.constant 4 : index
    %c1216_193 = arith.constant 1216 : index
    %310 = vector.load %arg13[%c4_192, %c1216_193] : memref<8x1280xf32, #tpu.memory_space<vmem>>, vector<1x64xf32>
    %311 = arith.mulf %257, %310 : vector<1x64xf32>
    %312 = arith.addf %309, %311 : vector<1x64xf32>
    %c5 = arith.constant 5 : index
    %c0_194 = arith.constant 0 : index
    %313 = vector.load %arg13[%c5, %c0_194] : memref<8x1280xf32, #tpu.memory_space<vmem>>, vector<1x64xf32>
    %314 = arith.mulf %279, %313 : vector<1x64xf32>
    %c5_195 = arith.constant 5 : index
    %c64_196 = arith.constant 64 : index
    %315 = vector.load %arg13[%c5_195, %c64_196] : memref<8x1280xf32, #tpu.memory_space<vmem>>, vector<1x64xf32>
    %316 = arith.mulf %290, %315 : vector<1x64xf32>
    %317 = arith.addf %314, %316 : vector<1x64xf32>
    %c5_197 = arith.constant 5 : index
    %c128_198 = arith.constant 128 : index
    %318 = vector.load %arg13[%c5_197, %c128_198] : memref<8x1280xf32, #tpu.memory_space<vmem>>, vector<1x64xf32>
    %319 = arith.mulf %301, %318 : vector<1x64xf32>
    %320 = arith.addf %317, %319 : vector<1x64xf32>
    %c5_199 = arith.constant 5 : index
    %c192_200 = arith.constant 192 : index
    %321 = vector.load %arg13[%c5_199, %c192_200] : memref<8x1280xf32, #tpu.memory_space<vmem>>, vector<1x64xf32>
    %322 = arith.mulf %312, %321 : vector<1x64xf32>
    %323 = arith.addf %320, %322 : vector<1x64xf32>
    %c5_201 = arith.constant 5 : index
    %c256_202 = arith.constant 256 : index
    %324 = vector.load %arg13[%c5_201, %c256_202] : memref<8x1280xf32, #tpu.memory_space<vmem>>, vector<1x64xf32>
    %325 = arith.mulf %279, %324 : vector<1x64xf32>
    %c5_203 = arith.constant 5 : index
    %c512_204 = arith.constant 512 : index
    %326 = vector.load %arg13[%c5_203, %c512_204] : memref<8x1280xf32, #tpu.memory_space<vmem>>, vector<1x64xf32>
    %327 = arith.mulf %290, %326 : vector<1x64xf32>
    %328 = arith.addf %325, %327 : vector<1x64xf32>
    %c5_205 = arith.constant 5 : index
    %c768_206 = arith.constant 768 : index
    %329 = vector.load %arg13[%c5_205, %c768_206] : memref<8x1280xf32, #tpu.memory_space<vmem>>, vector<1x64xf32>
    %330 = arith.mulf %301, %329 : vector<1x64xf32>
    %331 = arith.addf %328, %330 : vector<1x64xf32>
    %c5_207 = arith.constant 5 : index
    %c1024_208 = arith.constant 1024 : index
    %332 = vector.load %arg13[%c5_207, %c1024_208] : memref<8x1280xf32, #tpu.memory_space<vmem>>, vector<1x64xf32>
    %333 = arith.mulf %312, %332 : vector<1x64xf32>
    %334 = arith.addf %331, %333 : vector<1x64xf32>
    %c5_209 = arith.constant 5 : index
    %c320_210 = arith.constant 320 : index
    %335 = vector.load %arg13[%c5_209, %c320_210] : memref<8x1280xf32, #tpu.memory_space<vmem>>, vector<1x64xf32>
    %336 = arith.mulf %279, %335 : vector<1x64xf32>
    %c5_211 = arith.constant 5 : index
    %c576_212 = arith.constant 576 : index
    %337 = vector.load %arg13[%c5_211, %c576_212] : memref<8x1280xf32, #tpu.memory_space<vmem>>, vector<1x64xf32>
    %338 = arith.mulf %290, %337 : vector<1x64xf32>
    %339 = arith.addf %336, %338 : vector<1x64xf32>
    %c5_213 = arith.constant 5 : index
    %c832_214 = arith.constant 832 : index
    %340 = vector.load %arg13[%c5_213, %c832_214] : memref<8x1280xf32, #tpu.memory_space<vmem>>, vector<1x64xf32>
    %341 = arith.mulf %301, %340 : vector<1x64xf32>
    %342 = arith.addf %339, %341 : vector<1x64xf32>
    %c5_215 = arith.constant 5 : index
    %c1088_216 = arith.constant 1088 : index
    %343 = vector.load %arg13[%c5_215, %c1088_216] : memref<8x1280xf32, #tpu.memory_space<vmem>>, vector<1x64xf32>
    %344 = arith.mulf %312, %343 : vector<1x64xf32>
    %345 = arith.addf %342, %344 : vector<1x64xf32>
    %c5_217 = arith.constant 5 : index
    %c384_218 = arith.constant 384 : index
    %346 = vector.load %arg13[%c5_217, %c384_218] : memref<8x1280xf32, #tpu.memory_space<vmem>>, vector<1x64xf32>
    %347 = arith.mulf %279, %346 : vector<1x64xf32>
    %c5_219 = arith.constant 5 : index
    %c640_220 = arith.constant 640 : index
    %348 = vector.load %arg13[%c5_219, %c640_220] : memref<8x1280xf32, #tpu.memory_space<vmem>>, vector<1x64xf32>
    %349 = arith.mulf %290, %348 : vector<1x64xf32>
    %350 = arith.addf %347, %349 : vector<1x64xf32>
    %c5_221 = arith.constant 5 : index
    %c896_222 = arith.constant 896 : index
    %351 = vector.load %arg13[%c5_221, %c896_222] : memref<8x1280xf32, #tpu.memory_space<vmem>>, vector<1x64xf32>
    %352 = arith.mulf %301, %351 : vector<1x64xf32>
    %353 = arith.addf %350, %352 : vector<1x64xf32>
    %c5_223 = arith.constant 5 : index
    %c1152_224 = arith.constant 1152 : index
    %354 = vector.load %arg13[%c5_223, %c1152_224] : memref<8x1280xf32, #tpu.memory_space<vmem>>, vector<1x64xf32>
    %355 = arith.mulf %312, %354 : vector<1x64xf32>
    %356 = arith.addf %353, %355 : vector<1x64xf32>
    %c5_225 = arith.constant 5 : index
    %c448_226 = arith.constant 448 : index
    %357 = vector.load %arg13[%c5_225, %c448_226] : memref<8x1280xf32, #tpu.memory_space<vmem>>, vector<1x64xf32>
    %358 = arith.mulf %279, %357 : vector<1x64xf32>
    %c5_227 = arith.constant 5 : index
    %c704_228 = arith.constant 704 : index
    %359 = vector.load %arg13[%c5_227, %c704_228] : memref<8x1280xf32, #tpu.memory_space<vmem>>, vector<1x64xf32>
    %360 = arith.mulf %290, %359 : vector<1x64xf32>
    %361 = arith.addf %358, %360 : vector<1x64xf32>
    %c5_229 = arith.constant 5 : index
    %c960_230 = arith.constant 960 : index
    %362 = vector.load %arg13[%c5_229, %c960_230] : memref<8x1280xf32, #tpu.memory_space<vmem>>, vector<1x64xf32>
    %363 = arith.mulf %301, %362 : vector<1x64xf32>
    %364 = arith.addf %361, %363 : vector<1x64xf32>
    %c5_231 = arith.constant 5 : index
    %c1216_232 = arith.constant 1216 : index
    %365 = vector.load %arg13[%c5_231, %c1216_232] : memref<8x1280xf32, #tpu.memory_space<vmem>>, vector<1x64xf32>
    %366 = arith.mulf %312, %365 : vector<1x64xf32>
    %367 = arith.addf %364, %366 : vector<1x64xf32>
    %c6 = arith.constant 6 : index
    %c0_233 = arith.constant 0 : index
    %368 = vector.load %arg13[%c6, %c0_233] : memref<8x1280xf32, #tpu.memory_space<vmem>>, vector<1x64xf32>
    %369 = arith.mulf %334, %368 : vector<1x64xf32>
    %c6_234 = arith.constant 6 : index
    %c64_235 = arith.constant 64 : index
    %370 = vector.load %arg13[%c6_234, %c64_235] : memref<8x1280xf32, #tpu.memory_space<vmem>>, vector<1x64xf32>
    %371 = arith.mulf %345, %370 : vector<1x64xf32>
    %372 = arith.addf %369, %371 : vector<1x64xf32>
    %c6_236 = arith.constant 6 : index
    %c128_237 = arith.constant 128 : index
    %373 = vector.load %arg13[%c6_236, %c128_237] : memref<8x1280xf32, #tpu.memory_space<vmem>>, vector<1x64xf32>
    %374 = arith.mulf %356, %373 : vector<1x64xf32>
    %375 = arith.addf %372, %374 : vector<1x64xf32>
    %c6_238 = arith.constant 6 : index
    %c192_239 = arith.constant 192 : index
    %376 = vector.load %arg13[%c6_238, %c192_239] : memref<8x1280xf32, #tpu.memory_space<vmem>>, vector<1x64xf32>
    %377 = arith.mulf %367, %376 : vector<1x64xf32>
    %378 = arith.addf %375, %377 : vector<1x64xf32>
    %c6_240 = arith.constant 6 : index
    %c256_241 = arith.constant 256 : index
    %379 = vector.load %arg13[%c6_240, %c256_241] : memref<8x1280xf32, #tpu.memory_space<vmem>>, vector<1x64xf32>
    %380 = arith.mulf %334, %379 : vector<1x64xf32>
    %c6_242 = arith.constant 6 : index
    %c512_243 = arith.constant 512 : index
    %381 = vector.load %arg13[%c6_242, %c512_243] : memref<8x1280xf32, #tpu.memory_space<vmem>>, vector<1x64xf32>
    %382 = arith.mulf %345, %381 : vector<1x64xf32>
    %383 = arith.addf %380, %382 : vector<1x64xf32>
    %c6_244 = arith.constant 6 : index
    %c768_245 = arith.constant 768 : index
    %384 = vector.load %arg13[%c6_244, %c768_245] : memref<8x1280xf32, #tpu.memory_space<vmem>>, vector<1x64xf32>
    %385 = arith.mulf %356, %384 : vector<1x64xf32>
    %386 = arith.addf %383, %385 : vector<1x64xf32>
    %c6_246 = arith.constant 6 : index
    %c1024_247 = arith.constant 1024 : index
    %387 = vector.load %arg13[%c6_246, %c1024_247] : memref<8x1280xf32, #tpu.memory_space<vmem>>, vector<1x64xf32>
    %388 = arith.mulf %367, %387 : vector<1x64xf32>
    %389 = arith.addf %386, %388 : vector<1x64xf32>
    %c6_248 = arith.constant 6 : index
    %c320_249 = arith.constant 320 : index
    %390 = vector.load %arg13[%c6_248, %c320_249] : memref<8x1280xf32, #tpu.memory_space<vmem>>, vector<1x64xf32>
    %391 = arith.mulf %334, %390 : vector<1x64xf32>
    %c6_250 = arith.constant 6 : index
    %c576_251 = arith.constant 576 : index
    %392 = vector.load %arg13[%c6_250, %c576_251] : memref<8x1280xf32, #tpu.memory_space<vmem>>, vector<1x64xf32>
    %393 = arith.mulf %345, %392 : vector<1x64xf32>
    %394 = arith.addf %391, %393 : vector<1x64xf32>
    %c6_252 = arith.constant 6 : index
    %c832_253 = arith.constant 832 : index
    %395 = vector.load %arg13[%c6_252, %c832_253] : memref<8x1280xf32, #tpu.memory_space<vmem>>, vector<1x64xf32>
    %396 = arith.mulf %356, %395 : vector<1x64xf32>
    %397 = arith.addf %394, %396 : vector<1x64xf32>
    %c6_254 = arith.constant 6 : index
    %c1088_255 = arith.constant 1088 : index
    %398 = vector.load %arg13[%c6_254, %c1088_255] : memref<8x1280xf32, #tpu.memory_space<vmem>>, vector<1x64xf32>
    %399 = arith.mulf %367, %398 : vector<1x64xf32>
    %400 = arith.addf %397, %399 : vector<1x64xf32>
    %c6_256 = arith.constant 6 : index
    %c384_257 = arith.constant 384 : index
    %401 = vector.load %arg13[%c6_256, %c384_257] : memref<8x1280xf32, #tpu.memory_space<vmem>>, vector<1x64xf32>
    %402 = arith.mulf %334, %401 : vector<1x64xf32>
    %c6_258 = arith.constant 6 : index
    %c640_259 = arith.constant 640 : index
    %403 = vector.load %arg13[%c6_258, %c640_259] : memref<8x1280xf32, #tpu.memory_space<vmem>>, vector<1x64xf32>
    %404 = arith.mulf %345, %403 : vector<1x64xf32>
    %405 = arith.addf %402, %404 : vector<1x64xf32>
    %c6_260 = arith.constant 6 : index
    %c896_261 = arith.constant 896 : index
    %406 = vector.load %arg13[%c6_260, %c896_261] : memref<8x1280xf32, #tpu.memory_space<vmem>>, vector<1x64xf32>
    %407 = arith.mulf %356, %406 : vector<1x64xf32>
    %408 = arith.addf %405, %407 : vector<1x64xf32>
    %c6_262 = arith.constant 6 : index
    %c1152_263 = arith.constant 1152 : index
    %409 = vector.load %arg13[%c6_262, %c1152_263] : memref<8x1280xf32, #tpu.memory_space<vmem>>, vector<1x64xf32>
    %410 = arith.mulf %367, %409 : vector<1x64xf32>
    %411 = arith.addf %408, %410 : vector<1x64xf32>
    %c6_264 = arith.constant 6 : index
    %c448_265 = arith.constant 448 : index
    %412 = vector.load %arg13[%c6_264, %c448_265] : memref<8x1280xf32, #tpu.memory_space<vmem>>, vector<1x64xf32>
    %413 = arith.mulf %334, %412 : vector<1x64xf32>
    %c6_266 = arith.constant 6 : index
    %c704_267 = arith.constant 704 : index
    %414 = vector.load %arg13[%c6_266, %c704_267] : memref<8x1280xf32, #tpu.memory_space<vmem>>, vector<1x64xf32>
    %415 = arith.mulf %345, %414 : vector<1x64xf32>
    %416 = arith.addf %413, %415 : vector<1x64xf32>
    %c6_268 = arith.constant 6 : index
    %c960_269 = arith.constant 960 : index
    %417 = vector.load %arg13[%c6_268, %c960_269] : memref<8x1280xf32, #tpu.memory_space<vmem>>, vector<1x64xf32>
    %418 = arith.mulf %356, %417 : vector<1x64xf32>
    %419 = arith.addf %416, %418 : vector<1x64xf32>
    %c6_270 = arith.constant 6 : index
    %c1216_271 = arith.constant 1216 : index
    %420 = vector.load %arg13[%c6_270, %c1216_271] : memref<8x1280xf32, #tpu.memory_space<vmem>>, vector<1x64xf32>
    %421 = arith.mulf %367, %420 : vector<1x64xf32>
    %422 = arith.addf %419, %421 : vector<1x64xf32>
    %c7 = arith.constant 7 : index
    %c0_272 = arith.constant 0 : index
    %423 = vector.load %arg13[%c7, %c0_272] : memref<8x1280xf32, #tpu.memory_space<vmem>>, vector<1x64xf32>
    %424 = arith.mulf %389, %423 : vector<1x64xf32>
    %c7_273 = arith.constant 7 : index
    %c64_274 = arith.constant 64 : index
    %425 = vector.load %arg13[%c7_273, %c64_274] : memref<8x1280xf32, #tpu.memory_space<vmem>>, vector<1x64xf32>
    %426 = arith.mulf %400, %425 : vector<1x64xf32>
    %427 = arith.addf %424, %426 : vector<1x64xf32>
    %c7_275 = arith.constant 7 : index
    %c128_276 = arith.constant 128 : index
    %428 = vector.load %arg13[%c7_275, %c128_276] : memref<8x1280xf32, #tpu.memory_space<vmem>>, vector<1x64xf32>
    %429 = arith.mulf %411, %428 : vector<1x64xf32>
    %430 = arith.addf %427, %429 : vector<1x64xf32>
    %c7_277 = arith.constant 7 : index
    %c192_278 = arith.constant 192 : index
    %431 = vector.load %arg13[%c7_277, %c192_278] : memref<8x1280xf32, #tpu.memory_space<vmem>>, vector<1x64xf32>
    %432 = arith.mulf %422, %431 : vector<1x64xf32>
    %433 = arith.addf %430, %432 : vector<1x64xf32>
    %434 = tpu.concatenate %48, %103, %158, %213, %268, %323, %378, %433 in 0 : vector<1x64xf32>, vector<1x64xf32>, vector<1x64xf32>, vector<1x64xf32>, vector<1x64xf32>, vector<1x64xf32>, vector<1x64xf32>, vector<1x64xf32> -> vector<8x64xf32>
    %c0_279 = arith.constant 0 : index
    %c0_280 = arith.constant 0 : index
    %c0_281 = arith.constant 0 : index
    %435 = vector.load %arg12[%c0_279, %c0_280, %c0_281] : memref<1x8x64xf32, #tpu.memory_space<vmem>>, vector<1x8x64xf32>
    %436 = vector.shape_cast %435 : vector<1x8x64xf32> to vector<8x64xf32>
    %437 = vector.shape_cast %434 : vector<8x64xf32> to vector<1x8x64xf32>
    tpu.vector_store %arg12[%c0_279, %c0_280, %c0_281], %437 {strides = array<i32>} : memref<1x8x64xf32, #tpu.memory_space<vmem>>, vector<1x8x64xf32>,
    %c0_282 = arith.constant 0 : index
    %c0_283 = arith.constant 0 : index
    %438 = vector.load %arg6[%c0_282, %c0_283] : memref<64x64xf32, #tpu.memory_space<vmem>>, vector<64x64xf32>
    %cst_284 = arith.constant dense<0.000000e+00> : vector<8x64xf32>
    %439 = tpu.matmul %434, %438, %cst_284 {dimension_numbers = #tpu.dot_dimension_numbers<[1], [0], [0], [1], [0, 0, 1, 1], [], []>} : vector<8x64xf32>, vector<64x64xf32>, vector<8x64xf32> -> vector<8x64xf32>
    %cst_285 = arith.constant 1.600000e+01 : f32
    %440 = vector.broadcast %cst_285 : f32 to vector<8x64xf32>
    %441 = arith.mulf %439, %440 : vector<8x64xf32>
    %c0_286 = arith.constant 0 : index
    %c0_287 = arith.constant 0 : index
    %442 = vector.load %arg7[%c0_286, %c0_287] : memref<64x64xf32, #tpu.memory_space<vmem>>, vector<64x64xf32>
    %cst_288 = arith.constant dense<0.000000e+00> : vector<8x64xf32>
    %443 = tpu.matmul %441, %442, %cst_288 {dimension_numbers = #tpu.dot_dimension_numbers<[1], [0], [0], [1], [0, 0, 1, 1], [], []>} : vector<8x64xf32>, vector<64x64xf32>, vector<8x64xf32> -> vector<8x64xf32>
    %444 = arith.addf %1, %443 : vector<8x64xf32>
    %cst_289 = arith.constant dense<0.000000e+00> : vector<8xf32>
    %445 = vector.multi_reduction <add>, %444, %cst_289 [1] : vector<8x64xf32> to vector<8xf32>
    %446 = vector.shape_cast %445 : vector<8xf32> to vector<8x1xf32>
    %cst_290 = arith.constant 6.400000e+01 : f32
    %447 = vector.broadcast %cst_290 : f32 to vector<8x1xf32>
    %448 = arith.divf %446, %447 : vector<8x1xf32>
    %449 = vector.broadcast %448 : vector<8x1xf32> to vector<8x64xf32>
    %450 = arith.subf %444, %449 : vector<8x64xf32>
    %451 = arith.mulf %450, %450 : vector<8x64xf32>
    %cst_291 = arith.constant dense<0.000000e+00> : vector<8xf32>
    %452 = vector.multi_reduction <add>, %451, %cst_291 [1] : vector<8x64xf32> to vector<8xf32>
    %453 = vector.shape_cast %452 : vector<8xf32> to vector<8x1xf32>
    %cst_292 = arith.constant 6.400000e+01 : f32
    %454 = vector.broadcast %cst_292 : f32 to vector<8x1xf32>
    %455 = arith.divf %453, %454 : vector<8x1xf32>
    %456 = vector.broadcast %448 : vector<8x1xf32> to vector<8x64xf32>
    %457 = arith.subf %444, %456 : vector<8x64xf32>
    %cst_293 = arith.constant 9.99999974E-6 : f32
    %458 = vector.broadcast %cst_293 : f32 to vector<8x1xf32>
    %459 = arith.addf %455, %458 : vector<8x1xf32>
    %460 = math.rsqrt %459 : vector<8x1xf32>
    %461 = vector.broadcast %460 : vector<8x1xf32> to vector<8x64xf32>
    %462 = arith.mulf %457, %461 : vector<8x64xf32>
    %c0_294 = arith.constant 0 : index
    %c0_295 = arith.constant 0 : index
    %463 = vector.load %arg8[%c0_294, %c0_295] : memref<1x64xf32, #tpu.memory_space<vmem>>, vector<1x64xf32>
    %464 = vector.shape_cast %463 : vector<1x64xf32> to vector<64xf32>
    %465 = vector.shape_cast %464 : vector<64xf32> to vector<1x64xf32>
    %466 = vector.broadcast %465 : vector<1x64xf32> to vector<8x64xf32>
    %467 = arith.mulf %462, %466 : vector<8x64xf32>
    %c0_296 = arith.constant 0 : index
    %c0_297 = arith.constant 0 : index
    %468 = vector.load %arg9[%c0_296, %c0_297] : memref<64x256xf32, #tpu.memory_space<vmem>>, vector<64x256xf32>
    %cst_298 = arith.constant dense<0.000000e+00> : vector<8x256xf32>
    %469 = tpu.matmul %467, %468, %cst_298 {dimension_numbers = #tpu.dot_dimension_numbers<[1], [0], [0], [1], [0, 0, 1, 1], [], []>} : vector<8x64xf32>, vector<64x256xf32>, vector<8x256xf32> -> vector<8x256xf32>
    %470 = arith.mulf %469, %469 : vector<8x256xf32>
    %471 = arith.mulf %469, %470 : vector<8x256xf32>
    %cst_299 = arith.constant 4.471500e-02 : f32
    %472 = vector.broadcast %cst_299 : f32 to vector<8x256xf32>
    %473 = arith.mulf %472, %471 : vector<8x256xf32>
    %474 = arith.addf %469, %473 : vector<8x256xf32>
    %cst_300 = arith.constant 0.797884583 : f32
    %475 = vector.broadcast %cst_300 : f32 to vector<8x256xf32>
    %476 = arith.mulf %475, %474 : vector<8x256xf32>
    %477 = math.tanh %476 : vector<8x256xf32>
    %cst_301 = arith.constant 1.000000e+00 : f32
    %478 = vector.broadcast %cst_301 : f32 to vector<8x256xf32>
    %479 = arith.addf %478, %477 : vector<8x256xf32>
    %cst_302 = arith.constant 5.000000e-01 : f32
    %480 = vector.broadcast %cst_302 : f32 to vector<8x256xf32>
    %481 = arith.mulf %480, %479 : vector<8x256xf32>
    %482 = arith.mulf %469, %481 : vector<8x256xf32>
    %c0_303 = arith.constant 0 : index
    %c0_304 = arith.constant 0 : index
    %483 = vector.load %arg10[%c0_303, %c0_304] : memref<256x64xf32, #tpu.memory_space<vmem>>, vector<256x64xf32>
    %cst_305 = arith.constant dense<0.000000e+00> : vector<8x64xf32>
    %484 = tpu.matmul %482, %483, %cst_305 {dimension_numbers = #tpu.dot_dimension_numbers<[1], [0], [0], [1], [0, 0, 1, 1], [], []>} : vector<8x256xf32>, vector<256x64xf32>, vector<8x64xf32> -> vector<8x64xf32>
    %485 = arith.addf %444, %484 : vector<8x64xf32>
    %c0_306 = arith.constant 0 : index
    %c0_307 = arith.constant 0 : index
    %c0_308 = arith.constant 0 : index
    %486 = vector.load %arg11[%c0_306, %c0_307, %c0_308] : memref<1x8x64xf32, #tpu.memory_space<vmem>>, vector<1x8x64xf32>
    %487 = vector.shape_cast %486 : vector<1x8x64xf32> to vector<8x64xf32>
    %488 = vector.shape_cast %485 : vector<8x64xf32> to vector<1x8x64xf32>
    tpu.vector_store %arg11[%c0_306, %c0_307, %c0_308], %488 {strides = array<i32>} : memref<1x8x64xf32, #tpu.memory_space<vmem>>, vector<1x8x64xf32>,
    return
  }
  func.func @transform_0(%arg0: i32) -> (i32, i32, i32) {
    %c0_i32 = arith.constant 0 : i32
    %c0_i32_0 = arith.constant 0 : i32
    %c0_i32_1 = arith.constant 0 : i32
    return %arg0, %c0_i32, %c0_i32_0 : i32, i32, i32
  }
  func.func @transform_1(%arg0: i32) -> (i32, i32) {
    %c0_i32 = arith.constant 0 : i32
    %c0_i32_0 = arith.constant 0 : i32
    %c0_i32_1 = arith.constant 0 : i32
    return %c0_i32, %c0_i32_0 : i32, i32
  }
  func.func @transform_2(%arg0: i32) -> (i32, i32) {
    %c0_i32 = arith.constant 0 : i32
    %c0_i32_0 = arith.constant 0 : i32
    %c0_i32_1 = arith.constant 0 : i32
    return %c0_i32, %c0_i32_0 : i32, i32
  }
  func.func @transform_3(%arg0: i32) -> (i32, i32) {
    %c0_i32 = arith.constant 0 : i32
    %c0_i32_0 = arith.constant 0 : i32
    %c0_i32_1 = arith.constant 0 : i32
    return %c0_i32, %c0_i32_0 : i32, i32
  }
  func.func @transform_4(%arg0: i32) -> (i32, i32) {
    %c0_i32 = arith.constant 0 : i32
    %c0_i32_0 = arith.constant 0 : i32
    %c0_i32_1 = arith.constant 0 : i32
    return %c0_i32, %c0_i32_0 : i32, i32
  }
  func.func @transform_5(%arg0: i32) -> (i32, i32) {
    %c0_i32 = arith.constant 0 : i32
    %c0_i32_0 = arith.constant 0 : i32
    %c0_i32_1 = arith.constant 0 : i32
    return %c0_i32, %c0_i32_0 : i32, i32
  }
  func.func @transform_6(%arg0: i32) -> (i32, i32) {
    %c0_i32 = arith.constant 0 : i32
    %c0_i32_0 = arith.constant 0 : i32
    %c0_i32_1 = arith.constant 0 : i32
    return %c0_i32, %c0_i32_0 : i32, i32
  }
  func.func @transform_7(%arg0: i32) -> (i32, i32) {
    %c0_i32 = arith.constant 0 : i32
    %c0_i32_0 = arith.constant 0 : i32
    %c0_i32_1 = arith.constant 0 : i32
    return %c0_i32, %c0_i32_0 : i32, i32
  }
  func.func @transform_8(%arg0: i32) -> (i32, i32) {
    %c0_i32 = arith.constant 0 : i32
    %c0_i32_0 = arith.constant 0 : i32
    %c0_i32_1 = arith.constant 0 : i32
    return %c0_i32, %c0_i32_0 : i32, i32
  }
  func.func @transform_9(%arg0: i32) -> (i32, i32) {
    %c0_i32 = arith.constant 0 : i32
    %c0_i32_0 = arith.constant 0 : i32
    %c0_i32_1 = arith.constant 0 : i32
    return %c0_i32, %c0_i32_0 : i32, i32
  }
  func.func @transform_10(%arg0: i32) -> (i32, i32, i32) {
    %c0_i32 = arith.constant 0 : i32
    %c0_i32_0 = arith.constant 0 : i32
    %c0_i32_1 = arith.constant 0 : i32
    return %arg0, %c0_i32, %c0_i32_0 : i32, i32, i32
  }
  func.func @transform_11(%arg0: i32) -> (i32, i32, i32) {
    %c0_i32 = arith.constant 0 : i32
    %c0_i32_0 = arith.constant 0 : i32
    %c0_i32_1 = arith.constant 0 : i32
    return %arg0, %c0_i32, %c0_i32_0 : i32, i32, i32
  }
}

</mosaic_0001>

<bundles_post_ra>
// kernel: _lambda_.1
= control target key start
LH: loop header
LB: loop body
LE: loop exit
PB: predicated region body
PF: predicated region fallthrough
CT: control target
= control target key end

     0   :  { %s3920_s0 = inlined_call_operand.hbm [shape: f32[2,8,64], index: 0, kind: input, shape index: {}]   ;;  %s3921_s1 = inlined_call_operand.vmem [shape: f32[1,64], index: 1, kind: input, shape index: {}, may-alias: {1,7}]   ;;  %s3922_s2 = inlined_call_operand.hbm [shape: f32[64,1280], index: 2, kind: input, shape index: {}]   ;;  %s3923_s3 = inlined_call_operand.vmem [shape: f32[1,1280], index: 3, kind: input, shape index: {}]   ;;  %s3924_s4 = inlined_call_operand.vmem [shape: f32[4,64], index: 4, kind: input, shape index: {}]   ;;  %s3925_s5 = inlined_call_operand.hbm [shape: f32[64,64], index: 5, kind: input, shape index: {}]   ;;  %s3926_s6 = inlined_call_operand.hbm [shape: f32[64,64], index: 6, kind: input, shape index: {}]   ;;  %s3927_s7 = inlined_call_operand.vmem [shape: f32[1,64], index: 7, kind: input, shape index: {}, may-alias: {1,7}]   ;;  %s3928_s8 = inlined_call_operand.hbm [shape: f32[64,256], index: 8, kind: input, shape index: {}]   ;;  %s3929_s9 = inlined_call_operand.hbm [shape: f32[256,64], index: 9, kind: input, shape index: {}]   ;;  %s3930_s10 = inlined_call_operand.hbm [shape: f32[2,8,64], index: 10, kind: output, shape index: {0}]   ;;  %s3931_s11 = inlined_call_operand.vmem [shape: f32[2,8,64], index: 11, kind: output, shape index: {1}]  }
   0x1   :  { %3978 = sst [smem:[#allocation72_spill]] %s3927_s7 }
   0x2   :  { %3979 = sst [smem:[#allocation73_spill]] %s3930_s10 }
   0x3   :  { %3980 = sst [smem:[#allocation74_spill]] %s3931_s11 }
   0x4   :  { %17 = vsyncpa [#allocation4], 0 }
   0x5   :  { %19 = vsyncpa [#allocation4 + $0x1], 0 }
   0x6   :  { %20 = vsyncpa [#allocation7], 0 }
   0x7   :  { %21 = vsyncpa [#allocation10], 0 }
   0x8   :  { %22 = vsyncpa [#allocation13], 0 }
   0x9   :  { %23 = vsyncpa [#allocation5], 0 }
   0xa   :  { %25 = vsyncpa [#allocation5 + $0x1], 0  ;;  %s2985_s17 = smov 0   ;;  %s2987_s18 = smov 0  }
   0xb   :  { %s2989_s19 = smov 0   ;;  %s2991_s20 = smov 0  }
   0xc LB: > { %s2908_s21 = smov [#allocation6]   ;;  %s3006_s23 = sadd.s32 4294967295, %s2906_s20   ;;  %s2906_s20 = sphi %s2991_s20, %s4113_s20   ;;  %s2902_s19 = sphi %s2989_s19, %s4112_s19   ;;  %s2898_s18 = sphi %s2987_s18, %s4111_s18   ;;  %s2894_s17 = sphi %s2985_s17, %s4110_s17  }
   0xd   : > { %s318_s22 = sshll.u32 %s2908_s21, 4  ;;  %p2267_p0 = scmp.ge.s32.totalorder %s2906_s20, 1  ;;  %s3011_s22 = int_to_ptr.vmem [resolvable:$true] %s318_s22 }
   0xe   : > { %p3933_p1 = scmp.eq.s32.totalorder %s3006_s23, 0  ;;  %p303_p2 = scmp.lt.s32.totalorder %s2906_s20, 3 }
   0xf   : > { %s2909_s26 = smov [#allocation9]   ;;  %s2910_s28 = smov [#allocation8]  }
  0x10   : > { %p3013_p3 = pnand %p2267_p0, %p303_p2  ;;  %s350_s27 = sshll.u32 %s2909_s26, 4  ;;  %s3026_s27 = int_to_ptr.vmem [resolvable:$true] %s350_s27 }
  0x11   : > { %s3028_s29 = sshll.u32 %s2910_s28, 4  ;;  %s2658_s13 = scalar_lea.hbm %s3922_s2, 10240  ;;  %s338_s29 = int_to_ptr.vmem [resolvable:$true] %s3028_s29 }
  0x12   : > { %s3981_s24 = scalar_select %p3013_p3, 1, 0 }
  0x13   : > { %p2566_p5 = pneg %p3013_p3  ;;  %p2659_p7 = scmp.ne.s32.totalorder %s3922_s2, %s2658_s13 }
  0x14   : > { %p2665_p11 = scmp.lt.u32.totalorder %s2658_s13, %s3922_s2 }
  0x15   : > { %p3022_p6 = pnand %p2566_p5, %p3933_p1 }
  0x17   : > { %p3038_p8 = pneg %p3022_p6 }
  0x19   : > { %p2661_p9 = pnand %p3038_p8, %p2659_p7 }
  0x1b   : > { %p2662_p10 = pneg %p2661_p9 }
  0x1d   : > { %p2667_p12 = pnand %p2665_p11, %p2662_p10 }
  0x1f   : > { %2670 = shalt.err (!%p2667_p12)
}
  0x20   : > { %s2671_s28 = scalar_lea.vmem %s3011_s22, 10240  ;;  %p2679_p5 = scmp.lt.s32.totalorder %s3011_s22, %s3011_s22 }
  0x21   : > { %p2672_p13 = scmp.ne.s32.totalorder %s3011_s22, %s2671_s28  ;;  %p2680_p4 = scmp.lt.s32.totalorder %s2671_s28, %s2671_s28 }
  0x23   : > { %p2674_p0 = pnand %p2672_p13, %p3038_p8  ;;  %p2681_p7 = por %p2680_p4, %p2679_p5 }
  0x25   : > { %p2675_p2 = pneg %p2674_p0 }
  0x27   : > { %p2682_p9 = pnand %p2681_p7, %p2675_p2 }
  0x29   : > { %2685 = shalt.err (!%p2682_p9)
}
  0x2a   : > { %s2911_s30 = smov 1280   ;;  %s2912_s12 = smov 80  }
  0x2b   : > { %2569 = dma.hbm_to_vmem [thread:$0]  (!%p3022_p6), %s3922_s2, 10240, %s3011_s22, [#allocation7], %s2911_s30, %s2911_s30, %s2912_s12  }
  0x2c   : > { %s2686_s26 = scalar_lea.hbm %s3926_s6, 1024 }
  0x2d   : > { %p2687_p4 = scmp.ne.s32.totalorder %s3926_s6, %s2686_s26  ;;  %p2693_p12 = scmp.lt.u32.totalorder %s2686_s26, %s3926_s6 }
  0x2f   : > { %p2689_p10 = pnand %p2687_p4, %p3038_p8 }
  0x31   : > { %p2690_p11 = pneg %p2689_p10 }
  0x33   : > { %p2695_p13 = pnand %p2693_p12, %p2690_p11 }
  0x35   : > { %2698 = shalt.err (!%p2695_p13)
}
  0x36   : > { %s2699_s22 = scalar_lea.vmem %s3026_s27, 1024  ;;  %p2707_p7 = scmp.lt.s32.totalorder %s3026_s27, %s3026_s27 }
  0x37   : > { %p2700_p0 = scmp.ne.s32.totalorder %s3026_s27, %s2699_s22  ;;  %p2708_p9 = scmp.lt.s32.totalorder %s2699_s22, %s2699_s22 }
  0x39   : > { %p2702_p2 = pnand %p2700_p0, %p3038_p8  ;;  %p2709_p4 = por %p2708_p9, %p2707_p7 }
  0x3b   : > { %p2703_p5 = pneg %p2702_p2 }
  0x3d   : > { %p2710_p10 = pnand %p2709_p4, %p2703_p5 }
  0x3f   : > { %2713 = shalt.err (!%p2710_p10)
}
  0x40   : > { %s3935_s7 = smov 128   ;;  %s3936_s10 = smov 8  }
  0x41   : > { %2575 = dma.hbm_to_vmem [thread:$0]  (!%p3022_p6), %s3926_s6, 1024, %s3026_s27, [#allocation10], %s3935_s7, %s3935_s7, %s3936_s10  }
  0x42   : > { %s2714_s14 = scalar_lea.hbm %s3925_s5, 1024 }
  0x43   : > { %p2715_p11 = scmp.ne.s32.totalorder %s3925_s5, %s2714_s14  ;;  %p2721_p0 = scmp.lt.u32.totalorder %s2714_s14, %s3925_s5 }
  0x45   : > { %p2717_p12 = pnand %p2715_p11, %p3038_p8 }
  0x47   : > { %p2718_p13 = pneg %p2717_p12 }
  0x49   : > { %p2723_p2 = pnand %p2721_p0, %p2718_p13 }
  0x4b   : > { %2726 = shalt.err (!%p2723_p2)
}
  0x4c   : > { %s2727_s22 = scalar_lea.vmem %s338_s29, 1024  ;;  %p2735_p4 = scmp.lt.s32.totalorder %s338_s29, %s338_s29 }
  0x4d   : > { %p2728_p5 = scmp.ne.s32.totalorder %s338_s29, %s2727_s22  ;;  %p2736_p10 = scmp.lt.s32.totalorder %s2727_s22, %s2727_s22 }
  0x4f   : > { %p2730_p7 = pnand %p2728_p5, %p3038_p8  ;;  %p2737_p1 = por %p2736_p10, %p2735_p4 }
  0x51   : > { %p2731_p9 = pneg %p2730_p7 }
  0x53   : > { %p2738_p3 = pnand %p2737_p1, %p2731_p9 }
  0x55   : > { %2741 = shalt.err (!%p2738_p3)
}
  0x56   : > { %2572 = dma.hbm_to_vmem [thread:$0]  (!%p3022_p6), %s3925_s5, 1024, %s338_s29, [#allocation7], %s3935_s7, %s3935_s7, %s3936_s10  }
  0x57   : > { %s2915_s30 = smov [#allocation11]   ;;  %s2742_s15 = scalar_lea.hbm %s3928_s8, 2048 }
  0x58   : > { %s366_s12 = sshll.u32 %s2915_s30, 4  ;;  %p2743_p1 = scmp.ne.s32.totalorder %s3928_s8, %s2742_s15  ;;  %s367_s12 = int_to_ptr.vmem [resolvable:$true] %s366_s12 }
  0x59   : > { %p2749_p12 = scmp.lt.u32.totalorder %s2742_s15, %s3928_s8 }
  0x5a   : > { %p2745_p3 = pnand %p2743_p1, %p3038_p8 }
  0x5c   : > { %p2746_p11 = pneg %p2745_p3 }
  0x5e   : > { %p2751_p13 = pnand %p2749_p12, %p2746_p11 }
  0x60   : > { %2754 = shalt.err (!%p2751_p13)
}
  0x61   : > { %s2755_s29 = scalar_lea.vmem %s367_s12, 2048  ;;  %p2763_p7 = scmp.lt.s32.totalorder %s367_s12, %s367_s12 }
  0x62   : > { %p2756_p0 = scmp.ne.s32.totalorder %s367_s12, %s2755_s29  ;;  %p2764_p9 = scmp.lt.s32.totalorder %s2755_s29, %s2755_s29 }
  0x64   : > { %p2758_p2 = pnand %p2756_p0, %p3038_p8  ;;  %p2765_p4 = por %p2764_p9, %p2763_p7 }
  0x66   : > { %p2759_p5 = pneg %p2758_p2 }
  0x68   : > { %p2766_p10 = pnand %p2765_p4, %p2759_p5 }
  0x6a   : > { %2769 = shalt.err (!%p2766_p10)
}
  0x6b   : > { %s2916_s27 = smov 256   ;;  %s2917_s11 = smov 16  }
  0x6c   : > { %2578 = dma.hbm_to_vmem [thread:$0]  (!%p3022_p6), %s3928_s8, 2048, %s367_s12, [#allocation10], %s2916_s27, %s2916_s27, %s2917_s11  }
  0x6d   : > { %s2918_s14 = smov [#allocation12]   ;;  %s2770_s28 = scalar_lea.hbm %s3929_s9, 4096 }
  0x6e   : > { %s379_s15 = sshll.u32 %s2918_s14, 4  ;;  %p2771_p1 = scmp.ne.s32.totalorder %s3929_s9, %s2770_s28  ;;  %s380_s15 = int_to_ptr.vmem [resolvable:$true] %s379_s15 }
  0x6f   : > { %p2777_p12 = scmp.lt.u32.totalorder %s2770_s28, %s3929_s9 }
  0x70   : > { %p2773_p3 = pnand %p2771_p1, %p3038_p8 }
  0x72   : > { %p2774_p11 = pneg %p2773_p3 }
  0x74   : > { %p2779_p13 = pnand %p2777_p12, %p2774_p11 }
  0x76   : > { %2782 = shalt.err (!%p2779_p13)
}
  0x77   : > { %s2783_s12 = scalar_lea.vmem %s380_s15, 4096  ;;  %p2791_p7 = scmp.lt.s32.totalorder %s380_s15, %s380_s15 }
  0x78   : > { %p2784_p0 = scmp.ne.s32.totalorder %s380_s15, %s2783_s12  ;;  %p2792_p9 = scmp.lt.s32.totalorder %s2783_s12, %s2783_s12 }
  0x7a   : > { %p2786_p2 = pnand %p2784_p0, %p3038_p8  ;;  %p2793_p4 = por %p2792_p9, %p2791_p7 }
  0x7c   : > { %p2787_p5 = pneg %p2786_p2 }
  0x7e   : > { %p2794_p10 = pnand %p2793_p4, %p2787_p5 }
  0x80   : > { %2797 = shalt.err (!%p2794_p10)
}
  0x81   : > { %s3984_s27 = smov 8   ;;  %s3985_s11 = smov 128  }
  0x82   : > { %2581 = dma.hbm_to_vmem [thread:$0]  (!%p3022_p6), %s3929_s9, 4096, %s380_s15, [#allocation13], %s3985_s11, %s3985_s11, %s3984_s27  }
  0x83   : > { %s2266_s25 = sadd.s32 4294967294, %s2906_s20   ;;  %s3148_s16 = sadd.s32 1, %s2906_s20  }
  0x84   : > { %s38_s30 = sadd.s32 1, %s2902_s19  ;;  %s35_s13 = ssub.s32 %s2906_s20, %s3148_s16 }
  0x85   : > { %p45_p8 = scmp.ne.s32.totalorder %s2902_s19, %s2898_s18  ;;  %p36_p1 = scmp.eq.s32.totalorder %s35_s13, 0 }
  0x86   : > { %p46_p3 = scmp.eq.s32.totalorder %s2906_s20, 0  ;;  %p51_p11 = scmp.ne.s32.totalorder %s2898_s18, %s2894_s17 }
  0x87   : > { %p264_p12 = scmp.eq.s32.totalorder %s3006_s23, 1  ;;  %p3986_p0 = scmp.eq.s32.totalorder %s3006_s23, 0 }
  0x88   : > { %s3160_s14 = scalar_select %p36_p1, %s2902_s19, %s38_s30  }
  0x89   : > { %p47_p13 = por %p46_p3, %p45_p8  ;;  %p3164_p2 = por %p3986_p0, %p51_p11 }
  0x8a   : > { %p3168_p6 = por %p264_p12, %p45_p8  ;;  %p270_p5 = scmp.eq.s32.totalorder %s2266_s25, 1 }
  0x8b   : > { %p2595_p7 = scmp.lt.s32.totalorder %s2906_s20, 2  ;;  %s393_s26 = sand.u32 1, %s2902_s19  }
  0x8c   : > { %s3988_s15 = scalar_select %p3168_p6, 1, 0 }
  0x8d   : > { %p3174_p9 = por %p270_p5, %p51_p11  ;;  %s2274_s22 = sshll.u32 %s393_s26, 3 }
  0x8e   : > { %s2275_s29 = sshll.u32 %s2906_s20, 7  ;;  %s397_s7 = scalar_lea.vmem [#allocation3], %s2274_s22 }
  0x8f   : > { %s3989_s28 = scalar_select %p3174_p9, 1, 0 }
  0x90   : > { %s3182_s11 = scalar_lea.hbm %s3920_s0, %s2275_s29  ;;  %s404_s10 = sshll.u32 %s397_s7, 4  ;;  %s3188_s10 = int_to_ptr.vmem [resolvable:$true] %s404_s10 }
  0x91   : > { %p3184_p4 = pnand %p2595_p7, %p47_p13  ;;  %s394_s30 = scalar_lea.sflag [#allocation4], %s393_s26 }
  0x92   : > { %s2798_s13 = scalar_lea.hbm %s3182_s11, 128  ;;  %s2803_s12 = scalar_lea.hbm %s3920_s0, 256 }
  0x93   : > { %p2799_p10 = scmp.ne.s32.totalorder %s3182_s11, %s2798_s13  ;;  %p2800_p8 = pneg %p3184_p4 }
  0x94   : > { %p2804_p11 = scmp.lt.u32.totalorder %s3182_s11, %s3920_s0  ;;  %p2805_p12 = scmp.lt.u32.totalorder %s2803_s12, %s2798_s13 }
  0x95   : > { %p2801_p1 = pnand %p2800_p8, %p2799_p10  ;;  %p2807_p0 = scmp.lt.u32.totalorder %s2798_s13, %s3182_s11 }
  0x96   : > { %p2806_p13 = por %p2805_p12, %p2804_p11 }
  0x97   : > { %p2802_p3 = pneg %p2801_p1 }
  0x98   : > { %p2808_p5 = por %p2807_p0, %p2806_p13 }
  0x9a   : > { %p2809_p7 = pnand %p2808_p5, %p2802_p3 }
  0x9c   : > { %2812 = shalt.err (!%p2809_p7)
}
  0x9d   : > { %s2813_s26 = scalar_lea.vmem %s3188_s10, 128  ;;  %s2919_s29 = smov [#allocation3]  }
  0x9e   : > { %p2814_p10 = scmp.ne.s32.totalorder %s3188_s10, %s2813_s26  ;;  %s2818_s22 = sshll.u32 %s2919_s29, 4  ;;  %s2819_s22 = int_to_ptr.vmem [resolvable:$false] %s2818_s22 }
  0x9f   : > { %s2820_s27 = scalar_lea.vmem %s2819_s22, 256  ;;  %p2821_p6 = scmp.lt.s32.totalorder %s3188_s10, %s2819_s22 }
  0xa0   : > { %p2816_p1 = pnand %p2814_p10, %p2800_p8  ;;  %p2822_p11 = scmp.lt.s32.totalorder %s2820_s27, %s2813_s26 }
  0xa2   : > { %p2817_p9 = pneg %p2816_p1  ;;  %p2823_p12 = por %p2822_p11, %p2821_p6 }
  0xa4   : > { %p2824_p13 = pnand %p2823_p12, %p2817_p9 }
  0xa6   : > { %2827 = shalt.err (!%p2824_p13)
}
  0xa7   : > { %2585 = dma.hbm_to_vmem [thread:$0]  (!%p3184_p4), %s3182_s11, 128, %s3188_s10, %s394_s30  }
  0xa8   : > { %p3991_p3 = scmp.ne.s32.totalorder %s3981_s24, 0 }
  0xaa   : > { %413 = sbr.rel (%p3991_p3) target bundleno = 2225 (0x8b1), region = 60 }
  0xb1   : > { %s3218_s13 = sand.u32 1, %s2898_s18  }
  0xb2   : > { %s2277_s12 = sshll.u32 %s3218_s13, 3  ;;  %s416_s7 = scalar_lea.sflag [#allocation4], %s3218_s13 }
  0xb3   : > { %s3224_s26 = scalar_lea.vmem [#allocation3], %s2277_s12 }
  0xb4   : > { %2873 = dma.done.wait (%p3164_p2), %s416_s7, 128  }
  0xb5   : > { %2875 = vsyncadd (%p3164_p2), %s416_s7, 4294967168  ;;  %p3992_p6 = scmp.eq.s32.totalorder %s3006_s23, 0 }
  0xb7   : > { %2877 = dma.done.wait (%p3992_p6), [#allocation7], 11264   ;;  %p3993_p9 = pmov %p3992_p6 }
  0xb8   : > { %p3994_p4 = pmov %p3992_p6 }
  0xb9   : > { %2879 = vsyncadd (%p3993_p9), [#allocation7], 4294956032 }
  0xba   : > { %2881 = dma.done.wait (%p3994_p4), [#allocation10], 3072   ;;  %p3995_p8 = pmov %p3994_p4 }
  0xbb   : > { %p3996_p0 = pmov %p3994_p4 }
  0xbc   : > { %2883 = vsyncadd (%p3995_p8), [#allocation10], 4294964224 }
  0xbd   : > { %2885 = dma.done.wait (%p3996_p0), [#allocation13], 4096   ;;  %p3997_p5 = pmov %p3996_p0 }
  0xbe   : > { %vm487_vm0 = vcmask 523264   ;;  %v486_v0 = vld [vmem:[%s3224_s26] sm:$0xff]  ;;  %v511_v7 = vld [vmem:[#allocation6 + $0x8] sm:$0xff]  ;;  %v510_v12 = vld [vmem:[#allocation6] sm:$0xff]  ;;  %v3938_v58 = vmov 0.0   ;;  %s2921_s29 = smov 64  }
  0xbf   : > { %2887 = vsyncadd (%p3997_p5), [#allocation13], 4294963200  ;;  %v488_v1 = vsel %vm487_vm0, %v486_v0, 0.0  ;;  %v521_v8 = vld [vmem:[#allocation6 + $0x58] sm:$0xff]  ;;  %v515_v9 = vld [vmem:[#allocation6 + $0x28] sm:$0xff]  ;;  %711 = vmatprep.mubr.f32.mxu1 %v3938_v58  ;;  %853 = vmatprep.mubr.f32.mxu0 %v3938_v58  ;;  %vm2923_vm1 = vmmov 0  }
  0xc0   : > { %489 = vadd.xlane.f32.xlu0 %v488_v1  ;;  %v2390_v10 = vpack.c.bf16 %v521_v8, %v511_v7  ;;  %v525_v11 = vld [vmem:[#allocation6 + $0x78] sm:$0xff]  ;;  %v520_v13 = vld [vmem:[#allocation6 + $0x50] sm:$0xff]  ;;  %v514_v16 = vld [vmem:[#allocation6 + $0x20] sm:$0xff]  ;;  %vm1691_vm2 = vcmask 1040384   ;;  %vm1693_vm3 = vcmask 1041408   ;;  %vm1695_vm4 = vcmask 1042432  }
  0xc1   : > { %v2422_v14 = vpack.c.bf16 %v525_v11, %v515_v9  ;;  %v2392_v15 = vpack.c.bf16 %v520_v13, %v510_v12  ;;  %v524_v17 = vld [vmem:[#allocation6 + $0x70] sm:$0xff]  ;;  %v531_v19 = vld [vmem:[#allocation6 + $0xa8] sm:$0xff]  ;;  %v541_v20 = vld [vmem:[#allocation6 + $0xf8] sm:$0xff]  ;;  %vm1697_vm5 = vcmask 1043456   ;;  %p482_p2 = scmp.lt.s32.totalorder %s3006_s23, 1  ;;  %vm1699_vm6 = vcmask 1044480  }
  0xc2   : > { %2391 = vmatprep.subr.bf16.mxu1 %v2390_v10  ;;  %v2424_v18 = vpack.c.bf16 %v524_v17, %v514_v16  ;;  %v535_v21 = vld [vmem:[#allocation6 + $0xc8] sm:$0xff]  ;;  %v2394_v22 = vpack.c.bf16 %v541_v20, %v531_v19  ;;  %v545_v23 = vld [vmem:[#allocation6 + $0x118] sm:$0xff]  ;;  %v530_v24 = vld [vmem:[#allocation6 + $0xa0] sm:$0xff]  ;;  %vm1701_vm7 = vcmask 1045504   ;;  %vm1703_vm8 = vcmask 1046528   ;;  %s4103_s10 = sld [smem:[#allocation74_spill]] }
  0xc3   : > { %2423 = vmatprep.subr.bf16.mxu0 %v2422_v14  ;;  %2393 = vmatpush1.bf16.msra.mxu1 %v2392_v15  ;;  %v540_v25 = vld [vmem:[#allocation6 + $0xf0] sm:$0xff]  ;;  %v2426_v26 = vpack.c.bf16 %v545_v23, %v535_v21  ;;  %v534_v28 = vld [vmem:[#allocation6 + $0xc0] sm:$0xff]  ;;  %v551_v31 = vld [vmem:[#allocation6 + $0x148] sm:$0xff]  ;;  %s483_s7 = scalar_select %p482_p2, %s3006_s23, 1 }
  0xc4   : > { %2425 = vmatpush1.bf16.msra.mxu0 %v2424_v18  ;;  %v2396_v27 = vpack.c.bf16 %v540_v25, %v530_v24  ;;  %v544_v29 = vld [vmem:[#allocation6 + $0x110] sm:$0xff]  ;;  %2395 = vmatprep.subr.bf16.mxu1 %v2394_v22  ;;  %v561_v32 = vld [vmem:[#allocation6 + $0x198] sm:$0xff]  ;;  %v555_v33 = vld [vmem:[#allocation6 + $0x168] sm:$0xff]  ;;  %s2296_s22 = sshll.u32 %s3006_s23, 7  ;;  %s475_s27 = scalar_lea.vmem [#allocation14], %s2277_s12 }
  0xc5   : > { %v2428_v30 = vpack.c.bf16 %v544_v29, %v534_v28  ;;  %2427 = vmatprep.subr.bf16.mxu0 %v2426_v26  ;;  %v2398_v34 = vpack.c.bf16 %v561_v32, %v551_v31  ;;  %v565_v35 = vld [vmem:[#allocation6 + $0x1b8] sm:$0xff]  ;;  %v550_v36 = vld [vmem:[#allocation6 + $0x140] sm:$0xff]  ;;  %v560_v37 = vld [vmem:[#allocation6 + $0x190] sm:$0xff]  ;;  %s2284_s24 = sshll.u32 %s483_s7, 3  ;;  %s2121_s7 = sshll.u32 %s475_s27, 4  ;;  %s3877_s7 = int_to_ptr.vmem [resolvable:$true] %s2121_s7 }
  0xc6   : > { %v2430_v38 = vpack.c.bf16 %v565_v35, %v555_v33  ;;  %v2400_v39 = vpack.c.bf16 %v560_v37, %v550_v36  ;;  %v554_v40 = vld [vmem:[#allocation6 + $0x160] sm:$0xff]  ;;  %v564_v41 = vld [vmem:[#allocation6 + $0x1b0] sm:$0xff]  ;;  %v571_v43 = vld [vmem:[#allocation6 + $0x1e8] sm:$0xff]  ;;  %s4106_s11 = sld [smem:[#allocation73_spill]]  ;;  %s2828_s23 = scalar_lea.vmem %s3877_s7, 128 }
  0xc7   : > { %2397 = vmatpush1.bf16.msra.mxu1 %v2396_v27  ;;  %v2432_v42 = vpack.c.bf16 %v564_v41, %v554_v40  ;;  %v581_v44 = vld [vmem:[#allocation6 + $0x238] sm:$0xff]  ;;  %v575_v45 = vld [vmem:[#allocation6 + $0x208] sm:$0xff]  ;;  %v570_v48 = vld [vmem:[#allocation6 + $0x1e0] sm:$0xff]  ;;  %p2829_p7 = scmp.ne.s32.totalorder %s3877_s7, %s2828_s23  ;;  %p4107_p10 = scmp.ne.s32.totalorder %s3988_s15, 0 }
  0xc8   : > { %2429 = vmatpush1.bf16.msra.mxu0 %v2428_v30  ;;  %2399 = vmatprep.subr.bf16.mxu1 %v2398_v34  ;;  %v2402_v46 = vpack.c.bf16 %v581_v44, %v571_v43  ;;  %v585_v47 = vld [vmem:[#allocation6 + $0x258] sm:$0xff]  ;;  %v580_v49 = vld [vmem:[#allocation6 + $0x230] sm:$0xff]  ;;  %v574_v52 = vld [vmem:[#allocation6 + $0x200] sm:$0xff]  ;;  %s485_s25 = scalar_lea.vmem %s4103_s10, %s2284_s24  ;;  %s2924_s12 = smov [#allocation14]  }
  0xc9   : > { %2431 = vmatprep.subr.bf16.mxu0 %v2430_v38  ;;  %v2434_v50 = vpack.c.bf16 %v585_v47, %v575_v45  ;;  %v2404_v51 = vpack.c.bf16 %v580_v49, %v570_v48  ;;  %v584_v53 = vld [vmem:[#allocation6 + $0x250] sm:$0xff]  ;;  %v513_v55 = vld [vmem:[#allocation6 + $0x18] sm:$0xff]  ;;  %v523_v56 = vld [vmem:[#allocation6 + $0x68] sm:$0xff]  ;;  %p2830_p1 = pnand %p2829_p7, %p4107_p10 }
  0xca   : > { %v2436_v54 = vpack.c.bf16 %v584_v53, %v574_v52  ;;  %v519_v57 = vld [vmem:[#allocation6 + $0x48] sm:$0xff]  ;;  %v2406_v59 = vpack.c.bf16 %v523_v56, %v513_v55  ;;  %v529_v60 = vld [vmem:[#allocation6 + $0x98] sm:$0xff]  ;;  %v2285_v1 = vld [vmem:[%s3921_s1] ss:$0 sm:$0xff] }
  0xcb   : > { %2401 = vmatpush1.bf16.msra.mxu1 %v2400_v39  ;;  %v2454_v61 = vpack.c.bf16 %v529_v60, %v519_v57  ;;  %v533_v7 = vld [vmem:[#allocation6 + $0xb8] sm:$0xff]  ;;  %v543_v9 = vld [vmem:[#allocation6 + $0x108] sm:$0xff]  ;;  %v532_v15 = vld [vmem:[#allocation6 + $0xb0] sm:$0xff]  ;;  %p2831_p11 = pneg %p2830_p1 }
  0xcc   : > { %2433 = vmatpush1.bf16.msra.mxu0 %v2432_v42  ;;  %2403 = vmatprep.subr.bf16.mxu1 %v2402_v46  ;;  %v539_v10 = vld [vmem:[#allocation6 + $0xe8] sm:$0xff]  ;;  %v549_v11 = vld [vmem:[#allocation6 + $0x138] sm:$0xff]  ;;  %v542_v16 = vld [vmem:[#allocation6 + $0x100] sm:$0xff]  ;;  %v2410_v18 = vpack.c.bf16 %v543_v9, %v533_v7  ;;  %v594_v9 = vlaneseq  ;;  %s3875_s10 = scalar_lea.hbm %s4106_s11, %s2296_s22 }
  0xcd   : > { %2435 = vmatprep.subr.bf16.mxu0 %v2434_v50  ;;  %v2458_v19 = vpack.c.bf16 %v549_v11, %v539_v10  ;;  %v538_v20 = vld [vmem:[#allocation6 + $0xe0] sm:$0xff]  ;;  %v548_v21 = vld [vmem:[#allocation6 + $0x130] sm:$0xff]  ;;  %v553_v22 = vld [vmem:[#allocation6 + $0x158] sm:$0xff] }
  0xce   : > { %v563_v23 = vld [vmem:[#allocation6 + $0x1a8] sm:$0xff]  ;;  %v569_v25 = vld [vmem:[#allocation6 + $0x1d8] sm:$0xff]  ;;  %v2460_v26 = vpack.c.bf16 %v548_v21, %v538_v20  ;;  %v552_v27 = vld [vmem:[#allocation6 + $0x150] sm:$0xff]  ;;  %v3270_v10 = vshrl.u32 %v594_v9, 7 }
  0xcf   : > { %2405 = vmatpush1.bf16.msra.mxu1 %v2404_v51  ;;  %v559_v24 = vld [vmem:[#allocation6 + $0x188] sm:$0xff]  ;;  %v562_v28 = vld [vmem:[#allocation6 + $0x1a0] sm:$0xff]  ;;  %v2414_v29 = vpack.c.bf16 %v563_v23, %v553_v22  ;;  %v568_v32 = vld [vmem:[#allocation6 + $0x1d0] sm:$0xff] }
  0xd0   : > { %2437 = vmatpush1.bf16.msra.mxu0 %v2436_v54  ;;  %2407 = vmatprep.subr.bf16.mxu1 %v2406_v59  ;;  %v2462_v30 = vpack.c.bf16 %v569_v25, %v559_v24  ;;  %v558_v31 = vld [vmem:[#allocation6 + $0x180] sm:$0xff]  ;;  %v573_v33 = vld [vmem:[#allocation6 + $0x1f8] sm:$0xff]  ;;  %v583_v34 = vld [vmem:[#allocation6 + $0x248] sm:$0xff]  ;;  %v2416_v37 = vpack.c.bf16 %v562_v28, %v552_v27  ;;  %v596_v11 = vsub.s32 0, %v3270_v10  ;;  %v604_v28 = vsub.s32 2, %v3270_v10 }
  0xd1   : > { %2455 = vmatprep.subr.bf16.mxu0 %v2454_v61  ;;  %v579_v35 = vld [vmem:[#allocation6 + $0x228] sm:$0xff]  ;;  %v589_v36 = vld [vmem:[#allocation6 + $0x278] sm:$0xff]  ;;  %v2464_v38 = vpack.c.bf16 %v568_v32, %v558_v31  ;;  %v572_v39 = vld [vmem:[#allocation6 + $0x1f0] sm:$0xff]  ;;  %v2418_v40 = vpack.c.bf16 %v583_v34, %v573_v33  ;;  %v608_v31 = vsub.s32 3, %v3270_v10 }
  0xd2   : > { %v2466_v41 = vpack.c.bf16 %v589_v36, %v579_v35  ;;  %v582_v42 = vld [vmem:[#allocation6 + $0x240] sm:$0xff]  ;;  %v588_v44 = vld [vmem:[#allocation6 + $0x270] sm:$0xff]  ;;  %v517_v45 = vld [vmem:[#allocation6 + $0x38] sm:$0xff] }
  0xd3   : > { %v578_v43 = vld [vmem:[#allocation6 + $0x220] sm:$0xff]  ;;  %v527_v46 = vld [vmem:[#allocation6 + $0x88] sm:$0xff]  ;;  %v2420_v47 = vpack.c.bf16 %v582_v42, %v572_v39  ;;  %v516_v50 = vld [vmem:[#allocation6 + $0x30] sm:$0xff] }
  0xd4   : > { %v2468_v48 = vpack.c.bf16 %v588_v44, %v578_v43  ;;  %v2438_v49 = vpack.c.bf16 %v527_v46, %v517_v45  ;;  %v526_v51 = vld [vmem:[#allocation6 + $0x80] sm:$0xff]  ;;  %v537_v52 = vld [vmem:[#allocation6 + $0xd8] sm:$0xff]  ;;  %v547_v53 = vld [vmem:[#allocation6 + $0x128] sm:$0xff] }
  0xd5   : > { %v2440_v54 = vpack.c.bf16 %v526_v51, %v516_v50  ;;  %v2442_v55 = vpack.c.bf16 %v547_v53, %v537_v52  ;;  %v536_v56 = vld [vmem:[#allocation6 + $0xd0] sm:$0xff]  ;;  %v546_v57 = vld [vmem:[#allocation6 + $0x120] sm:$0xff]  ;;  %v557_v59 = vld [vmem:[#allocation6 + $0x178] sm:$0xff]  ;;  %v620_v50 = vsub.s32 6, %v3270_v10 }
  0xd6   : > { %v567_v60 = vld [vmem:[#allocation6 + $0x1c8] sm:$0xff]  ;;  %v2444_v61 = vpack.c.bf16 %v546_v57, %v536_v56  ;;  %v586_v7 = vld [vmem:[#allocation6 + $0x260] sm:$0xff] }
  0xd7   : > { %v591_v27 = vld [vmem:[%s3923_s3 + $0x8] sm:$0x3] }
  0xd8   : > { %v629_v32 = vrot.slane %v591_v27, %v596_v11 }
 0x14d   : > { %v490_v2 = vpop.xlane.xlu0 %489 }
 0x14e   : > { %v492_v3 = vmul.f32 0.015625, %v490_v2  ;;  %v512_v2 = vld [vmem:[#allocation6 + $0x10] sm:$0xff] }
 0x150   : > { %v3244_v4 = vsub.f32 %v486_v0, %v492_v3  ;;  %v522_v3 = vld [vmem:[#allocation6 + $0x60] sm:$0xff] }
 0x151   : > { %v2408_v13 = vpack.c.bf16 %v522_v3, %v512_v2  ;;  %v587_v2 = vld [vmem:[#allocation6 + $0x268] sm:$0xff] }
 0x152   : > { %v494_v5 = vmul.f32 %v3244_v4, %v3244_v4 }
 0x154   : > { %v495_v6 = vsel %vm487_vm0, %v494_v5, 0.0  ;;  %v518_v5 = vld [vmem:[#allocation6 + $0x40] sm:$0xff] }
 0x155   : > { %496 = vadd.xlane.f32.xlu0 %v495_v6  ;;  %v528_v6 = vld [vmem:[#allocation6 + $0x90] sm:$0xff] }
 0x156   : > { %v2456_v14 = vpack.c.bf16 %v528_v6, %v518_v5  ;;  %v576_v6 = vld [vmem:[#allocation6 + $0x210] sm:$0xff] }
 0x1e2   : > { %v497_v62 = vpop.xlane.xlu0 %496 }
 0x1e3   : > { %v498_v63 = vmul.f32 0.015625, %v497_v62  ;;  %v2446_v62 = vpack.c.bf16 %v567_v60, %v557_v59 }
 0x1e5   : > { %v499_v0 = vadd.f32 1e-05, %v498_v63  ;;  %v556_v63 = vld [vmem:[#allocation6 + $0x170] sm:$0xff] }
 0x1e7   : > { %2649 = vrsqrt.f32 %v499_v0  ;;  %v566_v0 = vld [vmem:[#allocation6 + $0x1c0] sm:$0xff] }
 0x1e8   : > { %v2448_v3 = vpack.c.bf16 %v566_v0, %v556_v63 }
 0x1f1   : > { %v2650_v8 = vpop.eup %2649 }
 0x1f2   : > { %v501_v12 = vmul.f32 %v2650_v8, %v3244_v4  ;;  %v2412_v4 = vpack.c.bf16 %v542_v16, %v532_v15  ;;  %v2452_v8 = vpack.c.bf16 %v586_v7, %v576_v6  ;;  %v616_v15 = vsub.s32 5, %v3270_v10 }
 0x1f4   : > { %v3255_v17 = vmul.f32 %v2285_v1, %v501_v12  ;;  %v577_v1 = vld [vmem:[#allocation6 + $0x218] sm:$0xff]  ;;  %v612_v12 = vsub.s32 4, %v3270_v10 }
 0x1f5   : > { %v2450_v5 = vpack.c.bf16 %v587_v2, %v577_v1 }
 0x1f6   : > { %2286 = vmatmul.mubr.msk.f32.vlgmr.msra.gmra.mrb[0].mxu1 %vm487_vm0, %v3255_v17  ;;  %2288 = vmatmul.mubr.msk.f32.vlgmr.msra.gmra.mrb[0].mxu0 %vm487_vm0, %v3255_v17 }
 0x1f7   : > { %2409 = vmatpush1.bf16.msra.mxu1 %v2408_v13  ;;  %2457 = vmatpush1.bf16.msra.mxu0 %v2456_v14  ;;  %v3277_v13 = vld [vmem:[%s3923_s3] sm:$0xff]  ;;  %v600_v14 = vsub.s32 1, %v3270_v10 }
 0x1f8   : > { %2411 = vmatprep.subr.bf16.mxu1 %v2410_v18  ;;  %2459 = vmatprep.subr.bf16.mxu0 %v2458_v19  ;;  %v597_v16 = vrot.slane %v3277_v13, %v596_v11  ;;  %v617_v19 = vrot.slane %v3277_v13, %v616_v15  ;;  %v605_v33 = vrot.slane %v3277_v13, %v604_v28 }
 0x1f9   : > { %782 = vmatprep.mubr.f32.mxu1 %v3938_v58  ;;  %995 = vmatprep.mubr.f32.mxu0 %v3938_v58  ;;  %v601_v18 = vrot.slane %v3277_v13, %v600_v14  ;;  %v609_v36 = vrot.slane %v3277_v13, %v608_v31  ;;  %v621_v59 = vrot.slane %v3277_v13, %v620_v50 }
 0x1fb   : > { %2413 = vmatpush1.bf16.msra.mxu1 %v2412_v4  ;;  %2461 = vmatpush1.bf16.msra.mxu0 %v2460_v26 }
 0x1fc   : > { %2415 = vmatprep.subr.bf16.mxu1 %v2414_v29  ;;  %2463 = vmatprep.subr.bf16.mxu0 %v2462_v30 }
 0x1ff   : > { %2417 = vmatpush1.bf16.msra.mxu1 %v2416_v37  ;;  %2465 = vmatpush1.bf16.msra.mxu0 %v2464_v38  ;;  %v633_v37 = vrot.slane %v591_v27, %v600_v14 }
 0x200   : > { %2419 = vmatprep.subr.bf16.mxu1 %v2418_v40  ;;  %2467 = vmatprep.subr.bf16.mxu0 %v2466_v41 }
 0x203   : > { %2421 = vmatpush1.bf16.msra.mxu1 %v2420_v47  ;;  %2469 = vmatpush1.bf16.msra.mxu0 %v2468_v48  ;;  %v3309_v47 = vld [vmem:[%s3924_s4] sm:$0xf] }
 0x204   : > { %2439 = vmatprep.subr.bf16.mxu1 %v2438_v49 }
 0x206   : > { %2287 = vmatmul.mubr.msk.f32.vlgmr.msra.gmra.mrb[2].mxu1 %vm487_vm0, %v3255_v17  ;;  %2290 = vmatmul.mubr.msk.f32.vlgmr.msra.gmra.mrb[2].mxu0 %vm487_vm0, %v3255_v17 }
 0x207   : > { %2441 = vmatpush1.bf16.msra.mxu1 %v2440_v54  ;;  %924 = vmatprep.mubr.f32.mxu1 %v3938_v58  ;;  %v624_v54 = vsub.s32 7, %v3270_v10 }
 0x208   : > { %2443 = vmatprep.subr.bf16.mxu1 %v2442_v55 }
 0x209   : > { %v625_v0 = vrot.slane %v3277_v13, %v624_v54 }
 0x20b   : > { %2445 = vmatpush1.bf16.msra.mxu1 %v2444_v61 }
 0x20c   : > { %2447 = vmatprep.subr.bf16.mxu1 %v2446_v62 }
 0x20f   : > { %2449 = vmatpush1.bf16.msra.mxu1 %v2448_v3 }
 0x210   : > { %2451 = vmatprep.subr.bf16.mxu1 %v2450_v5 }
 0x213   : > { %2453 = vmatpush1.bf16.msra.mxu1 %v2452_v8 }
 0x216   : > { %2289 = vmatmul.mubr.msk.f32.vlgmr.msra.gmra.mrb[4].mxu1 %vm487_vm0, %v3255_v17  ;;  %v613_v17 = vrot.slane %v3277_v13, %v612_v12 }
 0x2c9   : > { %v713_v20 = vpop.f32.mrb[0].mxu1  ;;  %v855_v21 = vpop.f32.mrb[0].mxu0 }
 0x2ca   : > { %v714_v22 = vadd.f32 %v713_v20, %v597_v16  ;;  %v856_v23 = vadd.f32 %v855_v21, %v613_v17  ;;  %v715_v24 = vpop.f32.mrb[1].mxu1  ;;  %v857_v25 = vpop.f32.mrb[1].mxu0 }
 0x2cb   : > { %v716_v4 = vadd.f32 %v715_v24, %v601_v18  ;;  %v858_v26 = vadd.f32 %v857_v25, %v617_v19 }
 0x2cc   : > { %1002 = vst [vmem:[#allocation2] sm:$0xff] %v714_v22  ;;  %1006 = vst [vmem:[#allocation2 + $0x20] sm:$0xff] %v856_v23 }
 0x2cd   : > { %1003 = vst [vmem:[#allocation2 + $0x8] sm:$0xff] %v716_v4  ;;  %1007 = vst [vmem:[#allocation2 + $0x28] sm:$0xff] %v858_v26 }
 0x2d3   : > { %v3289_v29 = vld [vmem:[#allocation2 + $0x21] ss:$0 sm:$0xff]  ;;  %v1041_v30 = vld [vmem:[#allocation2 + $0x20] ss:$0 sm:$0xff]  ;;  %v3296_v34 = vld [vmem:[#allocation2 + $0x22] ss:$0 sm:$0xff] }
 0x2d4   : > { %1177 = vrot.lane.b32.xlu0 %v3289_v29, %s2921_s29  ;;  %1065 = vrot.lane.b32.xlu1 %v1041_v30, %s2921_s29  ;;  %v1093_v35 = vld [vmem:[#allocation2 + $0x28] ss:$0 sm:$0xff]  ;;  %v3302_v46 = vld [vmem:[#allocation2 + $0x23] ss:$0 sm:$0xff]  ;;  %v3311_v48 = vld [vmem:[#allocation2 + $0x24] ss:$0 sm:$0xff]  ;;  %v1042_v49 = vmul.f32 %v1041_v30, %v3309_v47 }
 0x2d5   : > { %3998 = vst [vmem:[#allocation20_spill] sm:$0xff] %v3311_v48  ;;  %v1094_v51 = vmul.f32 %v1093_v35, %v3309_v47  ;;  %v3318_v53 = vld [vmem:[#allocation2 + $0x25] ss:$0 sm:$0xff]  ;;  %v3326_v63 = vld [vmem:[#allocation2 + $0x29] ss:$0 sm:$0xff] }
 0x2d6   : > { %3999 = vst [vmem:[#allocation21_spill] sm:$0xff] %v3318_v53  ;;  %v1044_v55 = vrot.slane %v1042_v49, 1  ;;  %v3333_v9 = vld [vmem:[#allocation2 + $0x2a] ss:$0 sm:$0xff]  ;;  %v3340_v11 = vld [vmem:[#allocation2 + $0x2b] ss:$0 sm:$0xff] }
 0x2d7   : > { %v1096_v61 = vrot.slane %v1094_v51, 1  ;;  %4000 = vst [vmem:[#allocation22_spill] sm:$0xff] %v3340_v11  ;;  %v3348_v13 = vld [vmem:[#allocation2 + $0x2c] ss:$0 sm:$0xff]  ;;  %v1143_v28 = vld [vmem:[#allocation2 + $0x1] ss:$0 sm:$0xff] }
 0x2d8   : > { %1262 = vrot.lane.b32.xlu0 %v3296_v34, %s2921_s29  ;;  %1117 = vrot.lane.b32.xlu1 %v1093_v35, %s2921_s29  ;;  %4001 = vst [vmem:[#allocation23_spill] sm:$0xff] %v3348_v13 }
 0x2d9   : > { %v997_v38 = vpop.f32.mrb[2].mxu0  ;;  %v784_v39 = vpop.f32.mrb[2].mxu1 }
 0x2da   : > { %v998_v40 = vadd.f32 %v997_v38, %v629_v32  ;;  %v785_v41 = vadd.f32 %v784_v39, %v605_v33  ;;  %v786_v42 = vpop.f32.mrb[3].mxu1  ;;  %v999_v43 = vpop.f32.mrb[3].mxu0 }
 0x2db   : > { %v787_v44 = vadd.f32 %v786_v42, %v609_v36  ;;  %v1000_v45 = vadd.f32 %v999_v43, %v633_v37 }
 0x2dc   : > { %1010 = vst [vmem:[#allocation2 + $0x40] sm:$0xff] %v998_v40  ;;  %1004 = vst [vmem:[#allocation2 + $0x10] sm:$0xff] %v785_v41  ;;  %1347 = vrot.lane.b32.xlu0 %v3302_v46, %s2921_s29 }
 0x2dd   : > { %1005 = vst [vmem:[#allocation2 + $0x18] sm:$0xff] %v787_v44  ;;  %1011 = vst [vmem:[#allocation2 + $0x48] sm:$0xff] %v1000_v45 }
 0x2e0   : > { %1432 = vrot.lane.b32.xlu0 %v3311_v48, %s2921_s29  ;;  %v1713_v48 = vld [vmem:[#allocation8 + $0x38] sm:$0xff] }
 0x2e3   : > { %v1039_v52 = vld [vmem:[#allocation2 + $0x10] ss:$0 sm:$0xff]  ;;  %v1053_v62 = vld [vmem:[#allocation2 + $0x40] ss:$0 sm:$0xff]  ;;  %v1160_v8 = vld [vmem:[#allocation2 + $0x11] ss:$0 sm:$0xff] }
 0x2e4   : > { %1060 = vrot.lane.b32.xlu1 %v1039_v52, %s2921_s29  ;;  %v1040_v56 = vmul.f32 %v1039_v52, %v3309_v47  ;;  %1517 = vrot.lane.b32.xlu0 %v3318_v53, %s2921_s29  ;;  %v1091_v60 = vld [vmem:[#allocation2 + $0x18] ss:$0 sm:$0xff]  ;;  %v3338_v10 = vld [vmem:[#allocation2 + $0x12] ss:$0 sm:$0xff]  ;;  %v3346_v12 = vld [vmem:[#allocation2 + $0x13] ss:$0 sm:$0xff]  ;;  %v1054_v15 = vmul.f32 %v1053_v62, %v3309_v47 }
 0x2e5   : > { %v1092_v1 = vmul.f32 %v1091_v60, %v3309_v47  ;;  %v1105_v16 = vld [vmem:[#allocation2 + $0x48] ss:$0 sm:$0xff]  ;;  %v3360_v21 = vld [vmem:[#allocation2 + $0x14] ss:$0 sm:$0xff]  ;;  %v3362_v22 = vld [vmem:[#allocation2 + $0x41] ss:$0 sm:$0xff] }
 0x2e6   : > { %v1046_v57 = vadd.f32 %v1044_v55, %v1040_v56  ;;  %4002 = vst [vmem:[#allocation24_spill] sm:$0xff] %v3360_v21  ;;  %v1106_v23 = vmul.f32 %v1105_v16, %v3309_v47  ;;  %v1056_v24 = vrot.slane %v1054_v15, 3  ;;  %v3369_v26 = vld [vmem:[#allocation2 + $0x15] ss:$0 sm:$0xff]  ;;  %v3373_v31 = vld [vmem:[#allocation2 + $0x42] ss:$0 sm:$0xff] }
 0x2e7   : > { %v1098_v3 = vadd.f32 %v1096_v61, %v1092_v1  ;;  %4003 = vst [vmem:[#allocation25_spill] sm:$0xff] %v3369_v26  ;;  %v1194_v33 = vld [vmem:[#allocation2 + $0x19] ss:$0 sm:$0xff]  ;;  %v3390_v40 = vld [vmem:[#allocation2 + $0x43] ss:$0 sm:$0xff] }
 0x2e8   : > { %1083 = vrot.lane.b32.xlu1 %v1053_v62, %s2921_s29  ;;  %1211 = vrot.lane.b32.xlu0 %v3326_v63, %s2921_s29  ;;  %v1108_v32 = vrot.slane %v1106_v23, 3  ;;  %v3398_v42 = vld [vmem:[#allocation2 + $0x44] ss:$0 sm:$0xff]  ;;  %v3403_v43 = vld [vmem:[#allocation2 + $0x49] ss:$0 sm:$0xff] }
 0x2e9   : > { %v926_v2 = vpop.f32.mrb[4].mxu1  ;;  %4004 = vst [vmem:[#allocation26_spill] sm:$0xff] %v3398_v42  ;;  %v3408_v44 = vld [vmem:[#allocation2 + $0x1a] ss:$0 sm:$0xff]  ;;  %v3410_v45 = vld [vmem:[#allocation2 + $0x4a] ss:$0 sm:$0xff] }
 0x2ea   : > { %v927_v5 = vadd.f32 %v926_v2, %v621_v59  ;;  %v928_v6 = vpop.f32.mrb[5].mxu1  ;;  %v3416_v49 = vld [vmem:[#allocation2 + $0x1b] ss:$0 sm:$0xff]  ;;  %v3418_v50 = vld [vmem:[#allocation2 + $0x4b] ss:$0 sm:$0xff] }
 0x2eb   : > { %v929_v7 = vadd.f32 %v928_v6, %v625_v0  ;;  %4005 = vst [vmem:[#allocation27_spill] sm:$0xff] %v3418_v50  ;;  %v3424_v51 = vld [vmem:[#allocation2 + $0x1c] ss:$0 sm:$0xff]  ;;  %v3426_v52 = vld [vmem:[#allocation2 + $0x4c] ss:$0 sm:$0xff] }
 0x2ec   : > { %1008 = vst [vmem:[#allocation2 + $0x30] sm:$0xff] %v927_v5  ;;  %1172 = vrot.lane.b32.xlu1 %v1160_v8, %s2921_s29  ;;  %1296 = vrot.lane.b32.xlu0 %v3333_v9, %s2921_s29  ;;  %4006 = vst [vmem:[#allocation28_spill] sm:$0xff] %v3424_v51  ;;  %v3432_v54 = vld [vmem:[#allocation2 + $0x1d] ss:$0 sm:$0xff]  ;;  %v3437_v55 = vld [vmem:[#allocation2 + $0x16] ss:$0 sm:$0xff] }
 0x2ed   : > { %1009 = vst [vmem:[#allocation2 + $0x38] sm:$0xff] %v929_v7  ;;  %4007 = vst [vmem:[#allocation29_spill] sm:$0xff] %v3426_v52  ;;  %v3439_v56 = vld [vmem:[#allocation2 + $0x45] ss:$0 sm:$0xff]  ;;  %v3447_v59 = vld [vmem:[#allocation2 + $0x2d] ss:$0 sm:$0xff] }
 0x2ee   : > { %4008 = vst [vmem:[#allocation30_spill] sm:$0xff] %v3432_v54  ;;  %4009 = vst [vmem:[#allocation31_spill] sm:$0xff] %v3437_v55  ;;  %v3460_v62 = vld [vmem:[#allocation2 + $0x26] ss:$0 sm:$0xff]  ;;  %v3473_v2 = vld [vmem:[#allocation2 + $0x2] ss:$0 sm:$0xff] }
 0x2ef   : > { %4010 = vst [vmem:[#allocation32_spill] sm:$0xff] %v3439_v56  ;;  %4011 = vst [vmem:[#allocation33_spill] sm:$0xff] %v3447_v59  ;;  %v3481_v5 = vld [vmem:[#allocation2 + $0x46] ss:$0 sm:$0xff]  ;;  %v3489_v7 = vld [vmem:[#allocation2 + $0x2e] ss:$0 sm:$0xff] }
 0x2f0   : > { %1257 = vrot.lane.b32.xlu1 %v3338_v10, %s2921_s29  ;;  %1381 = vrot.lane.b32.xlu0 %v3340_v11, %s2921_s29  ;;  %4013 = vst [vmem:[#allocation35_spill] sm:$0xff] %v3460_v62  ;;  %4016 = vst [vmem:[#allocation38_spill] sm:$0xff] %v3481_v5  ;;  %v3503_v15 = vld [vmem:[#allocation2 + $0x5] ss:$0 sm:$0xff] }
 0x2f1   : > { %4018 = vst [vmem:[#allocation40_spill] sm:$0xff] %v3489_v7  ;;  %4020 = vst [vmem:[#allocation42_spill] sm:$0xff] %v3503_v15 }
 0x2f3   : > { %v1047_v14 = vld [vmem:[#allocation2 + $0x30] ss:$0 sm:$0xff]  ;;  %v1165_v39 = vld [vmem:[#allocation2 + $0x31] ss:$0 sm:$0xff]  ;;  %v3458_v61 = vld [vmem:[#allocation2 + $0x32] ss:$0 sm:$0xff] }
 0x2f4   : > { %1342 = vrot.lane.b32.xlu1 %v3346_v12, %s2921_s29  ;;  %1466 = vrot.lane.b32.xlu0 %v3348_v13, %s2921_s29  ;;  %v1048_v17 = vmul.f32 %v1047_v14, %v3309_v47  ;;  %v3356_v18 = vld [vmem:[#allocation2 + $0x38] ss:$0 sm:$0xff]  ;;  %v3466_v0 = vld [vmem:[#allocation2 + $0x33] ss:$0 sm:$0xff]  ;;  %v3471_v1 = vld [vmem:[#allocation2 + $0x34] ss:$0 sm:$0xff] }
 0x2f5   : > { %v1100_v20 = vmul.f32 %v3356_v18, %v3309_v47  ;;  %4014 = vst [vmem:[#allocation36_spill] sm:$0xff] %v3471_v1  ;;  %v3487_v6 = vld [vmem:[#allocation2 + $0x36] ss:$0 sm:$0xff] }
 0x2f6   : > { %v1050_v19 = vrot.slane %v1048_v17, 2  ;;  %4017 = vst [vmem:[#allocation39_spill] sm:$0xff] %v3487_v6  ;;  %v3511_v17 = vld [vmem:[#allocation2 + $0xa] ss:$0 sm:$0xff]  ;;  %v1712_v13 = vld [vmem:[#allocation8 + $0x30] sm:$0xff] }
 0x2f7   : > { %v1102_v4 = vrot.slane %v1100_v20, 2  ;;  %v3521_v20 = vld [vmem:[#allocation2 + $0xb] ss:$0 sm:$0xff] }
 0x2f8   : > { %1427 = vrot.lane.b32.xlu1 %v3360_v21, %s2921_s29  ;;  %1189 = vrot.lane.b32.xlu0 %v3362_v22, %s2921_s29  ;;  %v1052_v25 = vadd.f32 %v1050_v19, %v1046_v57  ;;  %v3445_v57 = vld [vmem:[#allocation2] ss:$0 sm:$0xff]  ;;  %v3519_v19 = vld [vmem:[#allocation2 + $0x1e] ss:$0 sm:$0xff]  ;;  %4022 = vst [vmem:[#allocation44_spill] sm:$0xff] %v3521_v20  ;;  %v1790_v21 = vld [vmem:[#allocation9 + $0x10] sm:$0xff] }
 0x2f9   : > { %v1104_v30 = vadd.f32 %v1102_v4, %v1098_v3  ;;  %v3479_v3 = vld [vmem:[#allocation2 + $0x35] ss:$0 sm:$0xff]  ;;  %4021 = vst [vmem:[#allocation43_spill] sm:$0xff] %v3519_v19 }
 0x2fa   : > { %v3371_v27 = vadd.f32 %v1056_v24, %v1052_v25  ;;  %4015 = vst [vmem:[#allocation37_spill] sm:$0xff] %v3479_v3  ;;  %v3529_v24 = vld [vmem:[#allocation2 + $0x3a] ss:$0 sm:$0xff]  ;;  %v3531_v25 = vld [vmem:[#allocation2 + $0x7] ss:$0 sm:$0xff] }
 0x2fb   : > { %v3388_v38 = vadd.f32 %v1108_v32, %v1104_v30  ;;  %4023 = vst [vmem:[#allocation45_spill] sm:$0xff] %v3531_v25  ;;  %v3539_v30 = vld [vmem:[#allocation2 + $0x4] ss:$0 sm:$0xff]  ;;  %v3541_v32 = vld [vmem:[#allocation2 + $0xd] ss:$0 sm:$0xff] }
 0x2fc   : > { %1512 = vrot.lane.b32.xlu1 %v3369_v26, %s2921_s29  ;;  %1274 = vrot.lane.b32.xlu0 %v3373_v31, %s2921_s29  ;;  %v3380_v35 = vmul.f32 %v1160_v8, %v3371_v27  ;;  %v3383_v36 = vmul.f32 %v1194_v33, %v3371_v27  ;;  %v3386_v37 = vmul.f32 %v1143_v28, %v3371_v27  ;;  %v3495_v8 = vld [vmem:[#allocation2 + $0x8] ss:$0 sm:$0xff] }
 0x2fd   : > { %v3393_v41 = vmul.f32 %v1165_v39, %v3388_v38  ;;  %4024 = vst [vmem:[#allocation46_spill] sm:$0xff] %v3539_v30  ;;  %4025 = vst [vmem:[#allocation47_spill] sm:$0xff] %v3541_v32 }
 0x300   : > { %1112 = vrot.lane.b32.xlu1 %v1091_v60, %s2921_s29  ;;  %1359 = vrot.lane.b32.xlu0 %v3390_v40, %s2921_s29  ;;  %v3453_v60 = vld [vmem:[#allocation2 + $0x4d] ss:$0 sm:$0xff] }
 0x301   : > { %4012 = vst [vmem:[#allocation34_spill] sm:$0xff] %v3453_v60 }
 0x304   : > { %1135 = vrot.lane.b32.xlu1 %v1105_v16, %s2921_s29  ;;  %1444 = vrot.lane.b32.xlu0 %v3398_v42, %s2921_s29  ;;  %v3509_v16 = vld [vmem:[#allocation2 + $0x39] ss:$0 sm:$0xff]  ;;  %v3614_v42 = vld [vmem:[#allocation2 + $0xc] ss:$0 sm:$0xff] }
 0x305   : > { %4038 = vst [vmem:[#allocation60_spill] sm:$0xff] %v3614_v42 }
 0x308   : > { %1206 = vrot.lane.b32.xlu1 %v1194_v33, %s2921_s29  ;;  %1223 = vrot.lane.b32.xlu0 %v3403_v43, %s2921_s29 }
 0x30c   : > { %1291 = vrot.lane.b32.xlu1 %v3408_v44, %s2921_s29  ;;  %1308 = vrot.lane.b32.xlu0 %v3410_v45, %s2921_s29 }
 0x310   : > { %1376 = vrot.lane.b32.xlu1 %v3416_v49, %s2921_s29  ;;  %1393 = vrot.lane.b32.xlu0 %v3418_v50, %s2921_s29 }
 0x314   : > { %1461 = vrot.lane.b32.xlu1 %v3424_v51, %s2921_s29  ;;  %1478 = vrot.lane.b32.xlu0 %v3426_v52, %s2921_s29 }
 0x318   : > { %1546 = vrot.lane.b32.xlu1 %v3432_v54, %s2921_s29  ;;  %1074 = vrot.lane.b32.xlu0 %v1047_v14, %s2921_s29  ;;  %v3501_v14 = vld [vmem:[#allocation2 + $0x3] ss:$0 sm:$0xff]  ;;  %v3590_v54 = vld [vmem:[#allocation2 + $0x3d] ss:$0 sm:$0xff] }
 0x319   : > { %4019 = vst [vmem:[#allocation41_spill] sm:$0xff] %v3501_v14  ;;  %4032 = vst [vmem:[#allocation54_spill] sm:$0xff] %v3590_v54 }
 0x31c   : > { %1597 = vrot.lane.b32.xlu1 %v3437_v55, %s2921_s29  ;;  %1529 = vrot.lane.b32.xlu0 %v3439_v56, %s2921_s29  ;;  %v3563_v55 = vld [vmem:[#allocation2 + $0x9] ss:$0 sm:$0xff]  ;;  %v1706_v56 = vld [vmem:[#allocation8] sm:$0xff] }
 0x320   : > { %1016 = vrot.lane.b32.xlu1 %v3445_v57, %s2921_s29  ;;  %1551 = vrot.lane.b32.xlu0 %v3447_v59, %s2921_s29  ;;  %v3582_v59 = vld [vmem:[#allocation2 + $0x6] ss:$0 sm:$0xff] }
 0x321   : > { %4031 = vst [vmem:[#allocation53_spill] sm:$0xff] %v3582_v59 }
 0x324   : > { %1183 = vrot.lane.b32.xlu1 %v1165_v39, %s2921_s29  ;;  %1563 = vrot.lane.b32.xlu0 %v3453_v60, %s2921_s29  ;;  %v3573_v60 = vld [vmem:[#allocation2 + $0x3c] ss:$0 sm:$0xff] }
 0x325   : > { %4030 = vst [vmem:[#allocation52_spill] sm:$0xff] %v3573_v60 }
 0x328   : > { %1268 = vrot.lane.b32.xlu1 %v3458_v61, %s2921_s29  ;;  %1602 = vrot.lane.b32.xlu0 %v3460_v62, %s2921_s29 }
 0x32c   : > { %1353 = vrot.lane.b32.xlu1 %v3466_v0, %s2921_s29  ;;  %1146 = vrot.lane.b32.xlu0 %v1143_v28, %s2921_s29 }
 0x330   : > { %1438 = vrot.lane.b32.xlu1 %v3471_v1, %s2921_s29  ;;  %1231 = vrot.lane.b32.xlu0 %v3473_v2, %s2921_s29  ;;  %v2922_v1 = vmov 0.0|0.0  }
 0x331   : > { %2470 = vmatprep.subr.bf16.mxu1 %v2922_v1  ;;  %2482 = vmatprep.subr.bf16.mxu0 %v2922_v1 }
 0x334   : > { %1523 = vrot.lane.b32.xlu1 %v3479_v3, %s2921_s29  ;;  %1614 = vrot.lane.b32.xlu0 %v3481_v5, %s2921_s29 }
 0x338   : > { %1608 = vrot.lane.b32.xlu1 %v3487_v6, %s2921_s29  ;;  %1636 = vrot.lane.b32.xlu0 %v3489_v7, %s2921_s29  ;;  %v3552_v7 = vld [vmem:[#allocation2 + $0x3b] ss:$0 sm:$0xff] }
 0x339   : > { %4027 = vst [vmem:[#allocation49_spill] sm:$0xff] %v3552_v7 }
 0x33c   : > { %1126 = vrot.lane.b32.xlu1 %v3356_v18, %s2921_s29  ;;  %1031 = vrot.lane.b32.xlu0 %v3495_v8, %s2921_s29 }
 0x340   : > { %1316 = vrot.lane.b32.xlu1 %v3501_v14, %s2921_s29  ;;  %1486 = vrot.lane.b32.xlu0 %v3503_v15, %s2921_s29 }
 0x344   : > { %1217 = vrot.lane.b32.xlu1 %v3509_v16, %s2921_s29  ;;  %1240 = vrot.lane.b32.xlu0 %v3511_v17, %s2921_s29 }
 0x346   : > { %v3517_v18 = vpop.permute.xlu0 %1177  ;;  %v1066_v4 = vpop.permute.xlu1 %1065 }
 0x347   : > { %v1068_v58 = vmul.f32 %v1066_v4, %v3309_v47 }
 0x348   : > { %1631 = vrot.lane.b32.xlu1 %v3519_v19, %s2921_s29  ;;  %1325 = vrot.lane.b32.xlu0 %v3521_v20, %s2921_s29  ;;  %v1708_v20 = vld [vmem:[#allocation8 + $0x10] sm:$0xff] }
 0x349   : > { %v1070_v5 = vrot.slane %v1068_v58, 1 }
 0x34a   : > { %v3527_v23 = vpop.permute.xlu0 %1262  ;;  %v3547_v33 = vpop.permute.xlu1 %1117 }
 0x34c   : > { %1302 = vrot.lane.b32.xlu1 %v3529_v24, %s2921_s29  ;;  %1656 = vrot.lane.b32.xlu0 %v3531_v25, %s2921_s29  ;;  %v3554_v25 = vld [vmem:[#allocation2 + $0xf] ss:$0 sm:$0xff] }
 0x34d   : > { %4028 = vst [vmem:[#allocation50_spill] sm:$0xff] %v3554_v25 }
 0x34e   : > { %v3537_v28 = vpop.permute.xlu0 %1347 }
 0x350   : > { %1401 = vrot.lane.b32.xlu1 %v3539_v30, %s2921_s29  ;;  %1495 = vrot.lane.b32.xlu0 %v3541_v32, %s2921_s29  ;;  %v1791_v30 = vld [vmem:[#allocation9 + $0x18] sm:$0xff] }
 0x352   : > { %v3549_v39 = vpop.permute.xlu0 %1432 }
 0x353   : > { %4026 = vst [vmem:[#allocation48_spill] sm:$0xff] %v3549_v39 }
 0x354   : > { %1387 = vrot.lane.b32.xlu1 %v3552_v7, %s2921_s29  ;;  %1665 = vrot.lane.b32.xlu0 %v3554_v25, %s2921_s29  ;;  %v1793_v7 = vld [vmem:[#allocation9 + $0x28] sm:$0xff] }
 0x356   : > { %v1061_v6 = vpop.permute.xlu1 %1060  ;;  %v3560_v19 = vpop.permute.xlu0 %1517 }
 0x357   : > { %4029 = vst [vmem:[#allocation51_spill] sm:$0xff] %v3560_v19  ;;  %v1063_v62 = vmul.f32 %v1061_v6, %v3309_v47 }
 0x358   : > { %1155 = vrot.lane.b32.xlu1 %v3563_v55, %s2921_s29 }
 0x359   : > { %v3567_v4 = vadd.f32 %v1070_v5, %v1063_v62 }
 0x35a   : > { %v3569_v32 = vpop.permute.xlu1 %1083  ;;  %v3571_v15 = vpop.permute.xlu0 %1211 }
 0x35c   : > { %1472 = vrot.lane.b32.xlu1 %v3573_v60, %s2921_s29  ;;  %v3606_v60 = vld [vmem:[#allocation2 + $0x3e] ss:$0 sm:$0xff] }
 0x35d   : > { %4036 = vst [vmem:[#allocation58_spill] sm:$0xff] %v3606_v60 }
 0x35e   : > { %v1173_v25 = vpop.permute.xlu1 %1172  ;;  %v3577_v58 = vpop.permute.xlu0 %1296 }
 0x35f   : > { %v3580_v6 = vmul.f32 %v1173_v25, %v3371_v27  ;;  %v3598_v25 = vld [vmem:[#allocation2 + $0x4e] ss:$0 sm:$0xff] }
 0x360   : > { %1571 = vrot.lane.b32.xlu1 %v3582_v59, %s2921_s29  ;;  %4034 = vst [vmem:[#allocation56_spill] sm:$0xff] %v3598_v25  ;;  %v1707_v59 = vld [vmem:[#allocation8 + $0x8] sm:$0xff] }
 0x361   : > { %v2471_v52 = vpack.c.bf16 %v1707_v59, %v1706_v56 }
 0x362   : > { %v3586_v62 = vpop.permute.xlu1 %1257  ;;  %v3588_v5 = vpop.permute.xlu0 %1381 }
 0x363   : > { %2472 = vmatpush3.bf16.msra.mxu1 %v2471_v52  ;;  %v1710_v52 = vld [vmem:[#allocation8 + $0x20] sm:$0xff] }
 0x364   : > { %1557 = vrot.lane.b32.xlu1 %v3590_v54, %s2921_s29  ;;  %2473 = vmatprep.subr.bf16.mxu1 %v2922_v1 }
 0x366   : > { %v3594_v19 = vpop.permute.xlu1 %1342  ;;  %v3596_v3 = vpop.permute.xlu0 %1466 }
 0x367   : > { %4033 = vst [vmem:[#allocation55_spill] sm:$0xff] %v3596_v3  ;;  %v1709_v3 = vld [vmem:[#allocation8 + $0x18] sm:$0xff] }
 0x368   : > { %1648 = vrot.lane.b32.xlu1 %v3598_v25, %s2921_s29  ;;  %v2474_v56 = vpack.c.bf16 %v1709_v3, %v1708_v20  ;;  %v4042_v3 = vmov 0.0   ;;  %v2480_v20 = vpack.c.bf16 %v1713_v48, %v1712_v13 }
 0x369   : > { %2368 = vmatprep.mubr.msk.f32.mxu1 %vm2923_vm1, %v4042_v3  ;;  %2387 = vmatprep.mubr.msk.f32.mxu0 %vm2923_vm1, %v4042_v3 }
 0x36a   : > { %v3602_v53 = vpop.permute.xlu1 %1427  ;;  %v3604_v26 = vpop.permute.xlu0 %1189  ;;  %2475 = vmatpush3.bf16.msra.mxu1 %v2474_v56  ;;  %v1788_v56 = vld [vmem:[#allocation9] sm:$0xff] }
 0x36b   : > { %4035 = vst [vmem:[#allocation57_spill] sm:$0xff] %v3602_v53  ;;  %2476 = vmatprep.subr.bf16.mxu1 %v2922_v1  ;;  %v1789_v53 = vld [vmem:[#allocation9 + $0x8] sm:$0xff] }
 0x36c   : > { %1642 = vrot.lane.b32.xlu1 %v3606_v60, %s2921_s29  ;;  %v3622_v60 = vld [vmem:[#allocation2 + $0xe] ss:$0 sm:$0xff] }
 0x36d   : > { %4040 = vst [vmem:[#allocation62_spill] sm:$0xff] %v3622_v60 }
 0x36e   : > { %v3610_v54 = vpop.permute.xlu1 %1512  ;;  %v3612_v25 = vpop.permute.xlu0 %1274 }
 0x36f   : > { %4037 = vst [vmem:[#allocation59_spill] sm:$0xff] %v3610_v54  ;;  %v1711_v54 = vld [vmem:[#allocation8 + $0x28] sm:$0xff] }
 0x370   : > { %1410 = vrot.lane.b32.xlu1 %v3614_v42, %s2921_s29  ;;  %v2477_v39 = vpack.c.bf16 %v1711_v54, %v1710_v52  ;;  %v2486_v52 = vpack.c.bf16 %v1791_v30, %v1790_v21 }
 0x372   : > { %v3618_v59 = vpop.permute.xlu1 %1112  ;;  %v3620_v50 = vpop.permute.xlu0 %1359  ;;  %2478 = vmatpush3.bf16.msra.mxu1 %v2477_v39 }
 0x373   : > { %4039 = vst [vmem:[#allocation61_spill] sm:$0xff] %v3620_v50  ;;  %2479 = vmatprep.subr.bf16.mxu1 %v2922_v1 }
 0x374   : > { %1580 = vrot.lane.b32.xlu1 %v3622_v60, %s2921_s29  ;;  %v2483_v60 = vpack.c.bf16 %v1789_v53, %v1788_v56  ;;  %s4105_s29 = sld [smem:[#allocation72_spill]] }
 0x376   : > { %v3626_v51 = vpop.permute.xlu1 %1135  ;;  %v3628_v42 = vpop.permute.xlu0 %1444  ;;  %2484 = vmatpush3.bf16.msra.mxu0 %v2483_v60  ;;  %2481 = vmatpush3.bf16.msra.mxu1 %v2480_v20  ;;  %v1086_v20 = vmul.f32 %v3569_v32, %v3309_v47 }
 0x377   : > { %4041 = vst [vmem:[#allocation63_spill] sm:$0xff] %v3628_v42  ;;  %2485 = vmatprep.subr.bf16.mxu0 %v2922_v1  ;;  %v1792_v42 = vld [vmem:[#allocation9 + $0x20] sm:$0xff] }
 0x378   : > { %v2489_v48 = vpack.c.bf16 %v1793_v7, %v1792_v42 }
 0x37a   : > { %v1207_v14 = vpop.permute.xlu1 %1206  ;;  %v3632_v54 = vpop.permute.xlu0 %1223  ;;  %2487 = vmatpush3.bf16.msra.mxu0 %v2486_v52 }
 0x37b   : > { %2488 = vmatprep.subr.bf16.mxu0 %v2922_v1 }
 0x37e   : > { %v3634_v11 = vpop.permute.xlu1 %1291  ;;  %v3636_v3 = vpop.permute.xlu0 %1308  ;;  %2490 = vmatpush3.bf16.msra.mxu0 %v2489_v48 }
 0x37f   : > { %2491 = vmatprep.subr.bf16.mxu0 %v2922_v1 }
 0x382   : > { %v3638_v13 = vpop.permute.xlu1 %1376  ;;  %v3640_v53 = vpop.permute.xlu0 %1393 }
 0x383   : > { %4043 = vst [vmem:[#allocation64_spill] sm:$0xff] %v3640_v53  ;;  %v1088_v53 = vrot.slane %v1086_v20, 3 }
 0x386   : > { %v3642_v39 = vpop.permute.xlu1 %1461  ;;  %v3644_v21 = vpop.permute.xlu0 %1478 }
 0x387   : > { %4044 = vst [vmem:[#allocation65_spill] sm:$0xff] %v3642_v39  ;;  %4045 = vst [vmem:[#allocation66_spill] sm:$0xff] %v3644_v21 }
 0x38a   : > { %v3646_v60 = vpop.permute.xlu1 %1546  ;;  %v1075_v30 = vpop.permute.xlu0 %1074 }
 0x38b   : > { %4046 = vst [vmem:[#allocation67_spill] sm:$0xff] %v3646_v60  ;;  %v1077_v56 = vmul.f32 %v1075_v30, %v3309_v47  ;;  %v1209_v30 = vmul.f32 %v1207_v14, %v3371_v27 }
 0x38d   : > { %v1079_v42 = vrot.slane %v1077_v56, 2 }
 0x38e   : > { %v3651_v7 = vpop.permute.xlu1 %1597  ;;  %v3653_v52 = vpop.permute.xlu0 %1529 }
 0x38f   : > { %4047 = vst [vmem:[#allocation68_spill] sm:$0xff] %v3651_v7  ;;  %4048 = vst [vmem:[#allocation69_spill] sm:$0xff] %v3653_v52  ;;  %v1081_v1 = vadd.f32 %v1079_v42, %v3567_v4  ;;  %v1200_v7 = vmul.f32 %v3509_v16, %v3388_v38 }
 0x391   : > { %v1090_v48 = vadd.f32 %v1088_v53, %v1081_v1 }
 0x392   : > { %v1017_v39 = vpop.permute.xlu1 %1016  ;;  %v3656_v50 = vpop.permute.xlu0 %1551 }
 0x393   : > { %v1163_v60 = vmul.f32 %v3289_v29, %v1090_v48  ;;  %v1197_v21 = vmul.f32 %v3326_v63, %v1090_v48  ;;  %v1180_v32 = vmul.f32 %v3517_v18, %v1090_v48  ;;  %v1214_v56 = vmul.f32 %v3571_v15, %v1090_v48 }
 0x395   : > { %v1164_v20 = vadd.f32 %v1163_v60, %v3380_v35  ;;  %v1198_v4 = vadd.f32 %v1197_v21, %v3383_v36  ;;  %v1181_v53 = vadd.f32 %v1180_v32, %v3580_v6  ;;  %v1215_v29 = vadd.f32 %v1214_v56, %v1209_v30 }
 0x396   : > { %v1184_v42 = vpop.permute.xlu1 %1183  ;;  %v3668_v1 = vpop.permute.xlu0 %1563  ;;  %v1152_v36 = vmul.f32 %v3563_v55, %v3388_v38  ;;  %v1115_v55 = vmul.f32 %v3618_v59, %v3309_v47 }
 0x397   : > { %v1186_v63 = vmul.f32 %v1184_v42, %v3388_v38  ;;  %v1167_v18 = vadd.f32 %v3393_v41, %v1164_v20  ;;  %v1201_v27 = vadd.f32 %v1200_v7, %v1198_v4  ;;  %v1120_v20 = vmul.f32 %v3547_v33, %v3309_v47 }
 0x399   : > { %v1187_v14 = vadd.f32 %v1186_v63, %v1181_v53  ;;  %v1122_v4 = vrot.slane %v1120_v20, 1  ;;  %v1138_v53 = vmul.f32 %v3626_v51, %v3309_v47 }
 0x39a   : > { %v1269_v15 = vpop.permute.xlu1 %1268  ;;  %v3672_v52 = vpop.permute.xlu0 %1602 }
 0x39b   : > { %v1124_v63 = vadd.f32 %v1122_v4, %v1115_v55 }
 0x39e   : > { %v3674_v16 = vpop.permute.xlu1 %1353  ;;  %v1147_v35 = vpop.permute.xlu0 %1146 }
 0x39f   : > { %v1149_v60 = vmul.f32 %v1147_v35, %v1090_v48 }
 0x3a1   : > { %v1150_v6 = vadd.f32 %v1149_v60, %v3386_v37 }
 0x3a2   : > { %v3679_v21 = vpop.permute.xlu1 %1438  ;;  %v1232_v32 = vpop.permute.xlu0 %1231 }
 0x3a3   : > { %v3681_v30 = vadd.f32 %v1152_v36, %v1150_v6  ;;  %v1140_v6 = vrot.slane %v1138_v53, 3 }
 0x3a6   : > { %v3683_v41 = vpop.permute.xlu1 %1523  ;;  %v3685_v7 = vpop.permute.xlu0 %1614 }
 0x3aa   : > { %v3687_v56 = vpop.permute.xlu1 %1608  ;;  %v3691_v48 = vpop.permute.xlu0 %1636 }
 0x3ab   : > { %4049 = vst [vmem:[#allocation70_spill] sm:$0xff] %v3687_v56  ;;  %4050 = vst [vmem:[#allocation71_spill] sm:$0xff] %v3691_v48 }
 0x3ae   : > { %v1127_v37 = vpop.permute.xlu1 %1126  ;;  %v1032_v60 = vpop.permute.xlu0 %1031 }
 0x3af   : > { %v1129_v42 = vmul.f32 %v1127_v37, %v3309_v47 }
 0x3b1   : > { %v1131_v35 = vrot.slane %v1129_v42, 2 }
 0x3b2   : > { %v3698_v36 = vpop.permute.xlu1 %1316  ;;  %v3708_v37 = vpop.permute.xlu0 %1486 }
 0x3b3   : > { %v1133_v56 = vadd.f32 %v1131_v35, %v1124_v63  ;;  %v1019_v63 = vmul.f32 %v1017_v39, %v3309_v47 }
 0x3b5   : > { %v3700_v33 = vadd.f32 %v1140_v6, %v1133_v56  ;;  %v1014_v56 = vmul.f32 %v3445_v57, %v3309_v47 }
 0x3b6   : > { %v1218_v48 = vpop.permute.xlu1 %1217 }
 0x3b7   : > { %v1169_v59 = vmul.f32 %v3362_v22, %v3700_v33  ;;  %v1192_v20 = vmul.f32 %v3604_v26, %v3700_v33  ;;  %v1203_v51 = vmul.f32 %v3403_v43, %v3700_v33  ;;  %v1220_v55 = vmul.f32 %v1218_v48, %v3388_v38 }
 0x3b8   : > { %v1226_v22 = vmul.f32 %v3632_v54, %v3700_v33 }
 0x3b9   : > { %v1170_v4 = vadd.f32 %v1169_v59, %v1167_v18  ;;  %v1193_v42 = vadd.f32 %v1192_v20, %v1187_v14  ;;  %v1204_v53 = vadd.f32 %v1203_v51, %v1201_v27  ;;  %v1221_v35 = vadd.f32 %v1220_v55, %v1215_v29  ;;  %v1241_v20 = vpop.permute.xlu0 %1240 }
 0x3ba   : > { %v3716_v26 = vpop.permute.xlu1 %1631  ;;  %v1025_v27 = vmul.f32 %v3495_v8, %v3309_v47 }
 0x3bb   : > { %v1246_v43 = vmul.f32 %v3338_v10, %v1170_v4  ;;  %v1248_v6 = vmul.f32 %v3296_v34, %v1193_v42  ;;  %v1260_v38 = vmul.f32 %v3586_v62, %v1170_v4  ;;  %v1265_v18 = vmul.f32 %v3527_v23, %v1193_v42 }
 0x3bc   : > { %v1280_v57 = vmul.f32 %v3408_v44, %v1170_v4  ;;  %v1227_v39 = vadd.f32 %v1226_v22, %v1221_v35  ;;  %v1229_v14 = vmul.f32 %v3473_v2, %v1170_v4  ;;  %v1282_v48 = vmul.f32 %v3333_v9, %v1193_v42 }
 0x3bd   : > { %v1249_v54 = vadd.f32 %v1248_v6, %v1246_v43  ;;  %v1266_v29 = vadd.f32 %v1265_v18, %v1260_v38  ;;  %v1234_v59 = vmul.f32 %v1232_v32, %v1193_v42  ;;  %v1021_v10 = vrot.slane %v1019_v63, 1 }
 0x3be   : > { %v1254_v34 = vmul.f32 %v3373_v31, %v1227_v39  ;;  %v1277_v62 = vmul.f32 %v3612_v25, %v1227_v39  ;;  %v1237_v23 = vmul.f32 %v3511_v17, %v1204_v53  ;;  %v1303_v51 = vpop.permute.xlu1 %1302  ;;  %v1243_v55 = vmul.f32 %v1241_v20, %v1227_v39  ;;  %v4051_v20 = vld [vmem:[#allocation61_spill] sm:$0xff] }
 0x3bf   : > { %v1235_v8 = vadd.f32 %v1234_v59, %v1229_v14  ;;  %v1251_v44 = vmul.f32 %v3458_v61, %v1204_v53  ;;  %v1271_v22 = vmul.f32 %v1269_v15, %v1204_v53  ;;  %v1285_v2 = vmul.f32 %v3529_v24, %v1204_v53 }
 0x3c0   : > { %v1294_v35 = vmul.f32 %v3634_v11, %v1170_v4  ;;  %v1299_v9 = vmul.f32 %v3577_v58, %v1193_v42  ;;  %v1305_v32 = vmul.f32 %v1303_v51, %v1204_v53  ;;  %v1283_v25 = vadd.f32 %v1282_v48, %v1280_v57 }
 0x3c1   : > { %v1238_v63 = vadd.f32 %v1237_v23, %v1235_v8  ;;  %v1252_v31 = vadd.f32 %v1251_v44, %v1249_v54  ;;  %v1272_v43 = vadd.f32 %v1271_v22, %v1266_v29  ;;  %v1023_v6 = vadd.f32 %v1021_v10, %v1014_v56  ;;  %v4053_v8 = vld [vmem:[#allocation22_spill] sm:$0xff]  ;;  %v4054_v22 = vld [vmem:[#allocation49_spill] sm:$0xff] }
 0x3c2   : > { %v1288_v17 = vmul.f32 %v3410_v45, %v1227_v39  ;;  %v1300_v38 = vadd.f32 %v1299_v9, %v1294_v35  ;;  %v1402_v18 = vpop.permute.xlu1 %1401  ;;  %v1286_v59 = vadd.f32 %v1285_v2, %v1283_v25  ;;  %v1034_v24 = vmul.f32 %v1032_v60, %v3309_v47  ;;  %v4057_v25 = vld [vmem:[#allocation24_spill] sm:$0xff] }
 0x3c3   : > { %v3735_v14 = vadd.f32 %v1243_v55, %v1238_v63  ;;  %v1255_v61 = vadd.f32 %v1254_v34, %v1252_v31  ;;  %v1278_v15 = vadd.f32 %v1277_v62, %v1272_v43  ;;  %v1311_v11 = vmul.f32 %v3636_v3, %v1227_v39  ;;  %v4056_v31 = vld [vmem:[#allocation46_spill] sm:$0xff] }
 0x3c4   : > { %v1306_v58 = vadd.f32 %v1305_v32, %v1300_v38  ;;  %v1027_v4 = vrot.slane %v1025_v27, 2  ;;  %v1289_v42 = vadd.f32 %v1288_v17, %v1286_v59  ;;  %v1036_v27 = vrot.slane %v1034_v24, 3  ;;  %v4055_v32 = vld [vmem:[#allocation41_spill] sm:$0xff]  ;;  %v4059_v59 = vld [vmem:[#allocation28_spill] sm:$0xff] }
 0x3c5   : > { %v1331_v53 = vmul.f32 %v3346_v12, %v1255_v61  ;;  %v1333_v56 = vmul.f32 %v3302_v46, %v1278_v15  ;;  %v1345_v45 = vmul.f32 %v3594_v19, %v1255_v61  ;;  %v1350_v54 = vmul.f32 %v3537_v28, %v1278_v15  ;;  %v4058_v17 = vld [vmem:[#allocation57_spill] sm:$0xff] }
 0x3c6   : > { %v3741_v57 = vadd.f32 %v1311_v11, %v1306_v58  ;;  %v1379_v29 = vmul.f32 %v3638_v13, %v1255_v61  ;;  %v1388_v48 = vpop.permute.xlu1 %1387  ;;  %v1029_v10 = vadd.f32 %v1027_v4, %v1023_v6  ;;  %v1336_v3 = vmul.f32 %v3466_v0, %v1289_v42  ;;  %v4060_v11 = vld [vmem:[#allocation20_spill] sm:$0xff] }
 0x3c7   : > { %v1334_v47 = vadd.f32 %v1333_v56, %v1331_v53  ;;  %v1384_v60 = vmul.f32 %v3588_v5, %v1278_v15  ;;  %v1351_v46 = vadd.f32 %v1350_v54, %v1345_v45  ;;  %v1356_v39 = vmul.f32 %v3674_v16, %v1289_v42  ;;  %v4052_v5 = vld [vmem:[#allocation64_spill] sm:$0xff]  ;;  %v4062_v53 = vld [vmem:[#allocation23_spill] sm:$0xff] }
 0x3c8   : > { %v1339_v12 = vmul.f32 %v3390_v40, %v3741_v57  ;;  %v1390_v28 = vmul.f32 %v1388_v48, %v1289_v42  ;;  %v1365_v13 = vmul.f32 %v3416_v49, %v1255_v61  ;;  %v1362_v0 = vmul.f32 %v4051_v20, %v3741_v57  ;;  %v4061_v4 = vld [vmem:[#allocation48_spill] sm:$0xff] }
 0x3c9   : > { %v1337_v19 = vadd.f32 %v1336_v3, %v1334_v47  ;;  %v1385_v34 = vadd.f32 %v1384_v60, %v1379_v29  ;;  %v1357_v62 = vadd.f32 %v1356_v39, %v1351_v46  ;;  %v1396_v23 = vmul.f32 %v4052_v5, %v3741_v57  ;;  %v4066_v5 = vld [vmem:[#allocation44_spill] sm:$0xff] }
 0x3ca   : > { %v1156_v51 = vpop.permute.xlu1 %1155  ;;  %v1367_v40 = vmul.f32 %v4053_v8, %v1278_v15  ;;  %v1370_v2 = vmul.f32 %v4054_v22, %v1289_v42  ;;  %v1314_v49 = vmul.f32 %v4055_v32, %v1255_v61  ;;  %v1319_v63 = vmul.f32 %v3698_v36, %v1278_v15  ;;  %v4063_v15 = vld [vmem:[#allocation27_spill] sm:$0xff] }
 0x3cb   : > { %v1340_v55 = vadd.f32 %v1339_v12, %v1337_v19  ;;  %v1391_v44 = vadd.f32 %v1390_v28, %v1385_v34  ;;  %v1158_v16 = vmul.f32 %v1156_v51, %v3700_v33  ;;  %v1363_v35 = vadd.f32 %v1362_v0, %v1357_v62  ;;  %v4064_v34 = vld [vmem:[#allocation65_spill] sm:$0xff]  ;;  %v4065_v62 = vld [vmem:[#allocation55_spill] sm:$0xff]  ;;  %v4067_v51 = vld [vmem:[#allocation26_spill] sm:$0xff] }
 0x3cc   : > { %v1368_v9 = vadd.f32 %v1367_v40, %v1365_v13  ;;  %v1373_v48 = vmul.f32 %v4063_v15, %v3741_v57  ;;  %v1038_v46 = vadd.f32 %v1036_v27, %v1029_v10  ;;  %v1674_v39 = vrot.slane %v3735_v14, 6  ;;  %v4068_v40 = vld [vmem:[#allocation63_spill] sm:$0xff] }
 0x3cd   : > { %v1399_v43 = vmul.f32 %v4056_v31, %v1340_v55  ;;  %v1416_v6 = vmul.f32 %v4057_v25, %v1340_v55  ;;  %v1430_v38 = vmul.f32 %v4058_v17, %v1340_v55  ;;  %v1450_v24 = vmul.f32 %v4059_v59, %v1340_v55  ;;  %v4072_v31 = vld [vmem:[#allocation29_spill] sm:$0xff] }
 0x3ce   : > { %v1418_v58 = vmul.f32 %v4060_v11, %v1363_v35  ;;  %v1435_v33 = vmul.f32 %v4061_v4, %v1363_v35  ;;  %v1452_v56 = vmul.f32 %v4062_v53, %v1363_v35  ;;  %v1404_v45 = vmul.f32 %v1402_v18, %v1363_v35  ;;  %v1473_v54 = vpop.permute.xlu1 %1472  ;;  %v1326_v18 = vpop.permute.xlu0 %1325 }
 0x3cf   : > { %v3768_v29 = vadd.f32 %v1396_v23, %v1391_v44  ;;  %v1159_v36 = vadd.f32 %v1158_v16, %v3681_v30  ;;  %v1371_v61 = vadd.f32 %v1370_v2, %v1368_v9  ;;  %v1464_v28 = vmul.f32 %v4064_v34, %v1340_v55  ;;  %v4069_v44 = vld [vmem:[#allocation36_spill] sm:$0xff] }
 0x3d0   : > { %v1419_v47 = vadd.f32 %v1418_v58, %v1416_v6  ;;  %v1436_v3 = vadd.f32 %v1435_v33, %v1430_v38  ;;  %v1453_v60 = vadd.f32 %v1452_v56, %v1450_v24  ;;  %v1405_v12 = vadd.f32 %v1404_v45, %v1399_v43  ;;  %v4070_v2 = vld [vmem:[#allocation52_spill] sm:$0xff]  ;;  %v4073_v38 = vld [vmem:[#allocation66_spill] sm:$0xff]  ;;  %v4074_v56 = vld [vmem:[#allocation25_spill] sm:$0xff] }
 0x3d1   : > { %v1671_v19 = vrot.slane %v1159_v36, 7  ;;  %v1374_v13 = vadd.f32 %v1373_v48, %v1371_v61  ;;  %v1469_v20 = vmul.f32 %v4065_v62, %v1363_v35  ;;  %v1320_v30 = vadd.f32 %v1319_v63, %v1314_v49  ;;  %v4071_v49 = vld [vmem:[#allocation60_spill] sm:$0xff]  ;;  %v4076_v61 = vld [vmem:[#allocation59_spill] sm:$0xff] }
 0x3d2   : > { %v3776_v0 = vpop.permute.xlu1 %1571  ;;  %v1322_v23 = vmul.f32 %v4066_v5, %v1289_v42  ;;  %v1424_v8 = vmul.f32 %v4067_v51, %v3768_v29  ;;  %v1447_v10 = vmul.f32 %v4068_v40, %v3768_v29  ;;  %v1328_v27 = vmul.f32 %v1326_v18, %v3741_v57  ;;  %v4080_v18 = vld [vmem:[#allocation67_spill] sm:$0xff] }
 0x3d3   : > { %v1692_v14 = vsel %vm1691_vm2, %v1038_v46, %v1671_v19  ;;  %v1421_v16 = vmul.f32 %v4069_v44, %v1374_v13  ;;  %v1441_v22 = vmul.f32 %v3679_v21, %v1374_v13  ;;  %v1455_v35 = vmul.f32 %v4070_v2, %v1374_v13 }
 0x3d4   : > { %v1694_v55 = vsel %vm1693_vm3, %v1692_v14, %v1674_v39  ;;  %v1470_v9 = vadd.f32 %v1469_v20, %v1464_v28  ;;  %v1475_v42 = vmul.f32 %v1473_v54, %v1374_v13  ;;  %v1323_v32 = vadd.f32 %v1322_v23, %v1320_v30  ;;  %v4075_v54 = vld [vmem:[#allocation21_spill] sm:$0xff]  ;;  %v4079_v39 = vld [vmem:[#allocation51_spill] sm:$0xff]  ;;  %v3807_v20 = vpop.permute.xlu0 %1656  ;;  %v4081_v23 = vld [vmem:[#allocation30_spill] sm:$0xff] }
 0x3d5   : > { %v1407_v63 = vmul.f32 %v4071_v49, %v1374_v13  ;;  %v1458_v43 = vmul.f32 %v4072_v31, %v3768_v29  ;;  %v1422_v25 = vadd.f32 %v1421_v16, %v1419_v47  ;;  %v1442_v6 = vadd.f32 %v1441_v22, %v1436_v3  ;;  %v4077_v47 = vld [vmem:[#allocation32_spill] sm:$0xff]  ;;  %v4083_v14 = vld [vmem:[#allocation69_spill] sm:$0xff]  ;;  %v4085_v49 = vld [vmem:[#allocation34_spill] sm:$0xff] }
 0x3d6   : > { %v1456_v17 = vadd.f32 %v1455_v35, %v1453_v60  ;;  %v1558_v57 = vpop.permute.xlu1 %1557  ;;  %v1481_v59 = vmul.f32 %v4073_v38, %v3768_v29  ;;  %v1476_v24 = vadd.f32 %v1475_v42, %v1470_v9  ;;  %v1329_v11 = vadd.f32 %v1328_v27, %v1323_v32  ;;  %v4078_v60 = vld [vmem:[#allocation37_spill] sm:$0xff]  ;;  %v4084_v35 = vld [vmem:[#allocation54_spill] sm:$0xff] }
 0x3d7   : > { %v3794_v21 = vadd.f32 %v1407_v63, %v1405_v12  ;;  %v1425_v58 = vadd.f32 %v1424_v8, %v1422_v25  ;;  %v1448_v4 = vadd.f32 %v1447_v10, %v1442_v6  ;;  %v4082_v8 = vld [vmem:[#allocation33_spill] sm:$0xff]  ;;  %v4086_v31 = vld [vmem:[#allocation42_spill] sm:$0xff] }
 0x3d8   : > { %v1459_v33 = vadd.f32 %v1458_v43, %v1456_v17  ;;  %v1482_v53 = vadd.f32 %v1481_v59, %v1476_v24  ;;  %v1677_v19 = vrot.slane %v1329_v11, 5  ;;  %v4088_v38 = vld [vmem:[#allocation53_spill] sm:$0xff]  ;;  %v4089_v11 = vld [vmem:[#allocation31_spill] sm:$0xff] }
 0x3d9   : > { %v1501_v45 = vmul.f32 %v4074_v56, %v1425_v58  ;;  %v1503_v36 = vmul.f32 %v4075_v54, %v1448_v4  ;;  %v1515_v15 = vmul.f32 %v4076_v61, %v1425_v58  ;;  %v1520_v12 = vmul.f32 %v4079_v39, %v1448_v4 }
 0x3da   : > { %v3799_v48 = vpop.permute.xlu1 %1648  ;;  %v1509_v3 = vmul.f32 %v4077_v47, %v1482_v53  ;;  %v1506_v46 = vmul.f32 %v4078_v60, %v1459_v33  ;;  %v1526_v28 = vmul.f32 %v3683_v41, %v1459_v33  ;;  %v1549_v13 = vmul.f32 %v4080_v18, %v1425_v58  ;;  %v4091_v47 = vld [vmem:[#allocation35_spill] sm:$0xff] }
 0x3db   : > { %v1504_v34 = vadd.f32 %v1503_v36, %v1501_v45  ;;  %v1554_v62 = vmul.f32 %v3656_v50, %v1448_v4  ;;  %v1521_v30 = vadd.f32 %v1520_v12, %v1515_v15  ;;  %v1560_v5 = vmul.f32 %v1558_v57, %v1459_v33  ;;  %v4087_v57 = vld [vmem:[#allocation47_spill] sm:$0xff]  ;;  %v4090_v45 = vld [vmem:[#allocation68_spill] sm:$0xff]  ;;  %v1496_v36 = vpop.permute.xlu0 %1495 }
 0x3dc   : > { %v1535_v51 = vmul.f32 %v4081_v23, %v1425_v58  ;;  %v1537_v40 = vmul.f32 %v4082_v8, %v1448_v4  ;;  %v1532_v27 = vmul.f32 %v4083_v14, %v1482_v53  ;;  %v1566_v16 = vmul.f32 %v3668_v1, %v1482_v53  ;;  %v4093_v60 = vld [vmem:[#allocation43_spill] sm:$0xff]  ;;  %v4098_v23 = vld [vmem:[#allocation56_spill] sm:$0xff] }
 0x3dd   : > { %v1507_v10 = vadd.f32 %v1506_v46, %v1504_v34  ;;  %v1555_v44 = vadd.f32 %v1554_v62, %v1549_v13  ;;  %v1527_v41 = vadd.f32 %v1526_v28, %v1521_v30  ;;  %v1540_v9 = vmul.f32 %v4084_v35, %v1459_v33  ;;  %v4094_v34 = vld [vmem:[#allocation39_spill] sm:$0xff]  ;;  %v4095_v13 = vld [vmem:[#allocation70_spill] sm:$0xff]  ;;  %v4096_v62 = vld [vmem:[#allocation40_spill] sm:$0xff] }
 0x3de   : > { %v1643_v22 = vpop.permute.xlu1 %1642  ;;  %v1538_v2 = vadd.f32 %v1537_v40, %v1535_v51  ;;  %v3815_v50 = vsel %vm1695_vm4, %v1694_v55, %v1677_v19  ;;  %v1543_v63 = vmul.f32 %v4085_v49, %v1482_v53  ;;  %v1484_v43 = vmul.f32 %v4086_v31, %v1425_v58 }
 0x3df   : > { %v1510_v42 = vadd.f32 %v1509_v3, %v1507_v10  ;;  %v1561_v32 = vadd.f32 %v1560_v5, %v1555_v44  ;;  %v1533_v25 = vadd.f32 %v1532_v27, %v1527_v41  ;;  %v1489_v17 = vmul.f32 %v3708_v37, %v1448_v4  ;;  %v4092_v37 = vld [vmem:[#allocation38_spill] sm:$0xff]  ;;  %v4099_v10 = vld [vmem:[#allocation71_spill] sm:$0xff] }
 0x3e0   : > { %v1541_v6 = vadd.f32 %v1540_v9, %v1538_v2  ;;  %v1492_v1 = vmul.f32 %v4087_v57, %v1459_v33  ;;  %v1498_v39 = vmul.f32 %v1496_v36, %v1482_v53  ;;  %v4097_v5 = vld [vmem:[#allocation58_spill] sm:$0xff] }
 0x3e1   : > { %v1569_v59 = vmul.f32 %v4088_v38, %v1510_v42  ;;  %v1567_v24 = vadd.f32 %v1566_v16, %v1561_v32  ;;  %v1586_v56 = vmul.f32 %v4089_v11, %v1510_v42  ;;  %v1600_v55 = vmul.f32 %v4090_v45, %v1510_v42  ;;  %v4100_v9 = vld [vmem:[#allocation62_spill] sm:$0xff] }
 0x3e2   : > { %v1411_v54 = vpop.permute.xlu1 %1410  ;;  %v1574_v61 = vmul.f32 %v3776_v0, %v1533_v25  ;;  %v1544_v15 = vadd.f32 %v1543_v63, %v1541_v6  ;;  %v1588_v58 = vmul.f32 %v4091_v47, %v1533_v25  ;;  %v1605_v3 = vmul.f32 %v3672_v52, %v1533_v25 }
 0x3e3   : > { %v1594_v4 = vmul.f32 %v4092_v37, %v1567_v24  ;;  %v1617_v33 = vmul.f32 %v3685_v7, %v1567_v24  ;;  %v1620_v46 = vmul.f32 %v4093_v60, %v1510_v42  ;;  %v1622_v30 = vmul.f32 %v4096_v62, %v1533_v25  ;;  %v1794_v37 = vld [vmem:[#allocation9 + $0x30] sm:$0xff] }
 0x3e4   : > { %v1575_v12 = vadd.f32 %v1574_v61, %v1569_v59  ;;  %v1589_v19 = vadd.f32 %v1588_v58, %v1586_v56  ;;  %v1591_v28 = vmul.f32 %v4094_v34, %v1544_v15  ;;  %v1606_v18 = vadd.f32 %v1605_v3, %v1600_v55  ;;  %v1666_v55 = vpop.permute.xlu0 %1665 }
 0x3e5   : > { %v1611_v0 = vmul.f32 %v4095_v13, %v1544_v15  ;;  %v1625_v52 = vmul.f32 %v4097_v5, %v1544_v15  ;;  %v1628_v51 = vmul.f32 %v4098_v23, %v1567_v24  ;;  %v1634_v7 = vmul.f32 %v3716_v26, %v1510_v42  ;;  %v1894_v23 = vld [vmem:[#allocation11 + $0x18] sm:$0xff] }
 0x3e6   : > { %v1581_v8 = vpop.permute.xlu1 %1580  ;;  %v1592_v40 = vadd.f32 %v1591_v28, %v1589_v19  ;;  %v1639_v53 = vmul.f32 %v4099_v10, %v1533_v25  ;;  %v1645_v14 = vmul.f32 %v1643_v22, %v1544_v15  ;;  %v1623_v44 = vadd.f32 %v1622_v30, %v1620_v46  ;;  %v4101_v25 = vld [vmem:[#allocation45_spill] sm:$0xff]  ;;  %v1896_v10 = vld [vmem:[#allocation11 + $0x28] sm:$0xff] }
 0x3e7   : > { %v1612_v27 = vadd.f32 %v1611_v0, %v1606_v18  ;;  %v1413_v16 = vmul.f32 %v1411_v54, %v3768_v29  ;;  %v1490_v41 = vadd.f32 %v1489_v17, %v1484_v43  ;;  %v1577_v32 = vmul.f32 %v4100_v9, %v1544_v15  ;;  %v2657_v19 = vld [vmem:[%s3224_s26] sm:$0xff]  ;;  %v1899_v9 = vld [vmem:[#allocation11 + $0x40] sm:$0xff]  ;;  %s2832_s26 = sshll.u32 %s2924_s12, 4  ;;  %s2833_s26 = int_to_ptr.vmem [resolvable:$false] %s2832_s26 }
 0x3e8   : > { %v1595_v2 = vadd.f32 %v1594_v4, %v1592_v40  ;;  %v1640_v35 = vadd.f32 %v1639_v53, %v1634_v7  ;;  %v1583_v49 = vmul.f32 %v1581_v8, %v1567_v24  ;;  %v1626_v31 = vadd.f32 %v1625_v52, %v1623_v44  ;;  %v1795_v4 = vld [vmem:[#allocation9 + $0x38] sm:$0xff]  ;;  %v1892_v52 = vld [vmem:[#allocation11 + $0x8] sm:$0xff]  ;;  %v1891_v8 = vld [vmem:[#allocation11] sm:$0xff]  ;;  %s2834_s30 = scalar_lea.vmem %s2833_s26, 256  ;;  %p2835_p12 = scmp.lt.s32.totalorder %s3877_s7, %s2833_s26 }
 0x3e9   : > { %v1618_v63 = vadd.f32 %v1617_v33, %v1612_v27  ;;  %v1414_v26 = vadd.f32 %v1413_v16, %v3794_v21  ;;  %v1493_v42 = vadd.f32 %v1492_v1, %v1490_v41  ;;  %v1651_v22 = vmul.f32 %v3799_v48, %v1567_v24  ;;  %v4102_v21 = vld [vmem:[#allocation50_spill] sm:$0xff]  ;;  %v1893_v40 = vld [vmem:[#allocation11 + $0x10] sm:$0xff]  ;;  %v1898_v53 = vld [vmem:[#allocation11 + $0x38] sm:$0xff]  ;;  %p2836_p13 = scmp.lt.s32.totalorder %s2834_s30, %s2828_s23 }
 0x3ea   : > { %v1654_v6 = vmul.f32 %v4101_v25, %v1595_v2  ;;  %v1646_v57 = vadd.f32 %v1645_v14, %v1640_v35  ;;  %v1578_v29 = vadd.f32 %v1577_v32, %v1575_v12  ;;  %v1629_v43 = vadd.f32 %v1628_v51, %v1626_v31  ;;  %v1895_v14 = vld [vmem:[#allocation11 + $0x20] sm:$0xff]  ;;  %v1897_v44 = vld [vmem:[#allocation11 + $0x30] sm:$0xff]  ;;  %v1900_v16 = vld [vmem:[#allocation11 + $0x48] sm:$0xff] }
 0x3eb   : > { %v1659_v17 = vmul.f32 %v3807_v20, %v1618_v63  ;;  %v1680_v38 = vrot.slane %v1414_v26, 4  ;;  %v1499_v59 = vadd.f32 %v1498_v39, %v1493_v42  ;;  %v2492_v33 = vpack.c.bf16 %v1795_v4, %v1794_v37  ;;  %v1902_v41 = vld [vmem:[#allocation11 + $0x58] sm:$0xff]  ;;  %v1901_v32 = vld [vmem:[#allocation11 + $0x50] sm:$0xff]  ;;  %v1903_v26 = vld [vmem:[#allocation11 + $0x60] sm:$0xff]  ;;  %p2837_p3 = por %p2836_p13, %p2835_p12 }
 0x3ec   : > { %v1652_v11 = vadd.f32 %v1651_v22, %v1646_v57  ;;  %v1584_v56 = vadd.f32 %v1583_v49, %v1578_v29  ;;  %v1662_v1 = vmul.f32 %v4102_v21, %v1629_v43  ;;  %v2494_v51 = vpack.c.bf16 %v1894_v23, %v1892_v52  ;;  %v1904_v49 = vld [vmem:[#allocation11 + $0x68] sm:$0xff]  ;;  %v1906_v63 = vld [vmem:[#allocation11 + $0x78] sm:$0xff]  ;;  %v2015_v42 = vld [vmem:[#allocation12 + $0x80] sm:$0xff] }
 0x3ed   : > { %v1660_v45 = vadd.f32 %v1659_v17, %v1654_v6  ;;  %v1698_v48 = vsel %vm1697_vm5, %v3815_v50, %v1680_v38  ;;  %v1683_v24 = vrot.slane %v1499_v59, 3  ;;  %v4104_v50 = vmov 0.0   ;;  %2493 = vmatpush3.bf16.msra.mxu0 %v2492_v33  ;;  %v2016_v22 = vld [vmem:[#allocation12 + $0x88] sm:$0xff]  ;;  %v1905_v6 = vld [vmem:[#allocation11 + $0x70] sm:$0xff]  ;;  %v1999_v29 = vld [vmem:[#allocation12] sm:$0xff]  ;;  %p2838_p6 = pnand %p2837_p3, %p2831_p11 }
 0x3ee   : > { %v1686_v54 = vrot.slane %v1584_v56, 2  ;;  %v1668_v61 = vmul.f32 %v1666_v55, %v1652_v11  ;;  %v2496_v7 = vpack.c.bf16 %v1893_v40, %v1891_v8  ;;  %2495 = vmatprep.subr.bf16.mxu1 %v2494_v51  ;;  %v2498_v27 = vpack.c.bf16 %v1898_v53, %v1896_v10  ;;  %v2000_v43 = vld [vmem:[#allocation12 + $0x8] sm:$0xff]  ;;  %v2293_v21 = vld [vmem:[%s4105_s29] ss:$0 sm:$0xff]  ;;  %v2018_v55 = vld [vmem:[#allocation12 + $0x98] sm:$0xff] }
 0x3ef   : > { %v1663_v36 = vadd.f32 %v1662_v1, %v1660_v45  ;;  %v1700_v20 = vsel %vm1699_vm6, %v1698_v48, %v1683_v24  ;;  %v2500_v2 = vpack.c.bf16 %v1897_v44, %v1895_v14  ;;  %v2502_v35 = vpack.c.bf16 %v1902_v41, %v1900_v16  ;;  %v2017_v24 = vld [vmem:[#allocation12 + $0x90] sm:$0xff]  ;;  %v2022_v33 = vld [vmem:[#allocation12 + $0xb8] sm:$0xff]  ;;  %v2027_v8 = vld [vmem:[#allocation12 + $0xe0] sm:$0xff] }
 0x3f0   : > { %v1702_v15 = vsel %vm1701_vm7, %v1700_v20, %v1686_v54  ;;  %v2504_v31 = vpack.c.bf16 %v1901_v32, %v1899_v9  ;;  %v2506_v25 = vpack.c.bf16 %v1906_v63, %v1904_v49  ;;  %v2510_v57 = vpack.c.bf16 %v2016_v22, %v2015_v42  ;;  %v2021_v4 = vld [vmem:[#allocation12 + $0xb0] sm:$0xff]  ;;  %v2010_v51 = vld [vmem:[#allocation12 + $0x58] sm:$0xff]  ;;  %v2011_v10 = vld [vmem:[#allocation12 + $0x60] sm:$0xff] }
 0x3f1   : > { %v1669_v47 = vadd.f32 %v1668_v61, %v1663_v36  ;;  %v2512_v17 = vpack.c.bf16 %v2000_v43, %v1999_v29  ;;  %v2508_v38 = vpack.c.bf16 %v1905_v6, %v1903_v26  ;;  %v2514_v54 = vpack.c.bf16 %v2018_v55, %v2017_v24  ;;  %v2001_v36 = vld [vmem:[#allocation12 + $0x10] sm:$0xff]  ;;  %v2002_v61 = vld [vmem:[#allocation12 + $0x18] sm:$0xff]  ;;  %v2012_v53 = vld [vmem:[#allocation12 + $0x68] sm:$0xff] }
 0x3f2   : > { %2511 = vmatprep.subr.bf16.mxu0 %v2510_v57  ;;  %v2516_v20 = vpack.c.bf16 %v2002_v61, %v2001_v36  ;;  %v2009_v23 = vld [vmem:[#allocation12 + $0x50] sm:$0xff]  ;;  %v2030_v44 = vld [vmem:[#allocation12 + $0xf8] sm:$0xff]  ;;  %v2536_v16 = vpack.c.bf16 %v2012_v53, %v2011_v10 }
 0x3f3   : > { %v1689_v58 = vrot.slane %v1669_v47, 1  ;;  %v2020_v47 = vld [vmem:[#allocation12 + $0xa8] sm:$0xff]  ;;  %v2532_v40 = vpack.c.bf16 %v2010_v51, %v2009_v23 }
 0x3f5   : > { %v1704_v3 = vsel %vm1703_vm8, %v1702_v15, %v1689_v58  ;;  %v2019_v15 = vld [vmem:[#allocation12 + $0xa0] sm:$0xff] }
 0x3f6   : > { %1705 = vst.msk [vmem:[%s485_s25] sm:$0xff] %vm487_vm0, %v1704_v3  ;;  %2369 = vmatmul.mubr.msk.f32.vlgmr.msra.gmra.mrb[6].mxu1 %vm487_vm0, %v1704_v3  ;;  %v2518_v58 = vpack.c.bf16 %v2020_v47, %v2019_v15  ;;  %v2003_v3 = vld [vmem:[#allocation12 + $0x20] sm:$0xff]  ;;  %s2104_s25 = scalar_lea.sflag [#allocation5], %s3218_s13 }
 0x3f7   : > { %1974 = vmatprep.mubr.f32.mxu1 %v4104_v50  ;;  %2497 = vmatpush1.bf16.msra.mxu1 %v2496_v7  ;;  %v2004_v50 = vld [vmem:[#allocation12 + $0x28] sm:$0xff] }
 0x3f8   : > { %2499 = vmatprep.subr.bf16.mxu1 %v2498_v27  ;;  %v2520_v37 = vpack.c.bf16 %v2004_v50, %v2003_v3  ;;  %v2028_v7 = vld [vmem:[#allocation12 + $0xe8] sm:$0xff]  ;;  %v2029_v27 = vld [vmem:[#allocation12 + $0xf0] sm:$0xff] }
 0x3f9   : > { %v2534_v14 = vpack.c.bf16 %v2028_v7, %v2027_v8  ;;  %v2538_v41 = vpack.c.bf16 %v2030_v44, %v2029_v27 }
 0x3fb   : > { %2501 = vmatpush1.bf16.msra.mxu1 %v2500_v2  ;;  %v2013_v2 = vld [vmem:[#allocation12 + $0x70] sm:$0xff] }
 0x3fc   : > { %2503 = vmatprep.subr.bf16.mxu1 %v2502_v35  ;;  %v2014_v35 = vld [vmem:[#allocation12 + $0x78] sm:$0xff] }
 0x3fd   : > { %v2540_v9 = vpack.c.bf16 %v2014_v35, %v2013_v2 }
 0x3ff   : > { %2505 = vmatpush1.bf16.msra.mxu1 %v2504_v31 }
 0x400   : > { %2507 = vmatprep.subr.bf16.mxu1 %v2506_v25 }
 0x403   : > { %2509 = vmatpush1.bf16.msra.mxu1 %v2508_v38 }
 0x4c9   : > { %v1783_v60 = vpop.f32.mrb[6].mxu1 }
 0x4ca   : > { %v1787_v46 = vmul.f32 16.0, %v1783_v60  ;;  %v2370_v39 = vpop.f32.mrb[7].mxu1  ;;  %v2522_v60 = vpack.c.bf16 %v2022_v33, %v2021_v4 }
 0x4cb   : > { %v2006_v39 = vld [vmem:[#allocation12 + $0x38] sm:$0xff] }
 0x4cc   : > { %2388 = vmatmul.mubr.msk.f32.vlgmr.msra.gmra.mrb[4].mxu0 %vm487_vm0, %v1787_v46  ;;  %v2005_v46 = vld [vmem:[#allocation12 + $0x30] sm:$0xff] }
 0x4cd   : > { %2513 = vmatpush3.bf16.msra.mxu0 %v2512_v17 }
 0x4ce   : > { %2515 = vmatprep.subr.bf16.mxu0 %v2514_v54 }
 0x4d1   : > { %2517 = vmatpush3.bf16.msra.mxu0 %v2516_v20 }
 0x4d2   : > { %2519 = vmatprep.subr.bf16.mxu0 %v2518_v58 }
 0x4d5   : > { %2521 = vmatpush3.bf16.msra.mxu0 %v2520_v37 }
 0x4d6   : > { %2523 = vmatprep.subr.bf16.mxu0 %v2522_v60 }
 0x59f   : > { %v1865_v12 = vpop.f32.mrb[4].mxu0 }
 0x5a0   : > { %v3858_v34 = vadd.f32 %v2657_v19, %v1865_v12  ;;  %v2389_v28 = vpop.f32.mrb[5].mxu0  ;;  %v2524_v12 = vpack.c.bf16 %v2006_v39, %v2005_v46  ;;  %v2023_v19 = vld [vmem:[#allocation12 + $0xc0] sm:$0xff] }
 0x5a1   : > { %v2024_v28 = vld [vmem:[#allocation12 + $0xc8] sm:$0xff] }
 0x5a2   : > { %v1870_v18 = vsel %vm487_vm0, %v3858_v34, 0.0  ;;  %2525 = vmatpush3.bf16.msra.mxu0 %v2524_v12 }
 0x5a3   : > { %1871 = vadd.xlane.f32.xlu1 %v1870_v18  ;;  %v2526_v18 = vpack.c.bf16 %v2024_v28, %v2023_v19 }
 0x5a5   : > { %2527 = vmatprep.subr.bf16.mxu0 %v2526_v18 }
 0x630   : > { %v1872_v13 = vpop.xlane.xlu1 %1871 }
 0x631   : > { %v1873_v0 = vmul.f32 0.015625, %v1872_v13  ;;  %v2007_v13 = vld [vmem:[#allocation12 + $0x40] sm:$0xff] }
 0x633   : > { %v1874_v62 = vsub.f32 %v3858_v34, %v1873_v0  ;;  %v2008_v0 = vld [vmem:[#allocation12 + $0x48] sm:$0xff] }
 0x635   : > { %v1875_v30 = vmul.f32 %v1874_v62, %v1874_v62 }
 0x637   : > { %v1876_v5 = vsel %vm487_vm0, %v1875_v30, 0.0  ;;  %v2025_v30 = vld [vmem:[#allocation12 + $0xd0] sm:$0xff] }
 0x638   : > { %1877 = vadd.xlane.f32.xlu0 %v1876_v5  ;;  %v2026_v5 = vld [vmem:[#allocation12 + $0xd8] sm:$0xff] }
 0x639   : > { %v2530_v52 = vpack.c.bf16 %v2026_v5, %v2025_v30 }
 0x6c5   : > { %v1878_v59 = vpop.xlane.xlu0 %1877 }
 0x6c6   : > { %v1879_v11 = vmul.f32 0.015625, %v1878_v59 }
 0x6c8   : > { %v1880_v56 = vadd.f32 1e-05, %v1879_v11 }
 0x6ca   : > { %2651 = vrsqrt.f32 %v1880_v56 }
 0x6d4   : > { %v2652_v45 = vpop.eup %2651 }
 0x6d5   : > { %v1882_v1 = vmul.f32 %v2652_v45, %v1874_v62  ;;  %v2528_v62 = vpack.c.bf16 %v2008_v0, %v2007_v13 }
 0x6d7   : > { %v1890_v48 = vmul.f32 %v2293_v21, %v1882_v1  ;;  %2529 = vmatpush3.bf16.msra.mxu0 %v2528_v62 }
 0x6d8   : > { %2531 = vmatprep.subr.bf16.mxu0 %v2530_v52 }
 0x6d9   : > { %2294 = vmatmul.mubr.msk.f32.vlgmr.msra.gmra.mrb[8].mxu1 %vm487_vm0, %v1890_v48 }
 0x6db   : > { %2533 = vmatpush3.bf16.msra.mxu0 %v2532_v40 }
 0x6dc   : > { %2535 = vmatprep.subr.bf16.mxu0 %v2534_v14 }
 0x6df   : > { %2537 = vmatpush3.bf16.msra.mxu0 %v2536_v16 }
 0x6e0   : > { %2539 = vmatprep.subr.bf16.mxu0 %v2538_v41 }
 0x6e3   : > { %2541 = vmatpush3.bf16.msra.mxu0 %v2540_v9 }
 0x7ac   : > { %v1976_v32 = vpop.f32.mrb[8].mxu1 }
 0x7ad   : > { %v1981_v49 = vmul.f32 %v1976_v32, %v1976_v32  ;;  %v1978_v63 = vpop.f32.mrb[9].mxu1 }
 0x7ae   : > { %v1982_v31 = vmul.f32 %v1978_v63, %v1978_v63 }
 0x7af   : > { %v1983_v26 = vmul.f32 %v1981_v49, %v1976_v32 }
 0x7b0   : > { %v1984_v42 = vmul.f32 %v1982_v31, %v1978_v63 }
 0x7b1   : > { %v1985_v22 = vmul.f32 0.044715, %v1983_v26 }
 0x7b2   : > { %v1986_v25 = vmul.f32 0.044715, %v1984_v42 }
 0x7b3   : > { %v1987_v6 = vadd.f32 %v1985_v22, %v1976_v32 }
 0x7b4   : > { %v1988_v57 = vadd.f32 %v1986_v25, %v1978_v63 }
 0x7b5   : > { %v1989_v29 = vmul.f32 0.7978846, %v1987_v6 }
 0x7b6   : > { %v1990_v43 = vmul.f32 0.7978846, %v1988_v57 }
 0x7b7   : > { %2653 = vtanh.f32 %v1989_v29 }
 0x7b8   : > { %2655 = vtanh.f32 %v1990_v43 }
 0x7c1   : > { %v2654_v17 = vpop.eup %2653 }
 0x7c2   : > { %v2656_v38 = vpop.eup %2655  ;;  %v1993_v59 = vadd.f32 1.0, %v2654_v17 }
 0x7c3   : > { %v1994_v11 = vadd.f32 1.0, %v2656_v38 }
 0x7c4   : > { %v1995_v56 = vmul.f32 0.5, %v1993_v59 }
 0x7c5   : > { %v1996_v45 = vmul.f32 0.5, %v1994_v11 }
 0x7c6   : > { %v1997_v1 = vmul.f32 %v1995_v56, %v1976_v32 }
 0x7c7   : > { %v1998_v21 = vmul.f32 %v1996_v45, %v1978_v63 }
 0x7c9   : > { %2095 = vmatprep.mubr.f32.mxu0 %v1998_v21 }
 0x7ca   : > { %2096 = vmatmul.mubr.f32.vlgmr.msra.gmra.mrb[6].mxu0 %v1997_v1 }
 0x89d   : > { %v2349_v48 = vpop.f32.mrb[6].mxu0 }
 0x89e   : > { %v2350_v24 = vpop.f32.mrb[7].mxu0 }
 0x89f   : > { %v2351_v55 = vadd.f32 %v2350_v24, %v2349_v48 }
 0x8a1   : > { %v2101_v54 = vadd.f32 %v2351_v55, %v3858_v34 }
 0x8a3   : > { %2102 = vst.msk [vmem:[%s475_s27] sm:$0xff] %vm487_vm0, %v2101_v54 }
 0x8a4   : > { %2841 = shalt.err (!%p2838_p6)
}
 0x8a5   : > { %s2842_s13 = scalar_lea.hbm %s3875_s10, 128  ;;  %s2846_s27 = scalar_lea.hbm %s4106_s11, 256 }
 0x8a6   : > { %p2843_p9 = scmp.ne.s32.totalorder %s3875_s10, %s2842_s13  ;;  %p2847_p0 = scmp.lt.u32.totalorder %s3875_s10, %s4106_s11 }
 0x8a7   : > { %p2848_p5 = scmp.lt.u32.totalorder %s2846_s27, %s2842_s13  ;;  %p2850_p7 = scmp.lt.u32.totalorder %s2842_s13, %s3875_s10 }
 0x8a8   : > { %p2844_p4 = pnand %p2843_p9, %p4107_p10 }
 0x8a9   : > { %p2849_p2 = por %p2848_p5, %p2847_p0 }
 0x8aa   : > { %p2845_p8 = pneg %p2844_p4 }
 0x8ab   : > { %p2851_p1 = por %p2850_p7, %p2849_p2 }
 0x8ad   : > { %p2852_p11 = pnand %p2851_p1, %p2845_p8 }
 0x8af   : > { %2855 = shalt.err (!%p2852_p11)
}
 0x8b0   : > { %2564 = dma.vmem_to_hbm [thread:$0]  (%p4107_p10), %s3877_s7, 128, %s3875_s10, %s2104_s25  }
 0x8b1 PF: > { %s2136_s23 = sand.u32 1, %s2894_s17   ;;  %p4108_p12 = scmp.ne.s32.totalorder %s3989_s28, 0 }
 0x8b2   : > { %p4109_p13 = scmp.ge.s32.totalorder %s2906_s20, 2  ;;  %s2137_s12 = scalar_lea.sflag [#allocation5], %s2136_s23 }
 0x8b4   : > { %p2587_p3 = pnand %p4109_p13, %p4108_p12 }
 0x8b6   : > { %2889 = dma.done.wait (!%p2587_p3), %s2137_s12, 128  }
 0x8b7   : > { %2891 = vsyncadd (!%p2587_p3), %s2137_s12, 4294967168  ;;  %p28_p6 = scmp.ge.s32.totalorder %s3148_s16, 4   ;;  %s4110_s17 = smov %s2898_s18 }
 0x8b8   : > { %s4111_s18 = smov %s2902_s19  ;;  %s4112_s19 = smov %s3160_s14 }
 0x8b9   : > { %s4113_s20 = smov %s3148_s16  ;;  %30 = sbr.rel (!%p28_p6) target bundleno = 12 (0xc), region = 137 }
 0x8c0   :  { %2149 = vsyncpa [#allocation4], 1 }
 0x8c1   :  { %2151 = vsyncpa [#allocation4 + $0x1], 1 }
 0x8c2   :  { %2152 = vsyncpa [#allocation7], 1 }
 0x8c3   :  { %2153 = vsyncpa [#allocation10], 1 }
 0x8c4   :  { %2154 = vsyncpa [#allocation13], 1 }
 0x8c5   :  { %2155 = vsyncpa [#allocation5], 1 }
 0x8c6   :  { %2157 = vsyncpa [#allocation5 + $0x1], 1 }

</bundles_post_ra>
